<compile_context>
chip_gen: v6e
topology: v6e:2x2x1
jax: 0.10.0
libtpu: 0.0.40
codegen_flags: <defaults>
</compile_context>

<pallas_src>
import jax
import jax.numpy as jnp
from jax.experimental import pallas as pl
from jax.experimental.pallas import tpu as pltpu


def vae_forward_kernel(
    x_ref, eps_ref,
    w1_ref, b1_ref,        # encoder linear 1 : [image_size, h_dim] bf16, [1, h_dim] f32
    w2m_ref, b2m_ref,      # encoder head mu  : [h_dim, z_dim] bf16,      [1, z_dim] f32
    w2v_ref, b2v_ref,      # encoder head lv  : [h_dim, z_dim] bf16,      [1, z_dim] f32
    w3_ref, b3_ref,        # decoder linear 1 : [z_dim, h_dim] bf16,      [1, h_dim] f32
    w4_ref, b4_ref,        # decoder linear 2 : [h_dim, image_size] bf16, [1, image_size] f32
    recon_ref, mu_ref, logvar_ref,
):
    x = x_ref[...].astype(jnp.bfloat16)

    # ---- encoder ----
    h1 = jnp.dot(x, w1_ref[...], preferred_element_type=jnp.float32) + b1_ref[...]
    h1 = jnp.maximum(h1, 0.2 * h1)                         # LeakyReLU(0.2) -> single vmax
    h1b = h1.astype(jnp.bfloat16)

    mu = jnp.dot(h1b, w2m_ref[...], preferred_element_type=jnp.float32) + b2m_ref[...]
    logvar = jnp.dot(h1b, w2v_ref[...], preferred_element_type=jnp.float32) + b2v_ref[...]

    # ---- reparameterize: z = mu + exp(0.5*logvar) * eps ----
    std = jnp.exp(0.5 * logvar)                            # EUP
    z = mu + std * eps_ref[...]

    # ---- decoder ----
    d1 = jnp.dot(z.astype(jnp.bfloat16), w3_ref[...],
                 preferred_element_type=jnp.float32) + b3_ref[...]
    d1 = jnp.maximum(d1, 0.0)                              # ReLU
    d2 = jnp.dot(d1.astype(jnp.bfloat16), w4_ref[...],
                 preferred_element_type=jnp.float32) + b4_ref[...]

    # Sigmoid: exp on EUP, approx reciprocal also on EUP (frees VALU slots).
    recon_ref[...] = pl.reciprocal(1.0 + jnp.exp(-d2), approx=True)

    mu_ref[...] = mu
    logvar_ref[...] = logvar


def _pick_tile_b(B):
    for t in (256, 128, 64, 32, 16, 8):
        if B % t == 0:
            return t
    return B  # not a multiple of 8: single full-batch block (still legal)


def vae_forward(x, eps, params, *, tile_b=None):
    """Fused VAE forward. x: [B, image_size] f32, eps: [B, z_dim] f32."""
    B, image_size = x.shape
    z_dim = eps.shape[1]
    w1, b1, w2m, b2m, w2v, b2v, w3, b3, w4, b4 = params
    h_dim = w1.shape[1]

    if tile_b is None:
        tile_b = _pick_tile_b(B)
    assert B % tile_b == 0, "batch must be a multiple of the batch tile"
    grid = (B // tile_b,)

    def batch_spec(feat):
        # streamed activation tile: advances with the grid index
        return pl.BlockSpec((tile_b, feat), lambda i: (i, 0))

    def resident_spec(shape):
        # weights/biases: constant block index -> stay VMEM-resident
        return pl.BlockSpec(shape, lambda i: (0, 0))

    in_specs = [
        batch_spec(image_size),            # x
        batch_spec(z_dim),                 # eps
        resident_spec(w1.shape), resident_spec(b1.shape),
        resident_spec(w2m.shape), resident_spec(b2m.shape),
        resident_spec(w2v.shape), resident_spec(b2v.shape),
        resident_spec(w3.shape), resident_spec(b3.shape),
        resident_spec(w4.shape), resident_spec(b4.shape),
    ]
    out_specs = (
        batch_spec(image_size),            # reconstruction
        batch_spec(z_dim),                 # mu
        batch_spec(z_dim),                 # logvar
    )
    out_shapes = (
        jax.ShapeDtypeStruct((B, image_size), jnp.float32),
        jax.ShapeDtypeStruct((B, z_dim), jnp.float32),
        jax.ShapeDtypeStruct((B, z_dim), jnp.float32),
    )

    flops = 2 * B * (image_size * h_dim            # enc linear 1
                     + h_dim * 2 * z_dim           # enc heads (mu + logvar)
                     + z_dim * h_dim               # dec linear 1
                     + h_dim * image_size)         # dec linear 2
    transcendentals = B * (z_dim + image_size)     # exp(0.5*logvar) + sigmoid exp
    weight_bytes = sum(int(a.size) * a.dtype.itemsize
                       for a in (w1, b1, w2m, b2m, w2v, b2v, w3, b3, w4, b4))
    bytes_accessed = (x.size * 4 + eps.size * 4 + weight_bytes
                      + B * image_size * 4 + 2 * B * z_dim * 4)

    return pl.pallas_call(
        vae_forward_kernel,
        out_shape=out_shapes,
        grid=grid,
        in_specs=in_specs,
        out_specs=out_specs,
        compiler_params=pltpu.CompilerParams(
            dimension_semantics=("parallel",),          # megacore sharding on v7x
            vmem_limit_bytes=48 * 1024 * 1024,          # safe on v5e/v6e/v7x
        ),
        cost_estimate=pl.CostEstimate(
            flops=int(flops),
            transcendentals=int(transcendentals),
            bytes_accessed=int(bytes_accessed),
        ),
    )(x, eps, w1, b1, w2m, b2m, w2v, b2v, w3, b3, w4, b4)


def init_params(key, image_size, h_dim, z_dim):
    """Deterministic PyTorch-like uniform fan-in init.
    Weights are [in_features, out_features] (pre-transposed for x @ W), bf16.
    Biases are [1, out_features], f32.  The Linear(h_dim, 2*z_dim) head is
    created as two separate (mu, logvar) linears -- equivalent to chunk(dim=1)."""
    ks = jax.random.split(key, 10)

    def lin(kw, kb, fan_in, fan_out):
        bound = 1.0 / jnp.sqrt(jnp.float32(fan_in))
        w = jax.random.uniform(kw, (fan_in, fan_out), jnp.float32, -bound, bound)
        b = jax.random.uniform(kb, (1, fan_out), jnp.float32, -bound, bound)
        return w.astype(jnp.bfloat16), b

    w1, b1 = lin(ks[0], ks[1], image_size, h_dim)      # encoder[0]
    w2m, b2m = lin(ks[2], ks[3], h_dim, z_dim)         # encoder[2] (mu half)
    w2v, b2v = lin(ks[4], ks[5], h_dim, z_dim)         # encoder[2] (logvar half)
    w3, b3 = lin(ks[6], ks[7], z_dim, h_dim)           # decoder[0]
    w4, b4 = lin(ks[8], ks[9], h_dim, image_size)      # decoder[2]
    return (w1, b1, w2m, b2m, w2v, b2v, w3, b3, w4, b4)


def vae_forward_ref(x, eps, params):
    """Plain-JAX reference (same bf16 matmul inputs, f32 accumulation)."""
    w1, b1, w2m, b2m, w2v, b2v, w3, b3, w4, b4 = params
    xb = x.astype(jnp.bfloat16)
    h1 = jnp.dot(xb, w1, preferred_element_type=jnp.float32) + b1
    h1 = jnp.maximum(h1, 0.2 * h1)
    h1b = h1.astype(jnp.bfloat16)
    mu = jnp.dot(h1b, w2m, preferred_element_type=jnp.float32) + b2m
    logvar = jnp.dot(h1b, w2v, preferred_element_type=jnp.float32) + b2v
    z = mu + jnp.exp(0.5 * logvar) * eps
    d1 = jnp.maximum(
        jnp.dot(z.astype(jnp.bfloat16), w3, preferred_element_type=jnp.float32) + b3, 0.0)
    d2 = jnp.dot(d1.astype(jnp.bfloat16), w4, preferred_element_type=jnp.float32) + b4
    return jax.nn.sigmoid(d2), mu, logvar


if __name__ == "__main__":
    # Small, lane-aligned shapes consistent with the module (image_size, h_dim,
    # z_dim scaled down to multiples of 128; batch big enough to exercise the
    # batch grid with a 128-row MXU tile).
    B, IMAGE_SIZE, H_DIM, Z_DIM = 256, 512, 256, 128

    key = jax.random.PRNGKey(0)
    k_x, k_eps, k_p = jax.random.split(key, 3)

    x = jax.random.uniform(k_x, (B, IMAGE_SIZE), jnp.float32)   # "image" input
    eps = jax.random.normal(k_eps, (B, Z_DIM), jnp.float32)     # reparam noise
    params = init_params(k_p, IMAGE_SIZE, H_DIM, Z_DIM)

    recon, mu, logvar = vae_forward(x, eps, params, tile_b=128)  # grid of 2 steps
    jax.block_until_ready((recon, mu, logvar))

    # correctness check against plain-JAX reference (bf16 matmuls, f32 accumulation;
    # recon additionally goes through the EUP approx reciprocal -> loose tolerance)
    recon_r, mu_r, logvar_r = vae_forward_ref(x, eps, params)
    assert recon.shape == (B, IMAGE_SIZE)
    assert mu.shape == (B, Z_DIM) and logvar.shape == (B, Z_DIM)
    assert jnp.allclose(mu, mu_r, atol=1e-2, rtol=1e-2)
    assert jnp.allclose(logvar, logvar_r, atol=1e-2, rtol=1e-2)
    assert jnp.allclose(recon, recon_r, atol=1e-2, rtol=1e-2)

    print("KERNEL_OK")
</pallas_src>

<mosaic_0001>
module attributes {stable_mosaic.version = 11 : i64} {
  func.func @vae_forward_kernel(%arg0: i32, %arg1: memref<128x512xf32, #tpu.memory_space<vmem>>, %arg2: memref<128x128xf32, #tpu.memory_space<vmem>>, %arg3: memref<512x256xbf16, #tpu.memory_space<vmem>>, %arg4: memref<1x256xf32, #tpu.memory_space<vmem>>, %arg5: memref<256x128xbf16, #tpu.memory_space<vmem>>, %arg6: memref<1x128xf32, #tpu.memory_space<vmem>>, %arg7: memref<256x128xbf16, #tpu.memory_space<vmem>>, %arg8: memref<1x128xf32, #tpu.memory_space<vmem>>, %arg9: memref<128x256xbf16, #tpu.memory_space<vmem>>, %arg10: memref<1x256xf32, #tpu.memory_space<vmem>>, %arg11: memref<256x512xbf16, #tpu.memory_space<vmem>>, %arg12: memref<1x512xf32, #tpu.memory_space<vmem>>, %arg13: memref<128x512xf32, #tpu.memory_space<vmem>>, %arg14: memref<128x128xf32, #tpu.memory_space<vmem>>, %arg15: memref<128x128xf32, #tpu.memory_space<vmem>>) attributes {dimension_semantics = [#tpu.dimension_semantics<parallel>], iteration_bounds = array<i64: 2>, scalar_prefetch = 0 : i64, scratch_operands = 0 : i64, tpu.core_type = #tpu.core_type<tc>, window_params = [{transform_indices = @transform_0, window_bounds = array<i64: 128, 512>}, {transform_indices = @transform_1, window_bounds = array<i64: 128, 128>}, {pipeline_mode = #tpu.pipeline_mode<synchronous>, transform_indices = @transform_2, window_bounds = array<i64: 512, 256>}, {pipeline_mode = #tpu.pipeline_mode<synchronous>, transform_indices = @transform_3, window_bounds = array<i64: 1, 256>}, {pipeline_mode = #tpu.pipeline_mode<synchronous>, transform_indices = @transform_4, window_bounds = array<i64: 256, 128>}, {pipeline_mode = #tpu.pipeline_mode<synchronous>, transform_indices = @transform_5, window_bounds = array<i64: 1, 128>}, {pipeline_mode = #tpu.pipeline_mode<synchronous>, transform_indices = @transform_6, window_bounds = array<i64: 256, 128>}, {pipeline_mode = #tpu.pipeline_mode<synchronous>, transform_indices = @transform_7, window_bounds = array<i64: 1, 128>}, {pipeline_mode = #tpu.pipeline_mode<synchronous>, transform_indices = @transform_8, window_bounds = array<i64: 128, 256>}, {pipeline_mode = #tpu.pipeline_mode<synchronous>, transform_indices = @transform_9, window_bounds = array<i64: 1, 256>}, {pipeline_mode = #tpu.pipeline_mode<synchronous>, transform_indices = @transform_10, window_bounds = array<i64: 256, 512>}, {pipeline_mode = #tpu.pipeline_mode<synchronous>, transform_indices = @transform_11, window_bounds = array<i64: 1, 512>}, {transform_indices = @transform_12, window_bounds = array<i64: 128, 512>}, {transform_indices = @transform_13, window_bounds = array<i64: 128, 128>}, {transform_indices = @transform_14, window_bounds = array<i64: 128, 128>}]} {
    %c0 = arith.constant 0 : index
    %c0_0 = arith.constant 0 : index
    %0 = vector.load %arg1[%c0, %c0_0] : memref<128x512xf32, #tpu.memory_space<vmem>>, vector<128x512xf32>
    %1 = arith.truncf %0 : vector<128x512xf32> to vector<128x512xbf16>
    %c0_1 = arith.constant 0 : index
    %c0_2 = arith.constant 0 : index
    %2 = vector.load %arg3[%c0_1, %c0_2] : memref<512x256xbf16, #tpu.memory_space<vmem>>, vector<512x256xbf16>
    %cst = arith.constant dense<0.000000e+00> : vector<128x256xf32>
    %3 = tpu.matmul %1, %2, %cst {dimension_numbers = #tpu.dot_dimension_numbers<[1], [0], [0], [1], [0, 0, 1, 1], [], []>} : vector<128x512xbf16>, vector<512x256xbf16>, vector<128x256xf32> -> vector<128x256xf32>
    %c0_3 = arith.constant 0 : index
    %c0_4 = arith.constant 0 : index
    %4 = vector.load %arg4[%c0_3, %c0_4] : memref<1x256xf32, #tpu.memory_space<vmem>>, vector<1x256xf32>
    %5 = vector.broadcast %4 : vector<1x256xf32> to vector<128x256xf32>
    %6 = arith.addf %3, %5 : vector<128x256xf32>
    %cst_5 = arith.constant 2.000000e-01 : f32
    %7 = vector.broadcast %cst_5 : f32 to vector<128x256xf32>
    %8 = arith.mulf %7, %6 : vector<128x256xf32>
    %9 = arith.maximumf %6, %8 : vector<128x256xf32>
    %10 = arith.truncf %9 : vector<128x256xf32> to vector<128x256xbf16>
    %c0_6 = arith.constant 0 : index
    %c0_7 = arith.constant 0 : index
    %11 = vector.load %arg5[%c0_6, %c0_7] : memref<256x128xbf16, #tpu.memory_space<vmem>>, vector<256x128xbf16>
    %cst_8 = arith.constant dense<0.000000e+00> : vector<128x128xf32>
    %12 = tpu.matmul %10, %11, %cst_8 {dimension_numbers = #tpu.dot_dimension_numbers<[1], [0], [0], [1], [0, 0, 1, 1], [], []>} : vector<128x256xbf16>, vector<256x128xbf16>, vector<128x128xf32> -> vector<128x128xf32>
    %c0_9 = arith.constant 0 : index
    %c0_10 = arith.constant 0 : index
    %13 = vector.load %arg6[%c0_9, %c0_10] : memref<1x128xf32, #tpu.memory_space<vmem>>, vector<1x128xf32>
    %14 = vector.broadcast %13 : vector<1x128xf32> to vector<128x128xf32>
    %15 = arith.addf %12, %14 : vector<128x128xf32>
    %c0_11 = arith.constant 0 : index
    %c0_12 = arith.constant 0 : index
    %16 = vector.load %arg7[%c0_11, %c0_12] : memref<256x128xbf16, #tpu.memory_space<vmem>>, vector<256x128xbf16>
    %cst_13 = arith.constant dense<0.000000e+00> : vector<128x128xf32>
    %17 = tpu.matmul %10, %16, %cst_13 {dimension_numbers = #tpu.dot_dimension_numbers<[1], [0], [0], [1], [0, 0, 1, 1], [], []>} : vector<128x256xbf16>, vector<256x128xbf16>, vector<128x128xf32> -> vector<128x128xf32>
    %c0_14 = arith.constant 0 : index
    %c0_15 = arith.constant 0 : index
    %18 = vector.load %arg8[%c0_14, %c0_15] : memref<1x128xf32, #tpu.memory_space<vmem>>, vector<1x128xf32>
    %19 = vector.broadcast %18 : vector<1x128xf32> to vector<128x128xf32>
    %20 = arith.addf %17, %19 : vector<128x128xf32>
    %cst_16 = arith.constant 5.000000e-01 : f32
    %21 = vector.broadcast %cst_16 : f32 to vector<128x128xf32>
    %22 = arith.mulf %21, %20 : vector<128x128xf32>
    %23 = math.exp %22 : vector<128x128xf32>
    %c0_17 = arith.constant 0 : index
    %c0_18 = arith.constant 0 : index
    %24 = vector.load %arg2[%c0_17, %c0_18] : memref<128x128xf32, #tpu.memory_space<vmem>>, vector<128x128xf32>
    %25 = arith.mulf %23, %24 : vector<128x128xf32>
    %26 = arith.addf %15, %25 : vector<128x128xf32>
    %27 = arith.truncf %26 : vector<128x128xf32> to vector<128x128xbf16>
    %c0_19 = arith.constant 0 : index
    %c0_20 = arith.constant 0 : index
    %28 = vector.load %arg9[%c0_19, %c0_20] : memref<128x256xbf16, #tpu.memory_space<vmem>>, vector<128x256xbf16>
    %cst_21 = arith.constant dense<0.000000e+00> : vector<128x256xf32>
    %29 = tpu.matmul %27, %28, %cst_21 {dimension_numbers = #tpu.dot_dimension_numbers<[1], [0], [0], [1], [0, 0, 1, 1], [], []>} : vector<128x128xbf16>, vector<128x256xbf16>, vector<128x256xf32> -> vector<128x256xf32>
    %c0_22 = arith.constant 0 : index
    %c0_23 = arith.constant 0 : index
    %30 = vector.load %arg10[%c0_22, %c0_23] : memref<1x256xf32, #tpu.memory_space<vmem>>, vector<1x256xf32>
    %31 = vector.broadcast %30 : vector<1x256xf32> to vector<128x256xf32>
    %32 = arith.addf %29, %31 : vector<128x256xf32>
    %cst_24 = arith.constant 0.000000e+00 : f32
    %33 = vector.broadcast %cst_24 : f32 to vector<128x256xf32>
    %34 = arith.maximumf %32, %33 : vector<128x256xf32>
    %35 = arith.truncf %34 : vector<128x256xf32> to vector<128x256xbf16>
    %c0_25 = arith.constant 0 : index
    %c0_26 = arith.constant 0 : index
    %36 = vector.load %arg11[%c0_25, %c0_26] : memref<256x512xbf16, #tpu.memory_space<vmem>>, vector<256x512xbf16>
    %cst_27 = arith.constant dense<0.000000e+00> : vector<128x512xf32>
    %37 = tpu.matmul %35, %36, %cst_27 {dimension_numbers = #tpu.dot_dimension_numbers<[1], [0], [0], [1], [0, 0, 1, 1], [], []>} : vector<128x256xbf16>, vector<256x512xbf16>, vector<128x512xf32> -> vector<128x512xf32>
    %c0_28 = arith.constant 0 : index
    %c0_29 = arith.constant 0 : index
    %38 = vector.load %arg12[%c0_28, %c0_29] : memref<1x512xf32, #tpu.memory_space<vmem>>, vector<1x512xf32>
    %39 = vector.broadcast %38 : vector<1x512xf32> to vector<128x512xf32>
    %40 = arith.addf %37, %39 : vector<128x512xf32>
    %cst_30 = arith.constant 0.000000e+00 : f32
    %41 = vector.broadcast %cst_30 : f32 to vector<128x512xf32>
    %42 = arith.subf %41, %40 : vector<128x512xf32>
    %43 = math.exp %42 : vector<128x512xf32>
    %cst_31 = arith.constant 1.000000e+00 : f32
    %44 = vector.broadcast %cst_31 : f32 to vector<128x512xf32>
    %45 = arith.addf %44, %43 : vector<128x512xf32>
    %46 = tpu.reciprocal %45 {approx = true} : vector<128x512xf32> -> vector<128x512xf32>
    %c0_32 = arith.constant 0 : index
    %c0_33 = arith.constant 0 : index
    %47 = vector.load %arg13[%c0_32, %c0_33] : memref<128x512xf32, #tpu.memory_space<vmem>>, vector<128x512xf32>
    tpu.vector_store %arg13[%c0_32, %c0_33], %46 {strides = array<i32>} : memref<128x512xf32, #tpu.memory_space<vmem>>, vector<128x512xf32>,
    %c0_34 = arith.constant 0 : index
    %c0_35 = arith.constant 0 : index
    %48 = vector.load %arg14[%c0_34, %c0_35] : memref<128x128xf32, #tpu.memory_space<vmem>>, vector<128x128xf32>
    tpu.vector_store %arg14[%c0_34, %c0_35], %15 {strides = array<i32>} : memref<128x128xf32, #tpu.memory_space<vmem>>, vector<128x128xf32>,
    %c0_36 = arith.constant 0 : index
    %c0_37 = arith.constant 0 : index
    %49 = vector.load %arg15[%c0_36, %c0_37] : memref<128x128xf32, #tpu.memory_space<vmem>>, vector<128x128xf32>
    tpu.vector_store %arg15[%c0_36, %c0_37], %20 {strides = array<i32>} : memref<128x128xf32, #tpu.memory_space<vmem>>, vector<128x128xf32>,
    return
  }
  func.func @transform_0(%arg0: i32) -> (i32, i32) {
    %c0_i32 = arith.constant 0 : i32
    %c0_i32_0 = arith.constant 0 : i32
    return %arg0, %c0_i32 : i32, i32
  }
  func.func @transform_1(%arg0: i32) -> (i32, i32) {
    %c0_i32 = arith.constant 0 : i32
    %c0_i32_0 = arith.constant 0 : i32
    return %arg0, %c0_i32 : i32, i32
  }
  func.func @transform_2(%arg0: i32) -> (i32, i32) {
    %c0_i32 = arith.constant 0 : i32
    %c0_i32_0 = arith.constant 0 : i32
    %c0_i32_1 = arith.constant 0 : i32
    return %c0_i32, %c0_i32_0 : i32, i32
  }
  func.func @transform_3(%arg0: i32) -> (i32, i32) {
    %c0_i32 = arith.constant 0 : i32
    %c0_i32_0 = arith.constant 0 : i32
    %c0_i32_1 = arith.constant 0 : i32
    return %c0_i32, %c0_i32_0 : i32, i32
  }
  func.func @transform_4(%arg0: i32) -> (i32, i32) {
    %c0_i32 = arith.constant 0 : i32
    %c0_i32_0 = arith.constant 0 : i32
    %c0_i32_1 = arith.constant 0 : i32
    return %c0_i32, %c0_i32_0 : i32, i32
  }
  func.func @transform_5(%arg0: i32) -> (i32, i32) {
    %c0_i32 = arith.constant 0 : i32
    %c0_i32_0 = arith.constant 0 : i32
    %c0_i32_1 = arith.constant 0 : i32
    return %c0_i32, %c0_i32_0 : i32, i32
  }
  func.func @transform_6(%arg0: i32) -> (i32, i32) {
    %c0_i32 = arith.constant 0 : i32
    %c0_i32_0 = arith.constant 0 : i32
    %c0_i32_1 = arith.constant 0 : i32
    return %c0_i32, %c0_i32_0 : i32, i32
  }
  func.func @transform_7(%arg0: i32) -> (i32, i32) {
    %c0_i32 = arith.constant 0 : i32
    %c0_i32_0 = arith.constant 0 : i32
    %c0_i32_1 = arith.constant 0 : i32
    return %c0_i32, %c0_i32_0 : i32, i32
  }
  func.func @transform_8(%arg0: i32) -> (i32, i32) {
    %c0_i32 = arith.constant 0 : i32
    %c0_i32_0 = arith.constant 0 : i32
    %c0_i32_1 = arith.constant 0 : i32
    return %c0_i32, %c0_i32_0 : i32, i32
  }
  func.func @transform_9(%arg0: i32) -> (i32, i32) {
    %c0_i32 = arith.constant 0 : i32
    %c0_i32_0 = arith.constant 0 : i32
    %c0_i32_1 = arith.constant 0 : i32
    return %c0_i32, %c0_i32_0 : i32, i32
  }
  func.func @transform_10(%arg0: i32) -> (i32, i32) {
    %c0_i32 = arith.constant 0 : i32
    %c0_i32_0 = arith.constant 0 : i32
    %c0_i32_1 = arith.constant 0 : i32
    return %c0_i32, %c0_i32_0 : i32, i32
  }
  func.func @transform_11(%arg0: i32) -> (i32, i32) {
    %c0_i32 = arith.constant 0 : i32
    %c0_i32_0 = arith.constant 0 : i32
    %c0_i32_1 = arith.constant 0 : i32
    return %c0_i32, %c0_i32_0 : i32, i32
  }
  func.func @transform_12(%arg0: i32) -> (i32, i32) {
    %c0_i32 = arith.constant 0 : i32
    %c0_i32_0 = arith.constant 0 : i32
    return %arg0, %c0_i32 : i32, i32
  }
  func.func @transform_13(%arg0: i32) -> (i32, i32) {
    %c0_i32 = arith.constant 0 : i32
    %c0_i32_0 = arith.constant 0 : i32
    return %arg0, %c0_i32 : i32, i32
  }
  func.func @transform_14(%arg0: i32) -> (i32, i32) {
    %c0_i32 = arith.constant 0 : i32
    %c0_i32_0 = arith.constant 0 : i32
    return %arg0, %c0_i32 : i32, i32
  }
}

</mosaic_0001>

<bundles_post_ra>
// kernel: tpu_custom_call.1
= control target key start
LH: loop header
LB: loop body
LE: loop exit
PB: predicated region body
PF: predicated region fallthrough
CT: control target
= control target key end

     0   :  { %s5963_s0 = inlined_call_operand.hbm [shape: f32[256,512], index: 0, kind: input, shape index: {}]   ;;  %s5964_s1 = inlined_call_operand.hbm [shape: f32[256,128], index: 1, kind: input, shape index: {}]   ;;  %s5965_s2 = inlined_call_operand.hbm [shape: bf16[512,256], index: 2, kind: input, shape index: {}]   ;;  %s5966_s3 = inlined_call_operand.vmem [shape: f32[1,256], index: 3, kind: input, shape index: {}]   ;;  %s5967_s4 = inlined_call_operand.hbm [shape: bf16[256,128], index: 4, kind: input, shape index: {}]   ;;  %s5968_s5 = inlined_call_operand.vmem [shape: f32[1,128], index: 5, kind: input, shape index: {}]   ;;  %s5969_s6 = inlined_call_operand.hbm [shape: bf16[256,128], index: 6, kind: input, shape index: {}]   ;;  %s5970_s7 = inlined_call_operand.vmem [shape: f32[1,128], index: 7, kind: input, shape index: {}]   ;;  %s5971_s8 = inlined_call_operand.hbm [shape: bf16[128,256], index: 8, kind: input, shape index: {}]   ;;  %s5972_s9 = inlined_call_operand.vmem [shape: f32[1,256], index: 9, kind: input, shape index: {}]   ;;  %s5973_s10 = inlined_call_operand.hbm [shape: bf16[256,512], index: 10, kind: input, shape index: {}]   ;;  %s5974_s11 = inlined_call_operand.vmem [shape: f32[1,512], index: 11, kind: input, shape index: {}]   ;;  %s5975_s12 = inlined_call_operand.hbm [shape: f32[256,512], index: 12, kind: output, shape index: {0}]   ;;  %s5976_s13 = inlined_call_operand.hbm [shape: f32[256,128], index: 13, kind: output, shape index: {1}]   ;;  %s5977_s14 = inlined_call_operand.hbm [shape: f32[256,128], index: 14, kind: output, shape index: {2}]  }
   0x1   :  { %5992 = sst [smem:[#allocation29_spill]] %s5963_s0 }
   0x2   :  { %5993 = sst [smem:[#allocation30_spill]] %s5965_s2 }
   0x3   :  { %5994 = sst [smem:[#allocation31_spill]] %s5967_s4 }
   0x4   :  { %5995 = sst [smem:[#allocation32_spill]] %s5969_s6 }
   0x5   :  { %5996 = sst [smem:[#allocation33_spill]] %s5971_s8 }
   0x6   :  { %5997 = sst [smem:[#allocation34_spill]] %s5973_s10 }
   0x7   :  { %5998 = sst [smem:[#allocation35_spill]] %s5975_s12 }
   0x8   :  { %5999 = sst [smem:[#allocation36_spill]] %s5977_s14 }
   0x9   :  { %20 = vsyncpa [#allocation3], 0 }
   0xa   :  { %22 = vsyncpa [#allocation3 + $0x1], 0 }
   0xb   :  { %23 = vsyncpa [#allocation6], 0 }
   0xc   :  { %25 = vsyncpa [#allocation6 + $0x1], 0 }
   0xd   :  { %26 = vsyncpa [#allocation9], 0 }
   0xe   :  { %27 = vsyncpa [#allocation12], 0 }
   0xf   :  { %28 = vsyncpa [#allocation4], 0 }
  0x10   :  { %30 = vsyncpa [#allocation4 + $0x1], 0 }
  0x11   :  { %31 = vsyncpa [#allocation16], 0 }
  0x12   :  { %33 = vsyncpa [#allocation16 + $0x1], 0  ;;  %s5017_s29 = smov 0   ;;  %s5019_s30 = smov 0  }
  0x13   :  { %s5021_s15 = smov 0   ;;  %s5023_s16 = smov 0  }
  0x14 LB: > { %6000 = sst [smem:[#allocation25_spill]] %s4913_s15  ;;  %s4919_s17 = smov [#allocation7]   ;;  %s4917_s16 = sphi %s5023_s16, %s6036_s16   ;;  %s4913_s15 = sphi %s5021_s15, %s6038_s15   ;;  %s4909_s30 = sphi %s5019_s30, %s6040_s30   ;;  %s4905_s29 = sphi %s5017_s29, %s6039_s29  }
  0x15   : > { %s396_s18 = sshll.u32 %s4919_s17, 4  ;;  %s5038_s19 = sadd.s32 4294967295, %s4917_s16   ;;  %s397_s18 = int_to_ptr.vmem [resolvable:$true] %s396_s18 }
  0x16   : > { %p3568_p0 = scmp.ge.s32.totalorder %s4917_s16, 1  ;;  %p5985_p1 = scmp.eq.s32.totalorder %s5038_s19, 0 }
  0x17   : > { %p384_p2 = scmp.lt.s32.totalorder %s4917_s16, 3  ;;  %s4920_s21 = smov [#allocation8]  }
  0x18   : > { %s412_s22 = sshll.u32 %s4920_s21, 4  ;;  %s4921_s24 = smov [#allocation11]   ;;  %s5056_s22 = int_to_ptr.vmem [resolvable:$true] %s412_s22 }
  0x19   : > { %p5043_p3 = pnand %p3568_p0, %p384_p2  ;;  %s5058_s25 = sshll.u32 %s4921_s24, 4  ;;  %s445_s25 = int_to_ptr.vmem [resolvable:$true] %s5058_s25 }
  0x1a   : > { %s4606_s27 = scalar_lea.vmem %s397_s18, 8192  ;;  %p4614_p11 = scmp.lt.s32.totalorder %s397_s18, %s397_s18 }
  0x1b   : > { %p3964_p5 = pneg %p5043_p3  ;;  %p4607_p8 = scmp.ne.s32.totalorder %s397_s18, %s4606_s27 }
  0x1c   : > { %p4615_p12 = scmp.lt.s32.totalorder %s4606_s27, %s4606_s27 }
  0x1d   : > { %p5052_p6 = pnand %p3964_p5, %p5985_p1 }
  0x1e   : > { %p4616_p13 = por %p4615_p12, %p4614_p11 }
  0x1f   : > { %p5062_p7 = pneg %p5052_p6 }
  0x21   : > { %p4609_p9 = pnand %p4607_p8, %p5062_p7 }
  0x23   : > { %p4610_p10 = pneg %p4609_p9 }
  0x25   : > { %p4617_p0 = pnand %p4616_p13, %p4610_p10 }
  0x27   : > { %4620 = shalt.err (!%p4617_p0)
}
  0x28   : > { %s5982_s28 = smov 128   ;;  %s5984_s17 = smov 8  }
  0x29   : > { %s6004_s2 = sld [smem:[#allocation30_spill]]  ;;  %s4632_s12 = scalar_lea.vmem %s5056_s22, 2048 }
  0x2a   : > { %p4633_p2 = scmp.ne.s32.totalorder %s5056_s22, %s4632_s12  ;;  %p4640_p9 = scmp.lt.s32.totalorder %s5056_s22, %s5056_s22 }
  0x2b   : > { %p4641_p10 = scmp.lt.s32.totalorder %s4632_s12, %s4632_s12 }
  0x2c   : > { %p4635_p5 = pnand %p4633_p2, %p5062_p7 }
  0x2d   : > { %p4642_p11 = por %p4641_p10, %p4640_p9 }
  0x2e   : > { %p4636_p8 = pneg %p4635_p5 }
  0x2f   : > { %3967 = dma.hbm_to_vmem [thread:$0]  (!%p5052_p6), %s6004_s2, 8192, %s397_s18, [#allocation6], %s5982_s28, %s5982_s28, %s5984_s17  }
  0x30   : > { %p4643_p12 = pnand %p4642_p11, %p4636_p8 }
  0x32   : > { %4646 = shalt.err (!%p4643_p12)
}
  0x33   : > { %s5980_s27 = smov 64   ;;  %s5981_s14 = smov 4  }
  0x34   : > { %s6005_s4 = sld [smem:[#allocation31_spill]]  ;;  %s4658_s24 = scalar_lea.vmem %s445_s25, 2048 }
  0x35   : > { %p4659_p13 = scmp.ne.s32.totalorder %s445_s25, %s4658_s24  ;;  %p4666_p5 = scmp.lt.s32.totalorder %s445_s25, %s445_s25 }
  0x36   : > { %p4667_p8 = scmp.lt.s32.totalorder %s4658_s24, %s4658_s24 }
  0x37   : > { %p4661_p0 = pnand %p4659_p13, %p5062_p7 }
  0x38   : > { %p4668_p9 = por %p4667_p8, %p4666_p5 }
  0x39   : > { %p4662_p2 = pneg %p4661_p0 }
  0x3a   : > { %3970 = dma.hbm_to_vmem [thread:$0]  (!%p5052_p6), %s6005_s4, 2048, %s5056_s22, [#allocation9], %s5980_s27, %s5980_s27, %s5981_s14  }
  0x3b   : > { %p4669_p10 = pnand %p4668_p9, %p4662_p2 }
  0x3d   : > { %4672 = shalt.err (!%p4669_p10)
}
  0x3e   : > { %s6006_s8 = sld [smem:[#allocation33_spill]]  ;;  %s4926_s22 = smov [#allocation10]  }
  0x3f   : > { %s428_s18 = sshll.u32 %s4926_s22, 4  ;;  %s4927_s21 = smov [#allocation13]   ;;  %s429_s18 = int_to_ptr.vmem [resolvable:$true] %s428_s18 }
  0x40   : > { %s460_s27 = sshll.u32 %s4927_s21, 4  ;;  %s4684_s14 = scalar_lea.vmem %s429_s18, 2048  ;;  %s461_s27 = int_to_ptr.vmem [resolvable:$true] %s460_s27 }
  0x41   : > { %p4685_p11 = scmp.ne.s32.totalorder %s429_s18, %s4684_s14  ;;  %p4692_p0 = scmp.lt.s32.totalorder %s429_s18, %s429_s18 }
  0x42   : > { %p4693_p2 = scmp.lt.s32.totalorder %s4684_s14, %s4684_s14 }
  0x43   : > { %p4687_p12 = pnand %p4685_p11, %p5062_p7 }
  0x44   : > { %3976 = dma.hbm_to_vmem [thread:$0]  (!%p5052_p6), %s6006_s8, 2048, %s445_s25, [#allocation12], %s5982_s28, %s5982_s28, %s5984_s17  }
  0x45   : > { %p4688_p13 = pneg %p4687_p12  ;;  %p4694_p5 = por %p4693_p2, %p4692_p0 }
  0x47   : > { %p4695_p8 = pnand %p4694_p5, %p4688_p13 }
  0x49   : > { %4698 = shalt.err (!%p4695_p8)
}
  0x4a   : > { %s6007_s2 = smov 4   ;;  %s6008_s24 = smov 64  }
  0x4b   : > { %s6009_s6 = sld [smem:[#allocation32_spill]]  ;;  %s4710_s22 = scalar_lea.vmem %s461_s27, 8192 }
  0x4c   : > { %p4711_p9 = scmp.ne.s32.totalorder %s461_s27, %s4710_s22  ;;  %p4718_p12 = scmp.lt.s32.totalorder %s461_s27, %s461_s27 }
  0x4d   : > { %p4719_p0 = scmp.lt.s32.totalorder %s4710_s22, %s4710_s22 }
  0x4e   : > { %p4713_p10 = pnand %p4711_p9, %p5062_p7 }
  0x4f   : > { %p4720_p13 = por %p4719_p0, %p4718_p12 }
  0x50   : > { %p4714_p11 = pneg %p4713_p10 }
  0x51   : > { %3973 = dma.hbm_to_vmem [thread:$0]  (!%p5052_p6), %s6009_s6, 2048, %s429_s18, [#allocation9], %s6008_s24, %s6008_s24, %s6007_s2  }
  0x52   : > { %p4721_p2 = pnand %p4720_p13, %p4714_p11 }
  0x54   : > { %4724 = shalt.err (!%p4721_p2)
}
  0x55   : > { %s4928_s14 = smov 256   ;;  %s4929_s26 = smov 16  }
  0x56   : > { %s6010_s10 = sld [smem:[#allocation34_spill]]  ;;  %s5983_s2 = sadd.s32 4294967294, %s4917_s16  }
  0x57   : > { %s5121_s24 = sadd.s32 1, %s4917_s16   ;;  %s46_s25 = sadd.s32 1, %s4913_s15 }
  0x58   : > { %6011 = sst [smem:[#allocation26_spill]] %s5121_s24  ;;  %s43_s12 = ssub.s32 %s4917_s16, %s5121_s24 }
  0x59   : > { %p53_p7 = scmp.ne.s32.totalorder %s4913_s15, %s4909_s30  ;;  %p44_p5 = scmp.eq.s32.totalorder %s43_s12, 0 }
  0x5a   : > { %p54_p8 = scmp.eq.s32.totalorder %s4917_s16, 0  ;;  %p59_p9 = scmp.ne.s32.totalorder %s4909_s30, %s4905_s29 }
  0x5b   : > { %p319_p10 = scmp.eq.s32.totalorder %s5038_s19, 1  ;;  %p325_p0 = scmp.eq.s32.totalorder %s5983_s2, 1 }
  0x5c   : > { %3979 = dma.hbm_to_vmem [thread:$0]  (!%p5052_p6), %s6010_s10, 8192, %s461_s27, [#allocation12], %s4928_s14, %s4928_s14, %s4929_s26  }
  0x5d   : > { %s5133_s22 = scalar_select %p44_p5, %s4913_s15, %s46_s25  }
  0x5e   : > { %p55_p11 = por %p54_p8, %p53_p7  ;;  %p5137_p12 = por %p5985_p1, %p59_p9 }
  0x5f   : > { %6012 = sst [smem:[#allocation27_spill]] %s5133_s22  ;;  %p5141_p6 = por %p319_p10, %p53_p7 }
  0x60   : > { %s6013_s23 = scalar_select %p5137_p12, 1, 0 }
  0x61   : > { %s6014_s27 = scalar_select %p5141_p6, 1, 0 }
  0x62   : > { %p4002_p13 = scmp.lt.s32.totalorder %s4917_s16, 2  ;;  %s5149_s14 = sand.u32 1, %s4913_s15  }
  0x63   : > { %p5151_p2 = por %p325_p0, %p59_p9  ;;  %s3575_s18 = sshll.u32 %s5149_s14, 9 }
  0x64   : > { %s3784_s21 = sshll.u32 %s4917_s16, 13  ;;  %s6017_s0 = sld [smem:[#allocation29_spill]] }
  0x65   : > { %s6015_s26 = scalar_select %p5151_p2, 1, 0 }
  0x66   : > { %s481_s2 = scalar_lea.vmem [#allocation2], %s3575_s18  ;;  %p5162_p7 = pnand %p4002_p13, %p55_p11 }
  0x67   : > { %6016 = sst [smem:[#allocation28_spill]] %s6015_s26  ;;  %s489_s17 = sshll.u32 %s481_s2, 4  ;;  %s5166_s17 = int_to_ptr.vmem [resolvable:$true] %s489_s17 }
  0x68   : > { %p4727_p8 = pneg %p5162_p7 }
  0x6a   : > { %s5160_s28 = scalar_lea.hbm %s6017_s0, %s3784_s21  ;;  %s4730_s2 = scalar_lea.hbm %s6017_s0, 16384 }
  0x6b   : > { %s4725_s8 = scalar_lea.hbm %s5160_s28, 8192  ;;  %p4731_p11 = scmp.lt.s32.totalorder %s5160_s28, %s6017_s0 }
  0x6c   : > { %p4726_p5 = scmp.ne.s32.totalorder %s5160_s28, %s4725_s8  ;;  %p4732_p0 = scmp.lt.s32.totalorder %s4730_s2, %s4725_s8 }
  0x6e   : > { %p4728_p9 = pnand %p4727_p8, %p4726_p5  ;;  %p4733_p13 = por %p4732_p0, %p4731_p11 }
  0x70   : > { %p4729_p10 = pneg %p4728_p9 }
  0x72   : > { %p4734_p4 = pnand %p4733_p13, %p4729_p10 }
  0x74   : > { %4737 = shalt.err (!%p4734_p4)
}
  0x75   : > { %s4738_s6 = scalar_lea.vmem %s5166_s17, 8192  ;;  %s4930_s21 = smov [#allocation2]  }
  0x76   : > { %p4739_p1 = scmp.ne.s32.totalorder %s5166_s17, %s4738_s6  ;;  %s4743_s18 = sshll.u32 %s4930_s21, 4  ;;  %s4744_s18 = int_to_ptr.vmem [resolvable:$false] %s4743_s18 }
  0x77   : > { %s4745_s10 = scalar_lea.vmem %s4744_s18, 16384  ;;  %p4746_p2 = scmp.lt.s32.totalorder %s5166_s17, %s4744_s18 }
  0x78   : > { %p4741_p5 = pnand %p4739_p1, %p4727_p8  ;;  %p4747_p6 = scmp.lt.s32.totalorder %s4745_s10, %s4738_s6 }
  0x7a   : > { %p4742_p9 = pneg %p4741_p5  ;;  %p4748_p12 = por %p4747_p6, %p4746_p2 }
  0x7c   : > { %p4749_p11 = pnand %p4748_p12, %p4742_p9 }
  0x7e   : > { %4752 = shalt.err (!%p4749_p11)
}
  0x7f   : > { %s4931_s8 = smov 512   ;;  %s4932_s2 = smov 32  }
  0x80   : > { %s6019_s25 = scalar_lea.sflag [#allocation3], %s5149_s14  ;;  %s499_s12 = sand.u32 1, %s4917_s16  }
  0x81   : > { %3983 = dma.hbm_to_vmem [thread:$0]  (!%p5162_p7), %s5160_s28, 8192, %s5166_s17, %s6019_s25, %s4931_s8, %s4931_s8, %s4932_s2  }
  0x82   : > { %s3579_s21 = sshll.u32 %s5149_s14, 7  ;;  %s3785_s18 = sshll.u32 %s4917_s16, 11 }
  0x83   : > { %s503_s6 = scalar_lea.vmem [#allocation5], %s3579_s21  ;;  %s5201_s15 = scalar_lea.hbm %s5964_s1, %s3785_s18 }
  0x84   : > { %s510_s10 = sshll.u32 %s503_s6, 4  ;;  %s500_s24 = scalar_lea.sflag [#allocation6], %s499_s12  ;;  %s5203_s10 = int_to_ptr.vmem [resolvable:$true] %s510_s10 }
  0x85   : > { %s4753_s26 = scalar_lea.hbm %s5201_s15, 2048  ;;  %s4758_s14 = scalar_lea.hbm %s5964_s1, 4096 }
  0x86   : > { %p4754_p1 = scmp.ne.s32.totalorder %s5201_s15, %s4753_s26  ;;  %p4759_p6 = scmp.lt.s32.totalorder %s5201_s15, %s5964_s1 }
  0x87   : > { %p4760_p2 = scmp.lt.s32.totalorder %s4758_s14, %s4753_s26 }
  0x88   : > { %p4756_p4 = pnand %p4754_p1, %p4727_p8 }
  0x89   : > { %p4761_p10 = por %p4760_p2, %p4759_p6 }
  0x8a   : > { %p4757_p12 = pneg %p4756_p4 }
  0x8c   : > { %p4762_p0 = pnand %p4761_p10, %p4757_p12 }
  0x8e   : > { %4765 = shalt.err (!%p4762_p0)
}
  0x8f   : > { %s4766_s22 = scalar_lea.vmem %s5203_s10, 2048  ;;  %s4933_s2 = smov [#allocation5]  }
  0x90   : > { %p4767_p13 = scmp.ne.s32.totalorder %s5203_s10, %s4766_s22  ;;  %s4771_s25 = sshll.u32 %s4933_s2, 4  ;;  %s4772_s25 = int_to_ptr.vmem [resolvable:$false] %s4771_s25 }
  0x91   : > { %s4773_s12 = scalar_lea.vmem %s4772_s25, 4096  ;;  %p4774_p11 = scmp.lt.s32.totalorder %s5203_s10, %s4772_s25 }
  0x92   : > { %p4769_p5 = pnand %p4767_p13, %p4727_p8  ;;  %p4775_p1 = scmp.lt.s32.totalorder %s4773_s12, %s4766_s22 }
  0x94   : > { %p4770_p9 = pneg %p4769_p5  ;;  %p4776_p4 = por %p4775_p1, %p4774_p11 }
  0x96   : > { %p4777_p6 = pnand %p4776_p4, %p4770_p9 }
  0x98   : > { %4780 = shalt.err (!%p4777_p6)
}
  0x99   : > { %s6020_s26 = smov 8   ;;  %s6021_s21 = smov 128  }
  0x9a   : > { %3986 = dma.hbm_to_vmem [thread:$0]  (!%p5162_p7), %s5201_s15, 2048, %s5203_s10, %s500_s24, %s6021_s21, %s6021_s21, %s6020_s26  }
  0x9b   : > { %522 = sbr.rel (%p5043_p3) target bundleno = 1339 (0x53b), region = 68  ;;  %s5233_s18 = sand.u32 (!%p5043_p3), 1, %s4909_s30  }
  0x9c   : > { %s3583_s6 = sshll.u32 (!%p5043_p3), %s5233_s18, 9  ;;  %s525_s28 = scalar_lea.sflag (!%p5043_p3), [#allocation3], %s5233_s18 }
  0x9d   : > { %s5239_s4 = scalar_lea.vmem (!%p5043_p3), [#allocation2], %s3583_s6  ;;  %p6022_p8 = scmp.ne.s32.totalorder (!%p5043_p3), %s6013_s23, 0 }
  0xa0   : > { %4876 = dma.done.wait (%p6022_p8), %s525_s28, 8192  }
  0xa1   : > { %4878 = vsyncadd (%p6022_p8), %s525_s28, 4294959104  ;;  %s533_s15 = sand.u32 1, %s5038_s19   ;;  %s5247_s20 = sshll.u32 %s5233_s18, 7 }
  0xa2   : > { %s534_s24 = scalar_lea.sflag [#allocation6], %s533_s15  ;;  %s5252_s10 = scalar_lea.vmem [#allocation5], %s5247_s20 }
  0xa3   : > { %4880 = dma.done.wait (%p6022_p8), %s534_s24, 2048  }
  0xa4   : > { %4882 = vsyncadd (%p6022_p8), %s534_s24, 4294965248  ;;  %p6023_p3 = scmp.eq.s32.totalorder %s5038_s19, 0 }
  0xa6   : > { %4884 = dma.done.wait (%p6023_p3), [#allocation6], 8192   ;;  %p6024_p7 = pmov %p6023_p3 }
  0xa7   : > { %p6025_p12 = pmov %p6023_p3 }
  0xa8   : > { %4886 = vsyncadd (%p6024_p7), [#allocation6], 4294959104 }
  0xa9   : > { %4888 = dma.done.wait (%p6025_p12), [#allocation9], 4096   ;;  %p6026_p2 = pmov %p6023_p3 }
  0xab   : > { %4890 = vsyncadd (%p6026_p2), [#allocation9], 4294963200  ;;  %p6027_p10 = pmov %p6026_p2 }
  0xac   : > { %p6028_p0 = pmov %p6026_p2 }
  0xad   : > { %4892 = dma.done.wait (%p6027_p10), [#allocation12], 10240  }
  0xae   : > { %4894 = vsyncadd (%p6028_p0), [#allocation12], 4294957056  ;;  %v4059_v0 = vld [vmem:[#allocation7 + $0x74] ss:$8 sps:$4 sm:$0xff]   ;;  %v4063_v2 = vld [vmem:[#allocation7 + $0x70] ss:$8 sps:$4 sm:$0xff]  }
  0xaf   : > { %v4061_v1 = vld [vmem:[#allocation7 + $0x174] ss:$8 sps:$4 sm:$0xff]   ;;  %1115 = vmatprep.subr.bf16.mxu0 %v4059_v0  ;;  %v4064_v3 = vld [vmem:[#allocation7 + $0x170] ss:$8 sps:$4 sm:$0xff]   ;;  %v4065_v4 = vld [vmem:[#allocation7 + $0x64] ss:$8 sps:$4 sm:$0xff]  }
  0xb0   : > { %1228 = vmatprep.subr.bf16.mxu1 %v4061_v1  ;;  %1116 = vmatpush1.bf16.msra.mxu0 %v4063_v2  ;;  %v4067_v5 = vld [vmem:[#allocation7 + $0x164] ss:$8 sps:$4 sm:$0xff]   ;;  %v4069_v6 = vld [vmem:[#allocation7 + $0x60] ss:$8 sps:$4 sm:$0xff]   ;;  %v4071_v8 = vld [vmem:[#allocation7 + $0x54] ss:$8 sps:$4 sm:$0xff]  }
  0xb1   : > { %1229 = vmatpush1.bf16.msra.mxu1 %v4064_v3  ;;  %1117 = vmatprep.subr.bf16.mxu0 %v4065_v4  ;;  %v4070_v7 = vld [vmem:[#allocation7 + $0x160] ss:$8 sps:$4 sm:$0xff]   ;;  %v4073_v9 = vld [vmem:[#allocation7 + $0x154] ss:$8 sps:$4 sm:$0xff]   ;;  %v4075_v10 = vld [vmem:[#allocation7 + $0x50] ss:$8 sps:$4 sm:$0xff]  }
  0xb2   : > { %1230 = vmatprep.subr.bf16.mxu1 %v4067_v5  ;;  %v4076_v11 = vld [vmem:[#allocation7 + $0x150] ss:$8 sps:$4 sm:$0xff]   ;;  %v4077_v12 = vld [vmem:[#allocation7 + $0x44] ss:$8 sps:$4 sm:$0xff]   ;;  %v4081_v14 = vld [vmem:[#allocation7 + $0x40] ss:$8 sps:$4 sm:$0xff]  }
  0xb3   : > { %v4079_v13 = vld [vmem:[#allocation7 + $0x144] ss:$8 sps:$4 sm:$0xff]   ;;  %v4082_v15 = vld [vmem:[#allocation7 + $0x140] ss:$8 sps:$4 sm:$0xff]   ;;  %v4083_v16 = vld [vmem:[#allocation7 + $0x34] ss:$8 sps:$4 sm:$0xff]  }
  0xb4   : > { %1118 = vmatpush1.bf16.msra.mxu0 %v4069_v6  ;;  %v4085_v17 = vld [vmem:[#allocation7 + $0x134] ss:$8 sps:$4 sm:$0xff]   ;;  %v4087_v18 = vld [vmem:[#allocation7 + $0x30] ss:$8 sps:$4 sm:$0xff]   ;;  %v4089_v20 = vld [vmem:[#allocation7 + $0x24] ss:$8 sps:$4 sm:$0xff]  }
  0xb5   : > { %1231 = vmatpush1.bf16.msra.mxu1 %v4070_v7  ;;  %1119 = vmatprep.subr.bf16.mxu0 %v4071_v8  ;;  %v4088_v19 = vld [vmem:[#allocation7 + $0x130] ss:$8 sps:$4 sm:$0xff]   ;;  %v4091_v21 = vld [vmem:[#allocation7 + $0x124] ss:$8 sps:$4 sm:$0xff]   ;;  %v4093_v22 = vld [vmem:[#allocation7 + $0x20] ss:$8 sps:$4 sm:$0xff]  }
  0xb6   : > { %1232 = vmatprep.subr.bf16.mxu1 %v4073_v9  ;;  %v4094_v23 = vld [vmem:[#allocation7 + $0x120] ss:$8 sps:$4 sm:$0xff]   ;;  %v4095_v24 = vld [vmem:[#allocation7 + $0x14] ss:$8 sps:$4 sm:$0xff]   ;;  %v4099_v26 = vld [vmem:[#allocation7 + $0x10] ss:$8 sps:$4 sm:$0xff]  }
  0xb7   : > { %v4097_v25 = vld [vmem:[#allocation7 + $0x114] ss:$8 sps:$4 sm:$0xff]   ;;  %v4100_v27 = vld [vmem:[#allocation7 + $0x110] ss:$8 sps:$4 sm:$0xff]   ;;  %v4101_v28 = vld [vmem:[#allocation7 + $0x4] ss:$8 sps:$4 sm:$0xff]  }
  0xb8   : > { %1120 = vmatpush1.bf16.msra.mxu0 %v4075_v10  ;;  %v4103_v29 = vld [vmem:[#allocation7 + $0x104] ss:$8 sps:$4 sm:$0xff]   ;;  %v4105_v30 = vld [vmem:[#allocation7] ss:$8 sps:$4 sm:$0xff]   ;;  %v4107_v32 = vld [vmem:[#allocation7 + $0xf4] ss:$8 sps:$4 sm:$0xff]  }
  0xb9   : > { %1233 = vmatpush1.bf16.msra.mxu1 %v4076_v11  ;;  %1121 = vmatprep.subr.bf16.mxu0 %v4077_v12  ;;  %v4106_v31 = vld [vmem:[#allocation7 + $0x100] ss:$8 sps:$4 sm:$0xff]   ;;  %v4109_v33 = vld [vmem:[#allocation7 + $0x1f4] ss:$8 sps:$4 sm:$0xff]   ;;  %v4111_v34 = vld [vmem:[#allocation7 + $0xf0] ss:$8 sps:$4 sm:$0xff]  }
  0xba   : > { %1234 = vmatprep.subr.bf16.mxu1 %v4079_v13  ;;  %v4112_v35 = vld [vmem:[#allocation7 + $0x1f0] ss:$8 sps:$4 sm:$0xff]   ;;  %v4113_v36 = vld [vmem:[#allocation7 + $0xe4] ss:$8 sps:$4 sm:$0xff]   ;;  %v4117_v38 = vld [vmem:[#allocation7 + $0xe0] ss:$8 sps:$4 sm:$0xff]  }
  0xbb   : > { %v4115_v37 = vld [vmem:[#allocation7 + $0x1e4] ss:$8 sps:$4 sm:$0xff]   ;;  %v4118_v39 = vld [vmem:[#allocation7 + $0x1e0] ss:$8 sps:$4 sm:$0xff]   ;;  %v4119_v40 = vld [vmem:[#allocation7 + $0xd4] ss:$8 sps:$4 sm:$0xff]  }
  0xbc   : > { %1122 = vmatpush1.bf16.msra.mxu0 %v4081_v14  ;;  %v4121_v41 = vld [vmem:[#allocation7 + $0x1d4] ss:$8 sps:$4 sm:$0xff]   ;;  %v4123_v42 = vld [vmem:[#allocation7 + $0xd0] ss:$8 sps:$4 sm:$0xff]   ;;  %v4125_v44 = vld [vmem:[#allocation7 + $0xc4] ss:$8 sps:$4 sm:$0xff]  }
  0xbd   : > { %1235 = vmatpush1.bf16.msra.mxu1 %v4082_v15  ;;  %1123 = vmatprep.subr.bf16.mxu0 %v4083_v16  ;;  %v4124_v43 = vld [vmem:[#allocation7 + $0x1d0] ss:$8 sps:$4 sm:$0xff]   ;;  %v4127_v45 = vld [vmem:[#allocation7 + $0x1c4] ss:$8 sps:$4 sm:$0xff]   ;;  %v4129_v50 = vld [vmem:[#allocation7 + $0xc0] ss:$8 sps:$4 sm:$0xff]  }
  0xbe   : > { %1236 = vmatprep.subr.bf16.mxu1 %v4085_v17  ;;  %v624_v46 = vld [vmem:[%s5239_s4 + $0x8] sm:$0xff]  ;;  %v626_v48 = vld [vmem:[%s5239_s4 + $0x18] sm:$0xff]  ;;  %v623_v6 = vld [vmem:[%s5239_s4] sm:$0xff]  ;;  %s5441_s0 = scalar_lea.vmem [#allocation15], %s5247_s20  ;;  %s5527_s25 = scalar_lea.vmem [#allocation17], %s5247_s20 }
  0xbf   : > { %v628_v47 = vld [vmem:[%s5239_s4 + $0x28] sm:$0xff]  ;;  %v630_v49 = vld [vmem:[%s5239_s4 + $0x38] sm:$0xff]  ;;  %v627_v7 = vld [vmem:[%s5239_s4 + $0x20] sm:$0xff]  ;;  %s3347_s20 = sshll.u32 %s5441_s0, 4  ;;  %s5704_s17 = scalar_lea.sflag [#allocation16], %s533_s15  ;;  %s5696_s20 = int_to_ptr.vmem [resolvable:$true] %s3347_s20 }
  0xc0   : > { %1124 = vmatpush1.bf16.msra.mxu0 %v4087_v18  ;;  %v4130_v51 = vld [vmem:[#allocation7 + $0x1c0] ss:$8 sps:$4 sm:$0xff]   ;;  %v688_v52 = vpack.c.bf16 %v628_v47, %v624_v46  ;;  %v690_v53 = vpack.c.bf16 %v630_v49, %v626_v48  ;;  %v4131_v54 = vld [vmem:[#allocation7 + $0xb4] ss:$8 sps:$4 sm:$0xff]   ;;  %v4135_v56 = vld [vmem:[#allocation7 + $0xb0] ss:$8 sps:$4 sm:$0xff]   ;;  %v687_v14 = vpack.c.bf16 %v627_v7, %v623_v6 }
  0xc1   : > { %1237 = vmatpush1.bf16.msra.mxu1 %v4088_v19  ;;  %1125 = vmatprep.subr.bf16.mxu0 %v4089_v20  ;;  %v4133_v55 = vld [vmem:[#allocation7 + $0x1b4] ss:$8 sps:$4 sm:$0xff]   ;;  %v4136_v57 = vld [vmem:[#allocation7 + $0x1b0] ss:$8 sps:$4 sm:$0xff]   ;;  %v4137_v58 = vld [vmem:[#allocation7 + $0xa4] ss:$8 sps:$4 sm:$0xff]  }
  0xc2   : > { %1238 = vmatprep.subr.bf16.mxu1 %v4091_v21  ;;  %1147 = vmatprep.mubr.bf16.mxu0 %v688_v52  ;;  %v4139_v59 = vld [vmem:[#allocation7 + $0x1a4] ss:$8 sps:$4 sm:$0xff]   ;;  %v4141_v60 = vld [vmem:[#allocation7 + $0xa0] ss:$8 sps:$4 sm:$0xff]   ;;  %v4143_v62 = vld [vmem:[#allocation7 + $0x94] ss:$8 sps:$4 sm:$0xff]  }
  0xc3   : > { %1260 = vmatprep.mubr.bf16.mxu1 %v690_v53  ;;  %v4142_v61 = vld [vmem:[#allocation7 + $0x1a0] ss:$8 sps:$4 sm:$0xff]   ;;  %v4145_v63 = vld [vmem:[#allocation7 + $0x194] ss:$8 sps:$4 sm:$0xff]   ;;  %v4147_v0 = vld [vmem:[#allocation7 + $0x90] ss:$8 sps:$4 sm:$0xff]  }
  0xc4   : > { %1126 = vmatpush1.bf16.msra.mxu0 %v4093_v22  ;;  %v4148_v1 = vld [vmem:[#allocation7 + $0x190] ss:$8 sps:$4 sm:$0xff]   ;;  %v4149_v2 = vld [vmem:[#allocation7 + $0x84] ss:$8 sps:$4 sm:$0xff]   ;;  %v4153_v4 = vld [vmem:[#allocation7 + $0x80] ss:$8 sps:$4 sm:$0xff]  }
  0xc5   : > { %1239 = vmatpush1.bf16.msra.mxu1 %v4094_v23  ;;  %1127 = vmatprep.subr.bf16.mxu0 %v4095_v24  ;;  %v4151_v3 = vld [vmem:[#allocation7 + $0x184] ss:$8 sps:$4 sm:$0xff]   ;;  %v4154_v5 = vld [vmem:[#allocation7 + $0x180] ss:$8 sps:$4 sm:$0xff]   ;;  %v625_v8 = vld [vmem:[%s5239_s4 + $0x10] sm:$0xff]  ;;  %s4781_s14 = scalar_lea.vmem %s5696_s20, 2048 }
  0xc6   : > { %1240 = vmatprep.subr.bf16.mxu1 %v4097_v25  ;;  %v629_v9 = vld [vmem:[%s5239_s4 + $0x30] sm:$0xff]  ;;  %v632_v10 = vld [vmem:[%s5239_s4 + $0x48] sm:$0xff]  ;;  %v634_v12 = vld [vmem:[%s5239_s4 + $0x58] sm:$0xff]  ;;  %p4782_p13 = scmp.ne.s32.totalorder %s5696_s20, %s4781_s14  ;;  %p6029_p5 = scmp.ne.s32.totalorder %s6014_s27, 0 }
  0xc7   : > { %v636_v11 = vld [vmem:[%s5239_s4 + $0x68] sm:$0xff]  ;;  %v638_v13 = vld [vmem:[%s5239_s4 + $0x78] sm:$0xff]  ;;  %v689_v15 = vpack.c.bf16 %v629_v9, %v625_v8  ;;  %v631_v20 = vld [vmem:[%s5239_s4 + $0x40] sm:$0xff]  ;;  %s4935_s8 = smov [#allocation15]  }
  0xc8   : > { %1128 = vmatpush1.bf16.msra.mxu0 %v4099_v26  ;;  %v692_v16 = vpack.c.bf16 %v636_v11, %v632_v10  ;;  %v694_v17 = vpack.c.bf16 %v638_v13, %v634_v12  ;;  %v4155_v18 = vld [vmem:[#allocation8 + $0x78] sm:$0xff]   ;;  %v635_v21 = vld [vmem:[%s5239_s4 + $0x60] sm:$0xff]  ;;  %v633_v22 = vld [vmem:[%s5239_s4 + $0x50] sm:$0xff]  ;;  %p4783_p9 = pnand %p4782_p13, %p6029_p5 }
  0xc9   : > { %1241 = vmatpush1.bf16.msra.mxu1 %v4100_v27  ;;  %1129 = vmatprep.subr.bf16.mxu0 %v4101_v28  ;;  %v4156_v19 = vld [vmem:[#allocation8 + $0x38] sm:$0xff]   ;;  %v637_v23 = vld [vmem:[%s5239_s4 + $0x70] sm:$0xff]  ;;  %v640_v25 = vld [vmem:[%s5239_s4 + $0x88] sm:$0xff] }
  0xca   : > { %1242 = vmatprep.subr.bf16.mxu1 %v4103_v29  ;;  %v4157_v24 = vld [vmem:[#allocation8 + $0x70] sm:$0xff]   ;;  %v644_v26 = vld [vmem:[%s5239_s4 + $0xa8] sm:$0xff]  ;;  %v642_v27 = vld [vmem:[%s5239_s4 + $0x98] sm:$0xff]  ;;  %p4784_p11 = pneg %p4783_p9 }
  0xcb   : > { %v646_v28 = vld [vmem:[%s5239_s4 + $0xb8] sm:$0xff]  ;;  %v4158_v29 = vld [vmem:[#allocation8 + $0x30] sm:$0xff]   ;;  %v663_v10 = vld [vmem:[%s5239_s4 + $0x140] sm:$0xff] }
  0xcc   : > { %1130 = vmatpush1.bf16.msra.mxu0 %v4105_v30  ;;  %v4159_v30 = vld [vmem:[#allocation8 + $0x68] sm:$0xff]   ;;  %v649_v52 = vld [vmem:[%s5239_s4 + $0xd0] sm:$0xff]  ;;  %v667_v11 = vld [vmem:[%s5239_s4 + $0x160] sm:$0xff] }
  0xcd   : > { %1243 = vmatpush1.bf16.msra.mxu1 %v4106_v31  ;;  %1131 = vmatprep.subr.bf16.mxu0 %v4107_v32  ;;  %v691_v31 = vpack.c.bf16 %v635_v21, %v631_v20  ;;  %v693_v32 = vpack.c.bf16 %v637_v23, %v633_v22  ;;  %v653_v53 = vld [vmem:[%s5239_s4 + $0xf0] sm:$0xff]  ;;  %v671_v22 = vld [vmem:[%s5239_s4 + $0x180] sm:$0xff] }
  0xce   : > { %1244 = vmatprep.subr.bf16.mxu1 %v4109_v33  ;;  %v4160_v33 = vld [vmem:[#allocation8 + $0x28] sm:$0xff]   ;;  %v665_v12 = vld [vmem:[%s5239_s4 + $0x150] sm:$0xff]  ;;  %v675_v23 = vld [vmem:[%s5239_s4 + $0x1a0] sm:$0xff] }
  0xcf   : > { %v669_v13 = vld [vmem:[%s5239_s4 + $0x170] sm:$0xff] }
  0xd0   : > { %1132 = vmatpush2.bf16.msra.mxu0 %v4111_v34  ;;  %v696_v34 = vpack.c.bf16 %v644_v26, %v640_v25  ;;  %v677_v25 = vld [vmem:[%s5239_s4 + $0x1b0] sm:$0xff]  ;;  %v680_v26 = vld [vmem:[%s5239_s4 + $0x1c8] sm:$0xff] }
  0xd1   : > { %1245 = vmatpush2.bf16.msra.mxu1 %v4112_v35  ;;  %1133 = vmatprep.subr.bf16.mxu0 %v4113_v36  ;;  %v698_v35 = vpack.c.bf16 %v646_v28, %v642_v27  ;;  %v4161_v36 = vld [vmem:[#allocation8 + $0x60] sm:$0xff]   ;;  %v684_v27 = vld [vmem:[%s5239_s4 + $0x1e8] sm:$0xff]  ;;  %v682_v28 = vld [vmem:[%s5239_s4 + $0x1d8] sm:$0xff] }
  0xd2   : > { %1246 = vmatprep.subr.bf16.mxu1 %v4115_v37  ;;  %v639_v37 = vld [vmem:[%s5239_s4 + $0x80] sm:$0xff] }
  0xd4   : > { %1134 = vmatpush2.bf16.msra.mxu0 %v4117_v38  ;;  %v643_v38 = vld [vmem:[%s5239_s4 + $0xa0] sm:$0xff] }
  0xd5   : > { %1247 = vmatpush2.bf16.msra.mxu1 %v4118_v39  ;;  %1135 = vmatprep.subr.bf16.mxu0 %v4119_v40  ;;  %v641_v39 = vld [vmem:[%s5239_s4 + $0x90] sm:$0xff]  ;;  %v695_v46 = vpack.c.bf16 %v643_v38, %v639_v37 }
  0xd6   : > { %1248 = vmatprep.subr.bf16.mxu1 %v4121_v41  ;;  %v645_v40 = vld [vmem:[%s5239_s4 + $0xb0] sm:$0xff]  ;;  %v648_v41 = vld [vmem:[%s5239_s4 + $0xc8] sm:$0xff] }
  0xd7   : > { %v697_v47 = vpack.c.bf16 %v645_v40, %v641_v39  ;;  %v685_v37 = vld [vmem:[%s5239_s4 + $0x1f0] sm:$0xff]  ;;  %v4163_v40 = vld [vmem:[#allocation8 + $0x58] sm:$0xff]  }
  0xd8   : > { %1136 = vmatpush2.bf16.msra.mxu0 %v4123_v42  ;;  %v652_v42 = vld [vmem:[%s5239_s4 + $0xe8] sm:$0xff] }
  0xd9   : > { %1249 = vmatpush2.bf16.msra.mxu1 %v4124_v43  ;;  %1137 = vmatprep.subr.bf16.mxu0 %v4125_v44  ;;  %v650_v43 = vld [vmem:[%s5239_s4 + $0xd8] sm:$0xff]  ;;  %v700_v48 = vpack.c.bf16 %v652_v42, %v648_v41  ;;  %v4165_v42 = vld [vmem:[#allocation8 + $0x50] sm:$0xff]  }
  0xda   : > { %1250 = vmatprep.subr.bf16.mxu1 %v4127_v45  ;;  %v654_v44 = vld [vmem:[%s5239_s4 + $0xf8] sm:$0xff]  ;;  %v4162_v45 = vld [vmem:[#allocation8 + $0x20] sm:$0xff]  }
  0xdb   : > { %v702_v49 = vpack.c.bf16 %v654_v44, %v650_v43  ;;  %v4164_v41 = vld [vmem:[#allocation8 + $0x18] sm:$0xff]   ;;  %v4166_v43 = vld [vmem:[#allocation8 + $0x10] sm:$0xff]   ;;  %v4167_v44 = vld [vmem:[#allocation8 + $0x48] sm:$0xff]  }
  0xdc   : > { %1138 = vmatpush2.bf16.msra.mxu0 %v4129_v50  ;;  %v647_v50 = vld [vmem:[%s5239_s4 + $0xc0] sm:$0xff] }
  0xdd   : > { %1251 = vmatpush2.bf16.msra.mxu1 %v4130_v51  ;;  %1139 = vmatprep.subr.bf16.mxu0 %v4131_v54  ;;  %v651_v51 = vld [vmem:[%s5239_s4 + $0xe0] sm:$0xff]  ;;  %v656_v54 = vld [vmem:[%s5239_s4 + $0x108] sm:$0xff] }
  0xde   : > { %1252 = vmatprep.subr.bf16.mxu1 %v4133_v55  ;;  %v660_v55 = vld [vmem:[%s5239_s4 + $0x128] sm:$0xff] }
  0xe0   : > { %1140 = vmatpush2.bf16.msra.mxu0 %v4135_v56  ;;  %v658_v56 = vld [vmem:[%s5239_s4 + $0x118] sm:$0xff] }
  0xe1   : > { %1253 = vmatpush2.bf16.msra.mxu1 %v4136_v57  ;;  %1141 = vmatprep.subr.bf16.mxu0 %v4137_v58  ;;  %v662_v57 = vld [vmem:[%s5239_s4 + $0x138] sm:$0xff]  ;;  %v699_v58 = vpack.c.bf16 %v651_v51, %v647_v50 }
  0xe2   : > { %1254 = vmatprep.subr.bf16.mxu1 %v4139_v59  ;;  %v701_v59 = vpack.c.bf16 %v653_v53, %v649_v52  ;;  %v783_v52 = vld [vmem:[%s5966_s3] sm:$0x3] }
  0xe4   : > { %1142 = vmatpush2.bf16.msra.mxu0 %v4141_v60  ;;  %v704_v60 = vpack.c.bf16 %v660_v55, %v656_v54 }
  0xe5   : > { %1255 = vmatpush2.bf16.msra.mxu1 %v4142_v61  ;;  %1143 = vmatprep.subr.bf16.mxu0 %v4143_v62  ;;  %v706_v61 = vpack.c.bf16 %v662_v57, %v658_v56  ;;  %v655_v62 = vld [vmem:[%s5239_s4 + $0x100] sm:$0xff] }
  0xe6   : > { %1256 = vmatprep.subr.bf16.mxu1 %v4145_v63  ;;  %v659_v63 = vld [vmem:[%s5239_s4 + $0x120] sm:$0xff] }
  0xe7   : > { %v703_v6 = vpack.c.bf16 %v659_v63, %v655_v62 }
  0xe8   : > { %1144 = vmatpush2.bf16.msra.mxu0 %v4147_v0  ;;  %v657_v0 = vld [vmem:[%s5239_s4 + $0x110] sm:$0xff] }
  0xe9   : > { %1257 = vmatpush2.bf16.msra.mxu1 %v4148_v1  ;;  %1145 = vmatprep.subr.bf16.mxu0 %v4149_v2  ;;  %v661_v1 = vld [vmem:[%s5239_s4 + $0x130] sm:$0xff]  ;;  %v664_v2 = vld [vmem:[%s5239_s4 + $0x148] sm:$0xff] }
  0xea   : > { %1258 = vmatprep.subr.bf16.mxu1 %v4151_v3  ;;  %v668_v3 = vld [vmem:[%s5239_s4 + $0x168] sm:$0xff]  ;;  %v705_v7 = vpack.c.bf16 %v661_v1, %v657_v0 }
  0xeb   : > { %v708_v8 = vpack.c.bf16 %v668_v3, %v664_v2 }
  0xec   : > { %1146 = vmatpush2.bf16.msra.mxu0 %v4153_v4  ;;  %v666_v4 = vld [vmem:[%s5239_s4 + $0x158] sm:$0xff] }
  0xed   : > { %1259 = vmatpush2.bf16.msra.mxu1 %v4154_v5  ;;  %3790 = vmatprep.subr.bf16.mxu0 %v4155_v18  ;;  %v670_v5 = vld [vmem:[%s5239_s4 + $0x178] sm:$0xff] }
  0xee   : > { %3918 = vmatprep.subr.bf16.mxu1 %v4155_v18  ;;  %v710_v9 = vpack.c.bf16 %v670_v5, %v666_v4  ;;  %v707_v18 = vpack.c.bf16 %v667_v11, %v663_v10 }
  0xef   : > { %1148 = vmatmul.mubr.bf16.vlgmr.msra.gmra.mxu0 %v687_v14  ;;  %v672_v14 = vld [vmem:[%s5239_s4 + $0x188] sm:$0xff] }
  0xf0   : > { %1261 = vmatmul.mubr.bf16.vlgmr.msra.gmra.mxu1 %v689_v15  ;;  %1157 = vmatprep.mubr.bf16.mxu0 %v692_v16  ;;  %v676_v15 = vld [vmem:[%s5239_s4 + $0x1a8] sm:$0xff]  ;;  %v674_v16 = vld [vmem:[%s5239_s4 + $0x198] sm:$0xff] }
  0xf1   : > { %1270 = vmatprep.mubr.bf16.mxu1 %v694_v17  ;;  %3926 = vmatpush3.bf16.msra.mxu1 %v4156_v19  ;;  %v678_v17 = vld [vmem:[%s5239_s4 + $0x1b8] sm:$0xff]  ;;  %v712_v20 = vpack.c.bf16 %v676_v15, %v672_v14 }
  0xf2   : > { %3791 = vmatpush3.bf16.msra.mxu0 %v4156_v19  ;;  %3919 = vmatprep.subr.bf16.mxu1 %v4157_v24  ;;  %v709_v19 = vpack.c.bf16 %v669_v13, %v665_v12  ;;  %v714_v21 = vpack.c.bf16 %v678_v17, %v674_v16 }
  0xf3   : > { %3792 = vmatprep.subr.bf16.mxu0 %v4157_v24  ;;  %v673_v24 = vld [vmem:[%s5239_s4 + $0x190] sm:$0xff] }
  0xf5   : > { %3927 = vmatpush3.bf16.msra.mxu1 %v4158_v29 }
  0xf6   : > { %3793 = vmatpush3.bf16.msra.mxu0 %v4158_v29  ;;  %3920 = vmatprep.subr.bf16.mxu1 %v4159_v30  ;;  %v686_v29 = vld [vmem:[%s5239_s4 + $0x1f8] sm:$0xff] }
  0xf7   : > { %3794 = vmatprep.subr.bf16.mxu0 %v4159_v30  ;;  %1158 = vmatmul.mubr.bf16.gmra.mxu0 %v691_v31  ;;  %v711_v30 = vpack.c.bf16 %v675_v23, %v671_v22  ;;  %v713_v31 = vpack.c.bf16 %v677_v25, %v673_v24 }
  0xf8   : > { %1271 = vmatmul.mubr.bf16.gmra.mxu1 %v693_v32  ;;  %1167 = vmatprep.mubr.bf16.mxu0 %v696_v34  ;;  %v716_v32 = vpack.c.bf16 %v684_v27, %v680_v26  ;;  %v679_v34 = vld [vmem:[%s5239_s4 + $0x1c0] sm:$0xff] }
  0xf9   : > { %1280 = vmatprep.mubr.bf16.mxu1 %v698_v35  ;;  %3928 = vmatpush3.bf16.msra.mxu1 %v4160_v33  ;;  %v683_v35 = vld [vmem:[%s5239_s4 + $0x1e0] sm:$0xff] }
  0xfa   : > { %3795 = vmatpush3.bf16.msra.mxu0 %v4160_v33  ;;  %3921 = vmatprep.subr.bf16.mxu1 %v4161_v36  ;;  %v718_v33 = vpack.c.bf16 %v686_v29, %v682_v28  ;;  %v715_v38 = vpack.c.bf16 %v683_v35, %v679_v34 }
  0xfb   : > { %3796 = vmatprep.subr.bf16.mxu0 %v4161_v36  ;;  %v681_v36 = vld [vmem:[%s5239_s4 + $0x1d0] sm:$0xff]  ;;  %s3788_s4 = sshll.u32 %s5038_s19, 11 }
  0xfc   : > { %v717_v39 = vpack.c.bf16 %v685_v37, %v681_v36  ;;  %s5691_s23 = scalar_lea.hbm %s5976_s13, %s3788_s4 }
  0xfd   : > { %3929 = vmatpush3.bf16.msra.mxu1 %v4162_v45 }
  0xfe   : > { %3797 = vmatpush3.bf16.msra.mxu0 %v4162_v45  ;;  %3922 = vmatprep.subr.bf16.mxu1 %v4163_v40  ;;  %v4168_v45 = vld [vmem:[#allocation8 + $0x8] sm:$0xff]  }
  0xff   : > { %1168 = vmatmul.mubr.bf16.gmra.mxu0 %v695_v46  ;;  %3798 = vmatprep.subr.bf16.mxu0 %v4163_v40  ;;  %v4169_v46 = vld [vmem:[#allocation8 + $0x40] sm:$0xff]  }
 0x100   : > { %1281 = vmatmul.mubr.bf16.gmra.mxu1 %v697_v47  ;;  %1177 = vmatprep.mubr.bf16.mxu0 %v700_v48  ;;  %v4170_v47 = vld [vmem:[#allocation8] sm:$0xff]   ;;  %v4171_v48 = vld [vmem:[#allocation10 + $0x78] sm:$0xff]  }
 0x101   : > { %1290 = vmatprep.mubr.bf16.mxu1 %v702_v49  ;;  %3930 = vmatpush3.bf16.msra.mxu1 %v4164_v41  ;;  %v785_v49 = vlaneseq }
 0x102   : > { %3799 = vmatpush3.bf16.msra.mxu0 %v4164_v41  ;;  %3923 = vmatprep.subr.bf16.mxu1 %v4165_v42 }
 0x103   : > { %3800 = vmatprep.subr.bf16.mxu0 %v4165_v42  ;;  %v5334_v50 = vshrl.u32 %v785_v49, 7 }
 0x105   : > { %3931 = vmatpush3.bf16.msra.mxu1 %v4166_v43  ;;  %v5337_v51 = vsub.s32 0, %v5334_v50  ;;  %v5343_v53 = vsub.s32 1, %v5334_v50 }
 0x106   : > { %3801 = vmatpush3.bf16.msra.mxu0 %v4166_v43  ;;  %3924 = vmatprep.subr.bf16.mxu1 %v4167_v44 }
 0x107   : > { %1178 = vmatmul.mubr.bf16.gmra.mxu0 %v699_v58  ;;  %3802 = vmatprep.subr.bf16.mxu0 %v4167_v44  ;;  %v5346_v54 = vrot.slane %v783_v52, %v5337_v51  ;;  %v5349_v55 = vrot.slane %v783_v52, %v5343_v53 }
 0x108   : > { %1291 = vmatmul.mubr.bf16.gmra.mxu1 %v701_v59  ;;  %1187 = vmatprep.mubr.bf16.mxu0 %v704_v60 }
 0x109   : > { %1300 = vmatprep.mubr.bf16.mxu1 %v706_v61  ;;  %3932 = vmatpush3.bf16.msra.mxu1 %v4168_v45 }
 0x10a   : > { %3803 = vmatpush3.bf16.msra.mxu0 %v4168_v45  ;;  %3925 = vmatprep.subr.bf16.mxu1 %v4169_v46 }
 0x10b   : > { %3804 = vmatprep.subr.bf16.mxu0 %v4169_v46 }
 0x10d   : > { %3933 = vmatpush3.bf16.msra.mxu1 %v4170_v47 }
 0x10e   : > { %3805 = vmatpush3.bf16.msra.mxu0 %v4170_v47  ;;  %3854 = vmatprep.subr.bf16.mxu1 %v4171_v48 }
 0x10f   : > { %1188 = vmatmul.mubr.bf16.gmra.mxu0 %v703_v6 }
 0x110   : > { %1301 = vmatmul.mubr.bf16.gmra.mxu1 %v705_v7  ;;  %1197 = vmatprep.mubr.bf16.mxu0 %v708_v8 }
 0x111   : > { %1310 = vmatprep.mubr.bf16.mxu1 %v710_v9 }
 0x117   : > { %1198 = vmatmul.mubr.bf16.gmra.mxu0 %v707_v18 }
 0x118   : > { %1311 = vmatmul.mubr.bf16.gmra.mxu1 %v709_v19  ;;  %1207 = vmatprep.mubr.bf16.mxu0 %v712_v20 }
 0x119   : > { %1320 = vmatprep.mubr.bf16.mxu1 %v714_v21 }
 0x11f   : > { %1208 = vmatmul.mubr.bf16.gmra.mxu0 %v711_v30 }
 0x120   : > { %1321 = vmatmul.mubr.bf16.gmra.mxu1 %v713_v31  ;;  %1217 = vmatprep.mubr.bf16.mxu0 %v716_v32 }
 0x121   : > { %1330 = vmatprep.mubr.bf16.mxu1 %v718_v33 }
 0x127   : > { %1218 = vmatmul.mubr.bf16.gmra.mxu0 %v715_v38 }
 0x128   : > { %1331 = vmatmul.mubr.bf16.gmra.mxu1 %v717_v39 }
 0x1af   : > { %v1149_v56 = vpop.f32.mrf.mxu0 }
 0x1b0   : > { %v1262_v57 = vpop.f32.mrf.mxu1  ;;  %v1150_v58 = vadd.f32 %v1149_v56, %v5346_v54 }
 0x1b1   : > { %v1151_v59 = vpop.f32.mrf.mxu0 }
 0x1b2   : > { %v1264_v60 = vpop.f32.mrf.mxu1  ;;  %v1152_v61 = vadd.f32 %v1151_v59, %v5349_v55  ;;  %v1263_v2 = vadd.f32 %v1262_v57, %v1150_v58 }
 0x1b3   : > { %v1153_v62 = vpop.f32.mrf.mxu0 }
 0x1b4   : > { %v1266_v63 = vpop.f32.mrf.mxu1  ;;  %v1265_v0 = vadd.f32 %v1264_v60, %v1152_v61  ;;  %v1154_v1 = vadd.f32 %v1153_v62, %v5346_v54  ;;  %v1341_v12 = vmul.f32 0.2, %v1263_v2 }
 0x1b5   : > { %v1155_v3 = vpop.f32.mrf.mxu0 }
 0x1b6   : > { %v1268_v4 = vpop.f32.mrf.mxu1  ;;  %v1267_v5 = vadd.f32 %v1266_v63, %v1154_v1  ;;  %v1156_v6 = vadd.f32 %v1155_v3, %v5349_v55  ;;  %v1342_v9 = vmul.f32 0.2, %v1265_v0  ;;  %v1373_v23 = vmax.f32 %v1263_v2, %v1341_v12 }
 0x1b7   : > { %v1159_v7 = vpop.f32.mrf.mxu0 }
 0x1b8   : > { %v1272_v8 = vpop.f32.mrf.mxu1  ;;  %v1343_v10 = vmul.f32 0.2, %v1267_v5  ;;  %v1269_v11 = vadd.f32 %v1268_v4, %v1156_v6  ;;  %v1160_v16 = vadd.f32 %v1159_v7, %v5346_v54  ;;  %v1374_v21 = vmax.f32 %v1265_v0, %v1342_v9 }
 0x1b9   : > { %v1161_v13 = vpop.f32.mrf.mxu0 }
 0x1ba   : > { %v1274_v14 = vpop.f32.mrf.mxu1  ;;  %v1344_v15 = vmul.f32 0.2, %v1269_v11  ;;  %v1162_v17 = vadd.f32 %v1161_v13, %v5349_v55  ;;  %v1375_v18 = vmax.f32 %v1267_v5, %v1343_v10  ;;  %v1273_v28 = vadd.f32 %v1272_v8, %v1160_v16 }
 0x1bb   : > { %v1163_v19 = vpop.f32.mrf.mxu0 }
 0x1bc   : > { %v1276_v20 = vpop.f32.mrf.mxu1  ;;  %v1376_v22 = vmax.f32 %v1269_v11, %v1344_v15  ;;  %v1275_v24 = vadd.f32 %v1274_v14, %v1162_v17  ;;  %v1164_v25 = vadd.f32 %v1163_v19, %v5346_v54  ;;  %v5361_v31 = vpack.c.bf16 %v1375_v18, %v1373_v23 }
 0x1bd   : > { %v1165_v26 = vpop.f32.mrf.mxu0  ;;  %v1345_v40 = vmul.f32 0.2, %v1273_v28 }
 0x1be   : > { %v1278_v27 = vpop.f32.mrf.mxu1  ;;  %v1166_v29 = vadd.f32 %v1165_v26, %v5349_v55  ;;  %v5359_v30 = vpack.c.bf16 %v1376_v22, %v1374_v21  ;;  %v1277_v32 = vadd.f32 %v1276_v20, %v1164_v25  ;;  %v1346_v36 = vmul.f32 0.2, %v1275_v24 }
 0x1bf   : > { %v1169_v33 = vpop.f32.mrf.mxu0  ;;  %v1377_v58 = vmax.f32 %v1273_v28, %v1345_v40 }
 0x1c0   : > { %v1282_v34 = vpop.f32.mrf.mxu1  ;;  %v1279_v35 = vadd.f32 %v1278_v27, %v1166_v29  ;;  %1588 = vmatprep.mubr.bf16.mxu0 %v5359_v30  ;;  %v1347_v37 = vmul.f32 0.2, %v1277_v32  ;;  %v1170_v42 = vadd.f32 %v1169_v33, %v5346_v54  ;;  %v1378_v49 = vmax.f32 %v1275_v24, %v1346_v36 }
 0x1c1   : > { %v1171_v38 = vpop.f32.mrf.mxu0  ;;  %1589 = vmatmul.mubr.bf16.vlgmr.msra.gmra.mxu0 %v5361_v31 }
 0x1c2   : > { %v1284_v39 = vpop.f32.mrf.mxu1  ;;  %v1348_v41 = vmul.f32 0.2, %v1279_v35  ;;  %v1172_v43 = vadd.f32 %v1171_v38, %v5349_v55  ;;  %v1379_v46 = vmax.f32 %v1277_v32, %v1347_v37  ;;  %v1283_v59 = vadd.f32 %v1282_v34, %v1170_v42 }
 0x1c3   : > { %v1173_v44 = vpop.f32.mrf.mxu0 }
 0x1c4   : > { %v1286_v45 = vpop.f32.mrf.mxu1  ;;  %v1380_v47 = vmax.f32 %v1279_v35, %v1348_v41  ;;  %v1174_v48 = vadd.f32 %v1173_v44, %v5346_v54  ;;  %v1285_v52 = vadd.f32 %v1284_v39, %v1172_v43  ;;  %v5371_v3 = vpack.c.bf16 %v1379_v46, %v1377_v58 }
 0x1c5   : > { %v1175_v56 = vpop.f32.mrf.mxu0  ;;  %v1349_v7 = vmul.f32 0.2, %v1283_v59 }
 0x1c6   : > { %v1288_v57 = vpop.f32.mrf.mxu1  ;;  %v1287_v60 = vadd.f32 %v1286_v45, %v1174_v48  ;;  %v1176_v61 = vadd.f32 %v1175_v56, %v5349_v55  ;;  %v5369_v0 = vpack.c.bf16 %v1380_v47, %v1378_v49  ;;  %v1350_v4 = vmul.f32 0.2, %v1285_v52 }
 0x1c7   : > { %v1179_v62 = vpop.f32.mrf.mxu0  ;;  %v1381_v20 = vmax.f32 %v1283_v59, %v1349_v7 }
 0x1c8   : > { %v1292_v63 = vpop.f32.mrf.mxu1  ;;  %v1351_v1 = vmul.f32 0.2, %v1287_v60  ;;  %v1289_v2 = vadd.f32 %v1288_v57, %v1176_v61  ;;  %1596 = vmatprep.mubr.bf16.mxu0 %v5369_v0  ;;  %v1180_v9 = vadd.f32 %v1179_v62, %v5346_v54  ;;  %v1382_v16 = vmax.f32 %v1285_v52, %v1350_v4 }
 0x1c9   : > { %v1181_v5 = vpop.f32.mrf.mxu0  ;;  %1597 = vmatmul.mubr.bf16.gmra.mxu0 %v5371_v3 }
 0x1ca   : > { %v1294_v6 = vpop.f32.mrf.mxu1  ;;  %v1352_v8 = vmul.f32 0.2, %v1289_v2  ;;  %v1182_v10 = vadd.f32 %v1181_v5, %v5349_v55  ;;  %v1383_v13 = vmax.f32 %v1287_v60, %v1351_v1  ;;  %v1293_v21 = vadd.f32 %v1292_v63, %v1180_v9 }
 0x1cb   : > { %v1183_v11 = vpop.f32.mrf.mxu0 }
 0x1cc   : > { %v1296_v12 = vpop.f32.mrf.mxu1  ;;  %v1384_v14 = vmax.f32 %v1289_v2, %v1352_v8  ;;  %v1184_v15 = vadd.f32 %v1183_v11, %v5346_v54  ;;  %v1295_v17 = vadd.f32 %v1294_v6, %v1182_v10  ;;  %v5381_v29 = vpack.c.bf16 %v1383_v13, %v1381_v20 }
 0x1cd   : > { %v1185_v18 = vpop.f32.mrf.mxu0  ;;  %v1353_v36 = vmul.f32 0.2, %v1293_v21 }
 0x1ce   : > { %v1298_v19 = vpop.f32.mrf.mxu1  ;;  %v1297_v22 = vadd.f32 %v1296_v12, %v1184_v15  ;;  %v1186_v23 = vadd.f32 %v1185_v18, %v5349_v55  ;;  %v5379_v26 = vpack.c.bf16 %v1384_v14, %v1382_v16  ;;  %v1354_v32 = vmul.f32 0.2, %v1295_v17 }
 0x1cf   : > { %v1189_v24 = vpop.f32.mrf.mxu0  ;;  %v1385_v49 = vmax.f32 %v1293_v21, %v1353_v36  ;;  %v4172_v21 = vld [vmem:[#allocation10 + $0x38] sm:$0xff]  }
 0x1d0   : > { %v1302_v25 = vpop.f32.mrf.mxu1  ;;  %v1355_v27 = vmul.f32 0.2, %v1297_v22  ;;  %v1299_v28 = vadd.f32 %v1298_v19, %v1186_v23  ;;  %v1190_v33 = vadd.f32 %v1189_v24, %v5346_v54  ;;  %1604 = vmatprep.mubr.bf16.mxu0 %v5379_v26  ;;  %v1386_v45 = vmax.f32 %v1295_v17, %v1354_v32 }
 0x1d1   : > { %v1191_v34 = vpop.f32.mrf.mxu0  ;;  %1605 = vmatmul.mubr.bf16.gmra.mxu0 %v5381_v29 }
 0x1d2   : > { %v1304_v35 = vpop.f32.mrf.mxu1  ;;  %v1356_v37 = vmul.f32 0.2, %v1299_v28  ;;  %v1192_v38 = vadd.f32 %v1191_v34, %v5349_v55  ;;  %v1387_v41 = vmax.f32 %v1297_v22, %v1355_v27  ;;  %v1303_v46 = vadd.f32 %v1302_v25, %v1190_v33  ;;  %v4173_v27 = vld [vmem:[#allocation10 + $0x70] sm:$0xff]  }
 0x1d3   : > { %v1193_v39 = vpop.f32.mrf.mxu0 }
 0x1d4   : > { %v1306_v40 = vpop.f32.mrf.mxu1  ;;  %v1388_v42 = vmax.f32 %v1299_v28, %v1356_v37  ;;  %v1305_v43 = vadd.f32 %v1304_v35, %v1192_v38  ;;  %v1194_v44 = vadd.f32 %v1193_v39, %v5346_v54  ;;  %v5391_v63 = vpack.c.bf16 %v1387_v41, %v1385_v49 }
 0x1d5   : > { %v1195_v47 = vpop.f32.mrf.mxu0  ;;  %v1357_v1 = vmul.f32 0.2, %v1303_v46 }
 0x1d6   : > { %v1308_v48 = vpop.f32.mrf.mxu1  ;;  %v1307_v52 = vadd.f32 %v1306_v40, %v1194_v44  ;;  %v1196_v56 = vadd.f32 %v1195_v47, %v5349_v55  ;;  %v5389_v59 = vpack.c.bf16 %v1388_v42, %v1386_v45  ;;  %v1358_v60 = vmul.f32 0.2, %v1305_v43  ;;  %v4174_v40 = vld [vmem:[#allocation10 + $0x30] sm:$0xff]  }
 0x1d7   : > { %v1199_v57 = vpop.f32.mrf.mxu0  ;;  %v1389_v13 = vmax.f32 %v1303_v46, %v1357_v1 }
 0x1d8   : > { %v1312_v58 = vpop.f32.mrf.mxu1  ;;  %v1359_v61 = vmul.f32 0.2, %v1307_v52  ;;  %v1309_v62 = vadd.f32 %v1308_v48, %v1196_v56  ;;  %1612 = vmatprep.mubr.bf16.mxu0 %v5389_v59  ;;  %v1200_v6 = vadd.f32 %v1199_v57, %v5346_v54  ;;  %v1390_v11 = vmax.f32 %v1305_v43, %v1358_v60  ;;  %v4175_v43 = vld [vmem:[#allocation10 + $0x68] sm:$0xff]  }
 0x1d9   : > { %v1201_v2 = vpop.f32.mrf.mxu0  ;;  %1613 = vmatmul.mubr.bf16.gmra.mxu0 %v5391_v63 }
 0x1da   : > { %v1314_v4 = vpop.f32.mrf.mxu1  ;;  %v1360_v5 = vmul.f32 0.2, %v1309_v62  ;;  %v1202_v7 = vadd.f32 %v1201_v2, %v5349_v55  ;;  %v1391_v8 = vmax.f32 %v1307_v52, %v1359_v61  ;;  %v1313_v18 = vadd.f32 %v1312_v58, %v1200_v6  ;;  %v4176_v2 = vld [vmem:[#allocation10 + $0x28] sm:$0xff]  }
 0x1db   : > { %v1203_v9 = vpop.f32.mrf.mxu0 }
 0x1dc   : > { %v1316_v10 = vpop.f32.mrf.mxu1  ;;  %v1392_v12 = vmax.f32 %v1309_v62, %v1360_v5  ;;  %v1315_v14 = vadd.f32 %v1314_v4, %v1202_v7  ;;  %v1204_v15 = vadd.f32 %v1203_v9, %v5346_v54  ;;  %v5401_v22 = vpack.c.bf16 %v1391_v8, %v1389_v13  ;;  %v4177_v7 = vld [vmem:[#allocation10 + $0x60] sm:$0xff]  }
 0x1dd   : > { %v1205_v16 = vpop.f32.mrf.mxu0  ;;  %v1361_v36 = vmul.f32 0.2, %v1313_v18 }
 0x1de   : > { %v1318_v17 = vpop.f32.mrf.mxu1  ;;  %v1206_v19 = vadd.f32 %v1205_v16, %v5349_v55  ;;  %v5399_v20 = vpack.c.bf16 %v1392_v12, %v1390_v11  ;;  %v1317_v23 = vadd.f32 %v1316_v10, %v1204_v15  ;;  %v1362_v32 = vmul.f32 0.2, %v1315_v14 }
 0x1df   : > { %v1209_v24 = vpop.f32.mrf.mxu0  ;;  %v1393_v56 = vmax.f32 %v1313_v18, %v1361_v36 }
 0x1e0   : > { %v1322_v25 = vpop.f32.mrf.mxu1  ;;  %v1319_v28 = vadd.f32 %v1318_v17, %v1206_v19  ;;  %1620 = vmatprep.mubr.bf16.mxu1 %v5399_v20  ;;  %v1363_v33 = vmul.f32 0.2, %v1317_v23  ;;  %v1210_v38 = vadd.f32 %v1209_v24, %v5346_v54  ;;  %v1394_v47 = vmax.f32 %v1315_v14, %v1362_v32  ;;  %v4178_v17 = vld [vmem:[#allocation10 + $0x20] sm:$0xff]   ;;  %v4179_v24 = vld [vmem:[#allocation10 + $0x58] sm:$0xff]  }
 0x1e1   : > { %v1211_v34 = vpop.f32.mrf.mxu0  ;;  %1621 = vmatmul.mubr.bf16.vlgmr.msra.gmra.mxu1 %v5401_v22 }
 0x1e2   : > { %v1324_v35 = vpop.f32.mrf.mxu1  ;;  %v1364_v37 = vmul.f32 0.2, %v1319_v28  ;;  %v1212_v39 = vadd.f32 %v1211_v34, %v5349_v55  ;;  %3855 = vmatpush3.bf16.msra.mxu1 %v4172_v21  ;;  %v1395_v44 = vmax.f32 %v1317_v23, %v1363_v33  ;;  %v1323_v57 = vadd.f32 %v1322_v25, %v1210_v38 }
 0x1e3   : > { %v1213_v41 = vpop.f32.mrf.mxu0  ;;  %3856 = vmatprep.subr.bf16.mxu1 %v4173_v27 }
 0x1e4   : > { %v1326_v42 = vpop.f32.mrf.mxu1  ;;  %v1396_v45 = vmax.f32 %v1319_v28, %v1364_v37  ;;  %v1214_v46 = vadd.f32 %v1213_v41, %v5346_v54  ;;  %v1325_v48 = vadd.f32 %v1324_v35, %v1212_v39  ;;  %v5411_v6 = vpack.c.bf16 %v1395_v44, %v1393_v56  ;;  %v4180_v37 = vld [vmem:[#allocation10 + $0x18] sm:$0xff]   ;;  %v4182_v44 = vld [vmem:[#allocation10 + $0x10] sm:$0xff]  }
 0x1e5   : > { %v1215_v49 = vpop.f32.mrf.mxu0  ;;  %v1365_v11 = vmul.f32 0.2, %v1323_v57 }
 0x1e6   : > { %v1328_v52 = vpop.f32.mrf.mxu1  ;;  %v1327_v58 = vadd.f32 %v1326_v42, %v1214_v46  ;;  %v1216_v60 = vadd.f32 %v1215_v49, %v5349_v55  ;;  %3857 = vmatpush3.bf16.msra.mxu1 %v4174_v40  ;;  %v5409_v1 = vpack.c.bf16 %v1396_v45, %v1394_v47  ;;  %v1366_v8 = vmul.f32 0.2, %v1325_v48  ;;  %v4181_v42 = vld [vmem:[#allocation10 + $0x50] sm:$0xff]  }
 0x1e7   : > { %v1219_v61 = vpop.f32.mrf.mxu0  ;;  %3858 = vmatprep.subr.bf16.mxu1 %v4175_v43  ;;  %v1397_v28 = vmax.f32 %v1323_v57, %v1365_v11  ;;  %v4185_v57 = vld [vmem:[#allocation10 + $0x40] sm:$0xff]  }
 0x1e8   : > { %v1332_v62 = vpop.f32.mrf.mxu1  ;;  %v1367_v4 = vmul.f32 0.2, %v1327_v58  ;;  %v1329_v5 = vadd.f32 %v1328_v52, %v1216_v60  ;;  %1628 = vmatprep.mubr.bf16.mxu1 %v5409_v1  ;;  %v1220_v13 = vadd.f32 %v1219_v61, %v5346_v54  ;;  %v1398_v25 = vmax.f32 %v1325_v48, %v1366_v8  ;;  %v4184_v52 = vld [vmem:[#allocation10 + $0x8] sm:$0xff]  }
 0x1e9   : > { %v1221_v9 = vpop.f32.mrf.mxu0  ;;  %1629 = vmatmul.mubr.bf16.gmra.mxu1 %v5411_v6  ;;  %v4204_v60 = vld [vmem:[#allocation11 + $0x24] ss:$8 sps:$4 sm:$0xff]   ;;  %v4202_v61 = vld [vmem:[#allocation11 + $0x20] ss:$8 sps:$4 sm:$0xff]  }
 0x1ea   : > { %v1334_v10 = vpop.f32.mrf.mxu1  ;;  %v1368_v12 = vmul.f32 0.2, %v1329_v5  ;;  %v1222_v14 = vadd.f32 %v1221_v9, %v5349_v55  ;;  %3859 = vmatpush3.bf16.msra.mxu1 %v4176_v2  ;;  %v1399_v18 = vmax.f32 %v1327_v58, %v1367_v4  ;;  %v1333_v32 = vadd.f32 %v1332_v62, %v1220_v13  ;;  %v4186_v58 = vld [vmem:[#allocation10] sm:$0xff]   ;;  %v4207_v62 = vld [vmem:[#allocation11 + $0x14] ss:$8 sps:$4 sm:$0xff]  }
 0x1eb   : > { %v1223_v15 = vpop.f32.mrf.mxu0  ;;  %3860 = vmatprep.subr.bf16.mxu1 %v4177_v7  ;;  %v4210_v2 = vld [vmem:[#allocation11 + $0x4] ss:$8 sps:$4 sm:$0xff]   ;;  %v4208_v4 = vld [vmem:[#allocation11] ss:$8 sps:$4 sm:$0xff]  }
 0x1ec   : > { %v1336_v16 = vpop.f32.mrf.mxu1  ;;  %v1400_v19 = vmax.f32 %v1329_v5, %v1368_v12  ;;  %v1335_v21 = vadd.f32 %v1334_v10, %v1222_v14  ;;  %v1224_v23 = vadd.f32 %v1223_v15, %v5346_v54  ;;  %v1417_v41 = vpack.c.bf16 %v1399_v18, %v1397_v28  ;;  %v5435_v7 = vld [vmem:[%s5968_s5] ss:$0 sm:$0xff] }
 0x1ed   : > { %v1225_v27 = vpop.f32.mrf.mxu0  ;;  %v1369_v54 = vmul.f32 0.2, %v1333_v32  ;;  %v4934_v5 = vmov 0  }
 0x1ee   : > { %v1337_v33 = vadd.f32 %v1336_v16, %v1224_v23  ;;  %v1226_v34 = vadd.f32 %v1225_v27, %v5349_v55  ;;  %v1338_v35 = vpop.f32.mrf.mxu1  ;;  %3861 = vmatpush3.bf16.msra.mxu1 %v4178_v17  ;;  %v1418_v36 = vpack.c.bf16 %v1400_v19, %v1398_v25  ;;  %v1370_v38 = vmul.f32 0.2, %v1335_v21  ;;  %v4183_v55 = vld [vmem:[#allocation10 + $0x48] sm:$0xff]   ;;  %2129 = vmatprep.mubr.bf16.mxu0 %v4934_v5 }
 0x1ef   : > { %3862 = vmatprep.subr.bf16.mxu1 %v4179_v24  ;;  %v1401_v48 = vmax.f32 %v1333_v32, %v1369_v54  ;;  %v4216_v54 = vld [vmem:[#allocation13 + $0xec] ss:$16 sps:$4 sm:$0xff]  }
 0x1f0   : > { %v1371_v39 = vmul.f32 0.2, %v1337_v33  ;;  %v1339_v40 = vadd.f32 %v1338_v35, %v1226_v34  ;;  %1636 = vmatprep.mubr.bf16.mxu1 %v1418_v36  ;;  %v1402_v45 = vmax.f32 %v1335_v21, %v1370_v38 }
 0x1f1   : > { %1637 = vmatmul.mubr.bf16.gmra.mxu1 %v1417_v41 }
 0x1f2   : > { %v1372_v43 = vmul.f32 0.2, %v1339_v40  ;;  %3863 = vmatpush3.bf16.msra.mxu1 %v4180_v37  ;;  %v1403_v46 = vmax.f32 %v1337_v33, %v1371_v39 }
 0x1f3   : > { %3864 = vmatprep.subr.bf16.mxu1 %v4181_v42 }
 0x1f4   : > { %v1404_v47 = vmax.f32 %v1339_v40, %v1372_v43  ;;  %v1419_v56 = vpack.c.bf16 %v1403_v46, %v1401_v48  ;;  %v4211_v40 = vld [vmem:[#allocation13 + $0xe0] ss:$16 sps:$4 sm:$0xff]   ;;  %v4219_v43 = vld [vmem:[#allocation13 + $0xc4] ss:$16 sps:$4 sm:$0xff]  }
 0x1f5   : > { %v4217_v46 = vld [vmem:[#allocation13 + $0xc0] ss:$16 sps:$4 sm:$0xff]   ;;  %v4225_v48 = vld [vmem:[#allocation13 + $0xa4] ss:$16 sps:$4 sm:$0xff]  }
 0x1f6   : > { %v1420_v49 = vpack.c.bf16 %v1404_v47, %v1402_v45  ;;  %3865 = vmatpush3.bf16.msra.mxu1 %v4182_v44 }
 0x1f7   : > { %3866 = vmatprep.subr.bf16.mxu1 %v4183_v55 }
 0x1f8   : > { %1644 = vmatprep.mubr.bf16.mxu1 %v1420_v49 }
 0x1f9   : > { %1645 = vmatmul.mubr.bf16.gmra.mxu1 %v1419_v56 }
 0x1fa   : > { %3867 = vmatpush3.bf16.msra.mxu1 %v4184_v52  ;;  %1820 = vmatprep.mubr.bf16.mxu1 %v5359_v30  ;;  %v4189_v30 = vld [vmem:[#allocation11 + $0x74] ss:$8 sps:$4 sm:$0xff]  }
 0x1fb   : > { %3868 = vmatprep.subr.bf16.mxu1 %v4185_v57  ;;  %2097 = vmatprep.subr.bf16.mxu0 %v4189_v30  ;;  %v4223_v57 = vld [vmem:[#allocation13 + $0xa0] ss:$16 sps:$4 sm:$0xff]   ;;  %v4231_v30 = vld [vmem:[#allocation13 + $0x84] ss:$16 sps:$4 sm:$0xff]  }
 0x1fe   : > { %3869 = vmatpush3.bf16.msra.mxu1 %v4186_v58 }
 0x201   : > { %1821 = vmatmul.mubr.bf16.vlgmr.msra.gmra.mxu1 %v5361_v31  ;;  %v4187_v31 = vld [vmem:[#allocation11 + $0x70] ss:$8 sps:$4 sm:$0xff]  }
 0x202   : > { %1828 = vmatprep.mubr.bf16.mxu1 %v5369_v0  ;;  %2098 = vmatpush1.bf16.msra.mxu0 %v4187_v31  ;;  %v4192_v0 = vld [vmem:[#allocation11 + $0x64] ss:$8 sps:$4 sm:$0xff]  }
 0x203   : > { %2099 = vmatprep.subr.bf16.mxu0 %v4192_v0 }
 0x209   : > { %1829 = vmatmul.mubr.bf16.gmra.mxu1 %v5371_v3  ;;  %v4190_v3 = vld [vmem:[#allocation11 + $0x60] ss:$8 sps:$4 sm:$0xff]  }
 0x20a   : > { %1836 = vmatprep.mubr.bf16.mxu1 %v5379_v26  ;;  %2100 = vmatpush1.bf16.msra.mxu0 %v4190_v3  ;;  %v4195_v26 = vld [vmem:[#allocation11 + $0x54] ss:$8 sps:$4 sm:$0xff]  }
 0x20b   : > { %2101 = vmatprep.subr.bf16.mxu0 %v4195_v26  ;;  %v4229_v26 = vld [vmem:[#allocation13 + $0x80] ss:$16 sps:$4 sm:$0xff]  }
 0x211   : > { %1837 = vmatmul.mubr.bf16.gmra.mxu1 %v5381_v29  ;;  %v4193_v29 = vld [vmem:[#allocation11 + $0x50] ss:$8 sps:$4 sm:$0xff]  }
 0x212   : > { %1844 = vmatprep.mubr.bf16.mxu1 %v5389_v59  ;;  %2102 = vmatpush1.bf16.msra.mxu0 %v4193_v29  ;;  %v4198_v59 = vld [vmem:[#allocation11 + $0x44] ss:$8 sps:$4 sm:$0xff]  }
 0x213   : > { %2103 = vmatprep.subr.bf16.mxu0 %v4198_v59  ;;  %v4237_v29 = vld [vmem:[#allocation13 + $0x64] ss:$16 sps:$4 sm:$0xff]  }
 0x219   : > { %1845 = vmatmul.mubr.bf16.gmra.mxu1 %v5391_v63  ;;  %v4196_v63 = vld [vmem:[#allocation11 + $0x40] ss:$8 sps:$4 sm:$0xff]  }
 0x21a   : > { %1852 = vmatprep.mubr.bf16.mxu1 %v5399_v20  ;;  %2104 = vmatpush1.bf16.msra.mxu0 %v4196_v63  ;;  %v4201_v20 = vld [vmem:[#allocation11 + $0x34] ss:$8 sps:$4 sm:$0xff]  }
 0x21b   : > { %2105 = vmatprep.subr.bf16.mxu0 %v4201_v20 }
 0x221   : > { %1853 = vmatmul.mubr.bf16.gmra.mxu1 %v5401_v22  ;;  %v4199_v22 = vld [vmem:[#allocation11 + $0x30] ss:$8 sps:$4 sm:$0xff]  }
 0x222   : > { %1860 = vmatprep.mubr.bf16.mxu1 %v5409_v1  ;;  %2106 = vmatpush1.bf16.msra.mxu0 %v4199_v22  ;;  %v4205_v1 = vld [vmem:[#allocation11 + $0x10] ss:$8 sps:$4 sm:$0xff]  }
 0x223   : > { %2107 = vmatprep.subr.bf16.mxu0 %v4204_v60  ;;  %v4235_v22 = vld [vmem:[#allocation13 + $0x60] ss:$16 sps:$4 sm:$0xff]  }
 0x226   : > { %2108 = vmatpush1.bf16.msra.mxu0 %v4202_v61  ;;  %v4243_v61 = vld [vmem:[#allocation13 + $0x44] ss:$16 sps:$4 sm:$0xff]  }
 0x227   : > { %2109 = vmatprep.subr.bf16.mxu0 %v4207_v62 }
 0x229   : > { %1861 = vmatmul.mubr.bf16.gmra.mxu1 %v5411_v6 }
 0x22a   : > { %1868 = vmatprep.mubr.bf16.mxu1 %v1418_v36  ;;  %2110 = vmatpush1.bf16.msra.mxu0 %v4205_v1 }
 0x22b   : > { %2111 = vmatprep.subr.bf16.mxu0 %v4210_v2 }
 0x22e   : > { %2112 = vmatpush1.bf16.msra.mxu0 %v4208_v4  ;;  %v4241_v4 = vld [vmem:[#allocation13 + $0x40] ss:$16 sps:$4 sm:$0xff]  }
 0x22f   : > { %2777 = vmatprep.subr.bf16.mxu0 %v4216_v54 }
 0x231   : > { %1869 = vmatmul.mubr.bf16.gmra.mxu1 %v1417_v41  ;;  %v4213_v41 = vld [vmem:[#allocation13 + $0xe4] ss:$16 sps:$4 sm:$0xff]  }
 0x232   : > { %1876 = vmatprep.mubr.bf16.mxu1 %v1420_v49  ;;  %2664 = vmatprep.subr.bf16.mxu1 %v4213_v41 }
 0x233   : > { %2665 = vmatpush1.bf16.msra.mxu1 %v4211_v40 }
 0x234   : > { %2666 = vmatprep.subr.bf16.mxu1 %v4219_v43  ;;  %v4273_v43 = vld [vmem:[#allocation13 + $0x1a4] ss:$16 sps:$4 sm:$0xff]  }
 0x237   : > { %2667 = vmatpush1.bf16.msra.mxu1 %v4217_v46 }
 0x238   : > { %2668 = vmatprep.subr.bf16.mxu1 %v4225_v48  ;;  %v4271_v48 = vld [vmem:[#allocation13 + $0x1a0] ss:$16 sps:$4 sm:$0xff]  }
 0x239   : > { %1877 = vmatmul.mubr.bf16.gmra.mxu1 %v1419_v56 }
 0x23b   : > { %2669 = vmatpush1.bf16.msra.mxu1 %v4223_v57 }
 0x23c   : > { %2670 = vmatprep.subr.bf16.mxu1 %v4231_v30 }
 0x23f   : > { %2671 = vmatpush1.bf16.msra.mxu1 %v4229_v26  ;;  %v4285_v26 = vld [vmem:[#allocation13 + $0x164] ss:$16 sps:$4 sm:$0xff]  }
 0x240   : > { %2672 = vmatprep.subr.bf16.mxu1 %v4237_v29 }
 0x243   : > { %2673 = vmatpush1.bf16.msra.mxu1 %v4235_v22 }
 0x244   : > { %2674 = vmatprep.subr.bf16.mxu1 %v4243_v61 }
 0x247   : > { %2675 = vmatpush1.bf16.msra.mxu1 %v4241_v4 }
 0x281   : > { %v3806_v6 = vpop.f32.mrf.mxu0 }
 0x283   : > { %v3807_v8 = vpop.f32.mrf.mxu0 }
 0x284   : > { %v3808_v9 = vadd.f32 %v3807_v8, %v3806_v6  ;;  %v4249_v8 = vld [vmem:[#allocation13 + $0x24] ss:$16 sps:$4 sm:$0xff]  }
 0x285   : > { %v3809_v10 = vpop.f32.mrf.mxu0  ;;  %2676 = vmatprep.subr.bf16.mxu1 %v4249_v8 }
 0x286   : > { %v5438_v11 = vadd.f32 %v3808_v9, %v5435_v7 }
 0x287   : > { %v3810_v12 = vpop.f32.mrf.mxu0 }
 0x288   : > { %3274 = vst [vmem:[%s5441_s0] sm:$0xff] %v5438_v11  ;;  %v3811_v13 = vadd.f32 %v3810_v12, %v3809_v10 }
 0x289   : > { %v3812_v15 = vpop.f32.mrf.mxu0 }
 0x28a   : > { %v5446_v14 = vadd.f32 %v3811_v13, %v5435_v7  ;;  %v4247_v13 = vld [vmem:[#allocation13 + $0x20] ss:$16 sps:$4 sm:$0xff]  }
 0x28b   : > { %v3813_v16 = vpop.f32.mrf.mxu0  ;;  %2677 = vmatpush1.bf16.msra.mxu1 %v4247_v13 }
 0x28c   : > { %3275 = vst [vmem:[%s5441_s0 + $0x8] sm:$0xff] %v5446_v14  ;;  %v3814_v17 = vadd.f32 %v3813_v16, %v3812_v15  ;;  %v4255_v16 = vld [vmem:[#allocation13 + $0x4] ss:$16 sps:$4 sm:$0xff]  }
 0x28d   : > { %v3815_v18 = vpop.f32.mrf.mxu0  ;;  %2678 = vmatprep.subr.bf16.mxu1 %v4255_v16 }
 0x28e   : > { %v5451_v19 = vadd.f32 %v3814_v17, %v5435_v7 }
 0x28f   : > { %v3816_v21 = vpop.f32.mrf.mxu0 }
 0x290   : > { %3276 = vst [vmem:[%s5441_s0 + $0x10] sm:$0xff] %v5451_v19  ;;  %v3817_v23 = vadd.f32 %v3816_v21, %v3815_v18 }
 0x291   : > { %v3818_v24 = vpop.f32.mrf.mxu0 }
 0x292   : > { %v5456_v25 = vadd.f32 %v3817_v23, %v5435_v7  ;;  %v4253_v23 = vld [vmem:[#allocation13] ss:$16 sps:$4 sm:$0xff]  }
 0x293   : > { %v3819_v27 = vpop.f32.mrf.mxu0  ;;  %2679 = vmatpush1.bf16.msra.mxu1 %v4253_v23 }
 0x294   : > { %3277 = vst [vmem:[%s5441_s0 + $0x18] sm:$0xff] %v5456_v25  ;;  %v3820_v28 = vadd.f32 %v3819_v27, %v3818_v24  ;;  %v4261_v27 = vld [vmem:[#allocation13 + $0x1e4] ss:$16 sps:$4 sm:$0xff]  }
 0x295   : > { %v3821_v32 = vpop.f32.mrf.mxu0  ;;  %2680 = vmatprep.subr.bf16.mxu1 %v4261_v27 }
 0x296   : > { %v5461_v33 = vadd.f32 %v3820_v28, %v5435_v7 }
 0x297   : > { %v3822_v34 = vpop.f32.mrf.mxu0 }
 0x298   : > { %3278 = vst [vmem:[%s5441_s0 + $0x20] sm:$0xff] %v5461_v33  ;;  %v3823_v35 = vadd.f32 %v3822_v34, %v3821_v32 }
 0x299   : > { %v3824_v36 = vpop.f32.mrf.mxu0 }
 0x29a   : > { %v5466_v37 = vadd.f32 %v3823_v35, %v5435_v7  ;;  %v4259_v35 = vld [vmem:[#allocation13 + $0x1e0] ss:$16 sps:$4 sm:$0xff]  }
 0x29b   : > { %v3825_v38 = vpop.f32.mrf.mxu0  ;;  %2681 = vmatpush2.bf16.msra.mxu1 %v4259_v35 }
 0x29c   : > { %3279 = vst [vmem:[%s5441_s0 + $0x28] sm:$0xff] %v5466_v37  ;;  %v3826_v39 = vadd.f32 %v3825_v38, %v3824_v36  ;;  %v4267_v38 = vld [vmem:[#allocation13 + $0x1c4] ss:$16 sps:$4 sm:$0xff]  }
 0x29d   : > { %v3827_v42 = vpop.f32.mrf.mxu0  ;;  %2682 = vmatprep.subr.bf16.mxu1 %v4267_v38  ;;  %v1933_v38 = vld [vmem:[%s5252_s10] sm:$0xff] }
 0x29e   : > { %v5471_v44 = vadd.f32 %v3826_v39, %v5435_v7 }
 0x29f   : > { %v3828_v45 = vpop.f32.mrf.mxu0 }
 0x2a0   : > { %3280 = vst [vmem:[%s5441_s0 + $0x30] sm:$0xff] %v5471_v44  ;;  %v3829_v47 = vadd.f32 %v3828_v45, %v3827_v42  ;;  %v4265_v42 = vld [vmem:[#allocation13 + $0x1c0] ss:$16 sps:$4 sm:$0xff]  }
 0x2a1   : > { %v3830_v55 = vpop.f32.mrf.mxu1  ;;  %2683 = vmatpush2.bf16.msra.mxu1 %v4265_v42 }
 0x2a2   : > { %v5476_v49 = vadd.f32 %v3829_v47, %v5435_v7  ;;  %v5521_v47 = vld [vmem:[%s5970_s7] ss:$0 sm:$0xff]  ;;  %2684 = vmatprep.subr.bf16.mxu1 %v4273_v43 }
 0x2a3   : > { %v3831_v52 = vpop.f32.mrf.mxu1 }
 0x2a4   : > { %v3832_v56 = vadd.f32 %v3831_v52, %v3830_v55  ;;  %3281 = vst [vmem:[%s5441_s0 + $0x38] sm:$0xff] %v5476_v49 }
 0x2a5   : > { %v3833_v58 = vpop.f32.mrf.mxu1  ;;  %2685 = vmatpush2.bf16.msra.mxu1 %v4271_v48 }
 0x2a6   : > { %v5481_v31 = vadd.f32 %v3832_v56, %v5435_v7  ;;  %v4279_v56 = vld [vmem:[#allocation13 + $0x184] ss:$16 sps:$4 sm:$0xff]  }
 0x2a7   : > { %v3834_v0 = vpop.f32.mrf.mxu1  ;;  %2686 = vmatprep.subr.bf16.mxu1 %v4279_v56 }
 0x2a8   : > { %3282 = vst [vmem:[%s5441_s0 + $0x40] sm:$0xff] %v5481_v31  ;;  %v3835_v3 = vadd.f32 %v3834_v0, %v3833_v58 }
 0x2a9   : > { %v3836_v63 = vpop.f32.mrf.mxu1 }
 0x2aa   : > { %v5486_v59 = vadd.f32 %v3835_v3, %v5435_v7 }
 0x2ab   : > { %v3837_v20 = vpop.f32.mrf.mxu1 }
 0x2ac   : > { %3283 = vst [vmem:[%s5441_s0 + $0x48] sm:$0xff] %v5486_v59  ;;  %v3838_v60 = vadd.f32 %v3837_v20, %v3836_v63 }
 0x2ad   : > { %v3839_v62 = vpop.f32.mrf.mxu1 }
 0x2ae   : > { %v5491_v1 = vadd.f32 %v3838_v60, %v5435_v7  ;;  %v4283_v60 = vld [vmem:[#allocation13 + $0x160] ss:$16 sps:$4 sm:$0xff]  }
 0x2af   : > { %v3840_v2 = vpop.f32.mrf.mxu1 }
 0x2b0   : > { %3284 = vst [vmem:[%s5441_s0 + $0x50] sm:$0xff] %v5491_v1  ;;  %v3841_v6 = vadd.f32 %v3840_v2, %v3839_v62 }
 0x2b1   : > { %v3842_v9 = vpop.f32.mrf.mxu1 }
 0x2b2   : > { %v5496_v10 = vadd.f32 %v3841_v6, %v5435_v7 }
 0x2b3   : > { %v3843_v12 = vpop.f32.mrf.mxu1 }
 0x2b4   : > { %3285 = vst [vmem:[%s5441_s0 + $0x58] sm:$0xff] %v5496_v10  ;;  %v3844_v15 = vadd.f32 %v3843_v12, %v3842_v9 }
 0x2b5   : > { %v3845_v17 = vpop.f32.mrf.mxu1 }
 0x2b6   : > { %v5501_v18 = vadd.f32 %v3844_v15, %v5435_v7 }
 0x2b7   : > { %v3846_v21 = vpop.f32.mrf.mxu1 }
 0x2b8   : > { %3286 = vst [vmem:[%s5441_s0 + $0x60] sm:$0xff] %v5501_v18  ;;  %v3847_v24 = vadd.f32 %v3846_v21, %v3845_v17 }
 0x2b9   : > { %v3848_v28 = vpop.f32.mrf.mxu1 }
 0x2ba   : > { %v5506_v32 = vadd.f32 %v3847_v24, %v5435_v7 }
 0x2bb   : > { %v3849_v34 = vpop.f32.mrf.mxu1 }
 0x2bc   : > { %3287 = vst [vmem:[%s5441_s0 + $0x68] sm:$0xff] %v5506_v32  ;;  %v3850_v36 = vadd.f32 %v3849_v34, %v3848_v28 }
 0x2bd   : > { %v3851_v39 = vpop.f32.mrf.mxu1 }
 0x2be   : > { %v5511_v40 = vadd.f32 %v3850_v36, %v5435_v7 }
 0x2bf   : > { %v3852_v41 = vpop.f32.mrf.mxu1 }
 0x2c0   : > { %3288 = vst [vmem:[%s5441_s0 + $0x70] sm:$0xff] %v5511_v40  ;;  %v3853_v54 = vadd.f32 %v3852_v41, %v3851_v39 }
 0x2c1   : > { %v3870_v45 = vpop.f32.mrf.mxu1 }
 0x2c2   : > { %v5516_v46 = vadd.f32 %v3853_v54, %v5435_v7  ;;  %v4277_v7 = vld [vmem:[#allocation13 + $0x180] ss:$16 sps:$4 sm:$0xff]  }
 0x2c3   : > { %v3871_v55 = vpop.f32.mrf.mxu1  ;;  %2687 = vmatpush2.bf16.msra.mxu1 %v4277_v7 }
 0x2c4   : > { %3289 = vst [vmem:[%s5441_s0 + $0x78] sm:$0xff] %v5516_v46  ;;  %v3872_v52 = vadd.f32 %v3871_v55, %v3870_v45  ;;  %2688 = vmatprep.subr.bf16.mxu1 %v4285_v26  ;;  %v1934_v45 = vld [vmem:[%s5252_s10 + $0x8] sm:$0xff]  ;;  %s4785_s0 = sshll.u32 %s4935_s8, 4  ;;  %s4786_s0 = int_to_ptr.vmem [resolvable:$false] %s4785_s0 }
 0x2c5   : > { %v3873_v57 = vpop.f32.mrf.mxu1  ;;  %s4787_s22 = scalar_lea.vmem %s4786_s0, 4096  ;;  %p4788_p1 = scmp.lt.s32.totalorder %s5696_s20, %s4786_s0 }
 0x2c6   : > { %v1823_v58 = vadd.f32 %v3872_v52, %v5521_v47  ;;  %p4789_p4 = scmp.lt.s32.totalorder %s4787_s22, %s4781_s14 }
 0x2c7   : > { %v3874_v30 = vpop.f32.mrf.mxu1  ;;  %2689 = vmatpush2.bf16.msra.mxu1 %v4283_v60 }
 0x2c8   : > { %v1885_v0 = vmul.f32 0.5, %v1823_v58  ;;  %3290 = vst [vmem:[%s5527_s25] sm:$0xff] %v1823_v58  ;;  %v3875_v3 = vadd.f32 %v3874_v30, %v3873_v57  ;;  %p4790_p6 = por %p4789_p4, %p4788_p1 }
 0x2c9   : > { %v3876_v29 = vpop.f32.mrf.mxu1 }
 0x2ca   : > { %v1901_v63 = vmul.f32 1.442695, %v1885_v0  ;;  %v1826_v20 = vadd.f32 %v3875_v3, %v5521_v47  ;;  %p4791_p8 = pnand %p4790_p6, %p4784_p11 }
 0x2cb   : > { %v3877_v22 = vpop.f32.mrf.mxu1 }
 0x2cc   : > { %4307 = vpow2.f32 %v1901_v63  ;;  %v1886_v61 = vmul.f32 0.5, %v1826_v20  ;;  %3291 = vst [vmem:[%s5527_s25 + $0x8] sm:$0xff] %v1826_v20  ;;  %v3878_v62 = vadd.f32 %v3877_v22, %v3876_v29  ;;  %v1935_v20 = vld [vmem:[%s5252_s10 + $0x10] sm:$0xff] }
 0x2cd   : > { %v3879_v2 = vpop.f32.mrf.mxu1 }
 0x2ce   : > { %v1903_v4 = vmul.f32 1.442695, %v1886_v61  ;;  %v1831_v6 = vadd.f32 %v3878_v62, %v5521_v47  ;;  %v4214_v61 = vld [vmem:[#allocation13 + $0xe8] ss:$16 sps:$4 sm:$0xff]  }
 0x2cf   : > { %v3880_v8 = vpop.f32.mrf.mxu1 }
 0x2d0   : > { %4309 = vpow2.f32 %v1903_v4  ;;  %v1887_v9 = vmul.f32 0.5, %v1831_v6  ;;  %3292 = vst [vmem:[%s5527_s25 + $0x10] sm:$0xff] %v1831_v6  ;;  %v3881_v12 = vadd.f32 %v3880_v8, %v3879_v2  ;;  %v4222_v6 = vld [vmem:[#allocation13 + $0xcc] ss:$16 sps:$4 sm:$0xff]  }
 0x2d1   : > { %v3882_v13 = vpop.f32.mrf.mxu1 }
 0x2d2   : > { %v1905_v15 = vmul.f32 1.442695, %v1887_v9  ;;  %v1834_v16 = vadd.f32 %v3881_v12, %v5521_v47  ;;  %v1936_v9 = vld [vmem:[%s5252_s10 + $0x18] sm:$0xff] }
 0x2d3   : > { %v3883_v17 = vpop.f32.mrf.mxu1 }
 0x2d4   : > { %4311 = vpow2.f32 %v1905_v15  ;;  %v1888_v21 = vmul.f32 0.5, %v1834_v16  ;;  %3293 = vst [vmem:[%s5527_s25 + $0x18] sm:$0xff] %v1834_v16  ;;  %v3884_v23 = vadd.f32 %v3883_v17, %v3882_v13  ;;  %v4220_v16 = vld [vmem:[#allocation13 + $0xc8] ss:$16 sps:$4 sm:$0xff]  }
 0x2d5   : > { %v3885_v24 = vpop.f32.mrf.mxu1 }
 0x2d6   : > { %v1907_v27 = vmul.f32 1.442695, %v1888_v21  ;;  %v1839_v28 = vadd.f32 %v3884_v23, %v5521_v47 }
 0x2d7   : > { %v3886_v34 = vpop.f32.mrf.mxu1 }
 0x2d8   : > { %4313 = vpow2.f32 %v1907_v27  ;;  %v1889_v35 = vmul.f32 0.5, %v1839_v28  ;;  %3294 = vst [vmem:[%s5527_s25 + $0x20] sm:$0xff] %v1839_v28  ;;  %v3887_v36 = vadd.f32 %v3886_v34, %v3885_v24  ;;  %v4228_v24 = vld [vmem:[#allocation13 + $0xac] ss:$16 sps:$4 sm:$0xff]  }
 0x2d9   : > { %v4308_v39 = vpop.eup %4307  ;;  %v3888_v41 = vpop.f32.mrf.mxu1 }
 0x2da   : > { %v1909_v42 = vmul.f32 1.442695, %v1889_v35  ;;  %v1842_v54 = vadd.f32 %v3887_v36, %v5521_v47  ;;  %v1949_v55 = vmul.f32 %v4308_v39, %v1933_v38  ;;  %v1937_v38 = vld [vmem:[%s5252_s10 + $0x20] sm:$0xff] }
 0x2db   : > { %v3889_v43 = vpop.f32.mrf.mxu1 }
 0x2dc   : > { %4315 = vpow2.f32 %v1909_v42  ;;  %v1890_v48 = vmul.f32 0.5, %v1842_v54  ;;  %3295 = vst [vmem:[%s5527_s25 + $0x28] sm:$0xff] %v1842_v54  ;;  %v3890_v52 = vadd.f32 %v3889_v43, %v3888_v41  ;;  %v1965_v3 = vadd.f32 %v1949_v55, %v5438_v11  ;;  %v4226_v42 = vld [vmem:[#allocation13 + $0xa8] ss:$16 sps:$4 sm:$0xff]   ;;  %v4234_v55 = vld [vmem:[#allocation13 + $0x8c] ss:$16 sps:$4 sm:$0xff]  }
 0x2dd   : > { %v4310_v56 = vpop.eup %4309  ;;  %v3891_v57 = vpop.f32.mrf.mxu1 }
 0x2de   : > { %v1911_v58 = vmul.f32 1.442695, %v1890_v48  ;;  %v1847_v30 = vadd.f32 %v3890_v52, %v5521_v47  ;;  %v1950_v7 = vmul.f32 %v4310_v56, %v1934_v45  ;;  %v1938_v48 = vld [vmem:[%s5252_s10 + $0x28] sm:$0xff] }
 0x2df   : > { %v3892_v0 = vpop.f32.mrf.mxu1 }
 0x2e0   : > { %4317 = vpow2.f32 %v1911_v58  ;;  %v1891_v26 = vmul.f32 0.5, %v1847_v30  ;;  %3296 = vst [vmem:[%s5527_s25 + $0x30] sm:$0xff] %v1847_v30  ;;  %v3893_v29 = vadd.f32 %v3892_v0, %v3891_v57  ;;  %v1966_v63 = vadd.f32 %v1950_v7, %v5446_v14  ;;  %v4232_v30 = vld [vmem:[#allocation13 + $0x88] ss:$16 sps:$4 sm:$0xff]  }
 0x2e1   : > { %v4312_v22 = vpop.eup %4311  ;;  %v3894_v60 = vpop.f32.mrf.mxu1 }
 0x2e2   : > { %v1913_v62 = vmul.f32 1.442695, %v1891_v26  ;;  %v1850_v2 = vadd.f32 %v3893_v29, %v5521_v47  ;;  %v1981_v4 = vpack.c.bf16 %v1966_v63, %v1965_v3  ;;  %v1951_v12 = vmul.f32 %v4312_v22, %v1935_v20  ;;  %v4240_v26 = vld [vmem:[#allocation13 + $0x6c] ss:$16 sps:$4 sm:$0xff]  }
 0x2e3   : > { %v3895_v8 = vpop.f32.mrf.mxu1 }
 0x2e4   : > { %4319 = vpow2.f32 %v1913_v62  ;;  %v1892_v11 = vmul.f32 0.5, %v1850_v2  ;;  %3297 = vst [vmem:[%s5527_s25 + $0x38] sm:$0xff] %v1850_v2  ;;  %v3896_v13 = vadd.f32 %v3895_v8, %v3894_v60  ;;  %2130 = vmatmul.mubr.bf16.vlgmr.msra.gmra.mxu0 %v1981_v4  ;;  %v1967_v28 = vadd.f32 %v1951_v12, %v5451_v19  ;;  %v4238_v4 = vld [vmem:[#allocation13 + $0x68] ss:$16 sps:$4 sm:$0xff]   ;;  %v4246_v12 = vld [vmem:[#allocation13 + $0x4c] ss:$16 sps:$4 sm:$0xff]  }
 0x2e5   : > { %v4314_v15 = vpop.eup %4313  ;;  %v3897_v14 = vpop.f32.mrf.mxu1  ;;  %2139 = vmatprep.mubr.bf16.mxu0 %v4934_v5  ;;  %2778 = vmatpush1.bf16.msra.mxu0 %v4214_v61  ;;  %v1939_v61 = vld [vmem:[%s5252_s10 + $0x30] sm:$0xff] }
 0x2e6   : > { %v1915_v17 = vmul.f32 1.442695, %v1892_v11  ;;  %v1855_v21 = vadd.f32 %v3896_v13, %v5521_v47  ;;  %v1952_v23 = vmul.f32 %v4314_v15, %v1936_v9  ;;  %2779 = vmatprep.subr.bf16.mxu0 %v4222_v6  ;;  %v1940_v11 = vld [vmem:[%s5252_s10 + $0x38] sm:$0xff] }
 0x2e7   : > { %v3898_v27 = vpop.f32.mrf.mxu1 }
 0x2e8   : > { %4321 = vpow2.f32 %v1915_v17  ;;  %v1893_v34 = vmul.f32 0.5, %v1855_v21  ;;  %3298 = vst [vmem:[%s5527_s25 + $0x40] sm:$0xff] %v1855_v21  ;;  %v3899_v35 = vadd.f32 %v3898_v27, %v3897_v14  ;;  %v1968_v36 = vadd.f32 %v1952_v23, %v5456_v25  ;;  %v4244_v17 = vld [vmem:[#allocation13 + $0x48] ss:$16 sps:$4 sm:$0xff]   ;;  %v4252_v27 = vld [vmem:[#allocation13 + $0x2c] ss:$16 sps:$4 sm:$0xff]  }
 0x2e9   : > { %v4316_v39 = vpop.eup %4315  ;;  %v3900_v41 = vpop.f32.mrf.mxu1  ;;  %2780 = vmatpush1.bf16.msra.mxu0 %v4220_v16 }
 0x2ea   : > { %v1917_v54 = vmul.f32 1.442695, %v1893_v34  ;;  %v1858_v43 = vadd.f32 %v3899_v35, %v5521_v47  ;;  %v1982_v45 = vpack.c.bf16 %v1968_v36, %v1967_v28  ;;  %2781 = vmatprep.subr.bf16.mxu0 %v4228_v24  ;;  %v1953_v52 = vmul.f32 %v4316_v39, %v1937_v38  ;;  %v1941_v39 = vld [vmem:[%s5252_s10 + $0x40] sm:$0xff] }
 0x2eb   : > { %v3901_v19 = vpop.f32.mrf.mxu1 }
 0x2ec   : > { %4323 = vpow2.f32 %v1917_v54  ;;  %v1894_v56 = vmul.f32 0.5, %v1858_v43  ;;  %3299 = vst [vmem:[%s5527_s25 + $0x48] sm:$0xff] %v1858_v43  ;;  %v3902_v57 = vadd.f32 %v3901_v19, %v3900_v41  ;;  %2140 = vmatmul.mubr.bf16.gmra.mxu0 %v1982_v45  ;;  %v1969_v63 = vadd.f32 %v1953_v52, %v5461_v33  ;;  %v4250_v54 = vld [vmem:[#allocation13 + $0x28] ss:$16 sps:$4 sm:$0xff]   ;;  %v4258_v19 = vld [vmem:[#allocation13 + $0xc] ss:$16 sps:$4 sm:$0xff]  }
 0x2ed   : > { %v4318_v25 = vpop.eup %4317  ;;  %v3903_v58 = vpop.f32.mrf.mxu1  ;;  %2149 = vmatprep.mubr.bf16.mxu0 %v4934_v5  ;;  %2782 = vmatpush1.bf16.msra.mxu0 %v4226_v42 }
 0x2ee   : > { %v1919_v7 = vmul.f32 1.442695, %v1894_v56  ;;  %v1863_v0 = vadd.f32 %v3902_v57, %v5521_v47  ;;  %v1954_v3 = vmul.f32 %v4318_v25, %v1938_v48  ;;  %2783 = vmatprep.subr.bf16.mxu0 %v4234_v55  ;;  %v1942_v48 = vld [vmem:[%s5252_s10 + $0x48] sm:$0xff] }
 0x2ef   : > { %v3904_v29 = vpop.f32.mrf.mxu1 }
 0x2f0   : > { %4325 = vpow2.f32 %v1919_v7  ;;  %v1895_v20 = vmul.f32 0.5, %v1863_v0  ;;  %3300 = vst [vmem:[%s5527_s25 + $0x50] sm:$0xff] %v1863_v0  ;;  %v3905_v22 = vadd.f32 %v3904_v29, %v3903_v58  ;;  %v1970_v60 = vadd.f32 %v1954_v3, %v5466_v37  ;;  %v4256_v58 = vld [vmem:[#allocation13 + $0x8] ss:$16 sps:$4 sm:$0xff]   ;;  %v4264_v3 = vld [vmem:[#allocation13 + $0x1ec] ss:$16 sps:$4 sm:$0xff]  }
 0x2f1   : > { %v4320_v62 = vpop.eup %4319  ;;  %v3906_v2 = vpop.f32.mrf.mxu1  ;;  %2784 = vmatpush1.bf16.msra.mxu0 %v4232_v30 }
 0x2f2   : > { %v1921_v6 = vmul.f32 1.442695, %v1895_v20  ;;  %v1866_v8 = vadd.f32 %v3905_v22, %v5521_v47  ;;  %v1983_v9 = vpack.c.bf16 %v1970_v60, %v1969_v63  ;;  %2785 = vmatprep.subr.bf16.mxu0 %v4240_v26  ;;  %v1955_v13 = vmul.f32 %v4320_v62, %v1939_v61  ;;  %v1943_v61 = vld [vmem:[%s5252_s10 + $0x50] sm:$0xff]  ;;  %v4262_v62 = vld [vmem:[#allocation13 + $0x1e8] ss:$16 sps:$4 sm:$0xff]  }
 0x2f3   : > { %v3907_v33 = vpop.f32.mrf.mxu1 }
 0x2f4   : > { %4327 = vpow2.f32 %v1921_v6  ;;  %v1896_v15 = vmul.f32 0.5, %v1866_v8  ;;  %3301 = vst [vmem:[%s5527_s25 + $0x58] sm:$0xff] %v1866_v8  ;;  %v3908_v14 = vadd.f32 %v3907_v33, %v3906_v2  ;;  %2150 = vmatmul.mubr.bf16.gmra.mxu0 %v1983_v9  ;;  %v1971_v34 = vadd.f32 %v1955_v13, %v5471_v44  ;;  %v4270_v8 = vld [vmem:[#allocation13 + $0x1cc] ss:$16 sps:$4 sm:$0xff]  }
 0x2f5   : > { %v4322_v37 = vpop.eup %4321  ;;  %v3909_v16 = vpop.f32.mrf.mxu1  ;;  %2159 = vmatprep.mubr.bf16.mxu0 %v4934_v5  ;;  %2786 = vmatpush1.bf16.msra.mxu0 %v4238_v4  ;;  %v1944_v9 = vld [vmem:[%s5252_s10 + $0x58] sm:$0xff] }
 0x2f6   : > { %v1923_v21 = vmul.f32 1.442695, %v1896_v15  ;;  %v1871_v23 = vadd.f32 %v3908_v14, %v5521_v47  ;;  %v1956_v24 = vmul.f32 %v4322_v37, %v1940_v11  ;;  %2787 = vmatprep.subr.bf16.mxu0 %v4246_v12 }
 0x2f7   : > { %v3910_v28 = vpop.f32.mrf.mxu1 }
 0x2f8   : > { %4329 = vpow2.f32 %v1923_v21  ;;  %v1897_v35 = vmul.f32 0.5, %v1871_v23  ;;  %3302 = vst [vmem:[%s5527_s25 + $0x60] sm:$0xff] %v1871_v23  ;;  %v3911_v36 = vadd.f32 %v3910_v28, %v3909_v16  ;;  %v1972_v38 = vadd.f32 %v1956_v24, %v5476_v49  ;;  %v1945_v16 = vld [vmem:[%s5252_s10 + $0x60] sm:$0xff]  ;;  %v4282_v23 = vld [vmem:[#allocation13 + $0x18c] ss:$16 sps:$4 sm:$0xff]  }
 0x2f9   : > { %v4324_v41 = vpop.eup %4323  ;;  %v3912_v42 = vpop.f32.mrf.mxu1  ;;  %2788 = vmatpush1.bf16.msra.mxu0 %v4244_v17  ;;  %v4274_v17 = vld [vmem:[#allocation13 + $0x1a8] ss:$16 sps:$4 sm:$0xff]  }
 0x2fa   : > { %v1925_v43 = vmul.f32 1.442695, %v1897_v35  ;;  %v1874_v45 = vadd.f32 %v3911_v36, %v5521_v47  ;;  %v1984_v55 = vpack.c.bf16 %v1972_v38, %v1971_v34  ;;  %2789 = vmatprep.subr.bf16.mxu0 %v4252_v27  ;;  %v1957_v52 = vmul.f32 %v4324_v41, %v1941_v39  ;;  %v1946_v24 = vld [vmem:[%s5252_s10 + $0x68] sm:$0xff]  ;;  %v1947_v39 = vld [vmem:[%s5252_s10 + $0x70] sm:$0xff] }
 0x2fb   : > { %v3913_v44 = vpop.f32.mrf.mxu1  ;;  %v4280_v34 = vld [vmem:[#allocation13 + $0x188] ss:$16 sps:$4 sm:$0xff]  }
 0x2fc   : > { %4331 = vpow2.f32 %v1925_v43  ;;  %v1898_v56 = vmul.f32 0.5, %v1874_v45  ;;  %3303 = vst [vmem:[%s5527_s25 + $0x68] sm:$0xff] %v1874_v45  ;;  %v3914_v57 = vadd.f32 %v3913_v44, %v3912_v42  ;;  %2160 = vmatmul.mubr.bf16.gmra.mxu0 %v1984_v55  ;;  %v1973_v29 = vadd.f32 %v1957_v52, %v5481_v31  ;;  %v4286_v41 = vld [vmem:[#allocation13 + $0x168] ss:$16 sps:$4 sm:$0xff]   ;;  %v4289_v52 = vld [vmem:[#allocation13 + $0x140] ss:$16 sps:$4 sm:$0xff]  }
 0x2fd   : > { %v4326_v49 = vpop.eup %4325  ;;  %v3915_v25 = vpop.f32.mrf.mxu1  ;;  %2169 = vmatprep.mubr.bf16.mxu0 %v4934_v5  ;;  %2790 = vmatpush1.bf16.msra.mxu0 %v4250_v54  ;;  %v1948_v54 = vld [vmem:[%s5252_s10 + $0x78] sm:$0xff] }
 0x2fe   : > { %v1927_v30 = vmul.f32 1.442695, %v1898_v56  ;;  %v1879_v7 = vadd.f32 %v3914_v57, %v5521_v47  ;;  %v1958_v0 = vmul.f32 %v4326_v49, %v1942_v48  ;;  %2791 = vmatprep.subr.bf16.mxu0 %v4258_v19  ;;  %v4294_v48 = vld [vmem:[#allocation13 + $0x14c] ss:$16 sps:$4 sm:$0xff]   ;;  %v4292_v56 = vld [vmem:[#allocation13 + $0x148] ss:$16 sps:$4 sm:$0xff]  }
 0x2ff   : > { %v3916_v26 = vpop.f32.mrf.mxu1  ;;  %v4297_v57 = vld [vmem:[#allocation13 + $0x124] ss:$16 sps:$4 sm:$0xff]   ;;  %v4300_v49 = vld [vmem:[#allocation13 + $0x12c] ss:$16 sps:$4 sm:$0xff]  }
 0x300   : > { %4333 = vpow2.f32 %v1927_v30  ;;  %v1899_v63 = vmul.f32 0.5, %v1879_v7  ;;  %3304 = vst [vmem:[%s5527_s25 + $0x70] sm:$0xff] %v1879_v7  ;;  %v3917_v20 = vadd.f32 %v3916_v26, %v3915_v25  ;;  %v1974_v22 = vadd.f32 %v1958_v0, %v5486_v59  ;;  %v4268_v59 = vld [vmem:[#allocation13 + $0x1c8] ss:$16 sps:$4 sm:$0xff]   ;;  %v4295_v25 = vld [vmem:[#allocation13 + $0x120] ss:$16 sps:$4 sm:$0xff]  }
 0x301   : > { %v4328_v60 = vpop.eup %4327  ;;  %2792 = vmatpush1.bf16.msra.mxu0 %v4256_v58  ;;  %v4301_v58 = vld [vmem:[#allocation13 + $0x100] ss:$16 sps:$4 sm:$0xff]   ;;  %v4304_v30 = vld [vmem:[#allocation13 + $0x108] ss:$16 sps:$4 sm:$0xff]  }
 0x302   : > { %v1929_v2 = vmul.f32 1.442695, %v1899_v63  ;;  %v1882_v4 = vadd.f32 %v3917_v20, %v5521_v47  ;;  %v1985_v6 = vpack.c.bf16 %v1974_v22, %v1973_v29  ;;  %2793 = vmatprep.subr.bf16.mxu0 %v4264_v3  ;;  %v1959_v12 = vmul.f32 %v4328_v60, %v1943_v61  ;;  %v4276_v47 = vld [vmem:[#allocation13 + $0x1ac] ss:$16 sps:$4 sm:$0xff]   ;;  %v2005_v7 = vld [vmem:[%s5972_s9] sm:$0x3] }
 0x303   : > { %v5603_v3 = vrot.slane %v2005_v7, %v5343_v53  ;;  %v5606_v26 = vrot.slane %v2005_v7, %v5337_v51 }
 0x304   : > { %4335 = vpow2.f32 %v1929_v2  ;;  %v1900_v31 = vmul.f32 0.5, %v1882_v4  ;;  %3305 = vst [vmem:[%s5527_s25 + $0x78] sm:$0xff] %v1882_v4  ;;  %2170 = vmatmul.mubr.bf16.gmra.mxu0 %v1985_v6  ;;  %v1975_v15 = vadd.f32 %v1959_v12, %v5491_v1 }
 0x305   : > { %v4330_v33 = vpop.eup %4329  ;;  %2179 = vmatprep.mubr.bf16.mxu0 %v4934_v5  ;;  %2794 = vmatpush2.bf16.msra.mxu0 %v4262_v62 }
 0x306   : > { %v1931_v11 = vmul.f32 1.442695, %v1900_v31  ;;  %v1960_v13 = vmul.f32 %v4330_v33, %v1944_v9  ;;  %2795 = vmatprep.subr.bf16.mxu0 %v4270_v8 }
 0x308   : > { %4337 = vpow2.f32 %v1931_v11  ;;  %v1976_v14 = vadd.f32 %v1960_v13, %v5496_v10  ;;  %v4288_v10 = vld [vmem:[#allocation13 + $0x16c] ss:$16 sps:$4 sm:$0xff]  }
 0x309   : > { %v4332_v37 = vpop.eup %4331  ;;  %2796 = vmatpush2.bf16.msra.mxu0 %v4268_v59 }
 0x30a   : > { %v1986_v21 = vpack.c.bf16 %v1976_v14, %v1975_v15  ;;  %2797 = vmatprep.subr.bf16.mxu0 %v4276_v47  ;;  %v1961_v27 = vmul.f32 %v4332_v37, %v1945_v16 }
 0x30c   : > { %2180 = vmatmul.mubr.bf16.gmra.mxu0 %v1986_v21  ;;  %v1977_v35 = vadd.f32 %v1961_v27, %v5501_v18 }
 0x30d   : > { %v4334_v28 = vpop.eup %4333  ;;  %2189 = vmatprep.mubr.bf16.mxu0 %v4934_v5  ;;  %2798 = vmatpush2.bf16.msra.mxu0 %v4274_v17 }
 0x30e   : > { %v1962_v1 = vmul.f32 %v4334_v28, %v1946_v24  ;;  %2799 = vmatprep.subr.bf16.mxu0 %v4282_v23 }
 0x310   : > { %v1978_v36 = vadd.f32 %v1962_v1, %v5506_v32  ;;  %v4291_v32 = vld [vmem:[#allocation13 + $0x144] ss:$16 sps:$4 sm:$0xff]  }
 0x311   : > { %v4336_v38 = vpop.eup %4335  ;;  %2800 = vmatpush2.bf16.msra.mxu0 %v4280_v34  ;;  %2690 = vmatprep.subr.bf16.mxu1 %v4291_v32 }
 0x312   : > { %v1987_v42 = vpack.c.bf16 %v1978_v36, %v1977_v35  ;;  %2801 = vmatprep.subr.bf16.mxu0 %v4288_v10  ;;  %v1963_v43 = vmul.f32 %v4336_v38, %v1947_v39  ;;  %2691 = vmatpush2.bf16.msra.mxu1 %v4289_v52 }
 0x313   : > { %2692 = vmatprep.subr.bf16.mxu1 %v4297_v57 }
 0x314   : > { %2190 = vmatmul.mubr.bf16.gmra.mxu0 %v1987_v42  ;;  %v1979_v19 = vadd.f32 %v1963_v43, %v5511_v40  ;;  %v4303_v40 = vld [vmem:[#allocation13 + $0x104] ss:$16 sps:$4 sm:$0xff]  }
 0x315   : > { %v4338_v45 = vpop.eup %4337  ;;  %2199 = vmatprep.mubr.bf16.mxu0 %v4934_v5  ;;  %2802 = vmatpush2.bf16.msra.mxu0 %v4286_v41  ;;  %v4298_v5 = vld [vmem:[#allocation13 + $0x128] ss:$16 sps:$4 sm:$0xff]  }
 0x316   : > { %v1964_v55 = vmul.f32 %v4338_v45, %v1948_v54  ;;  %2803 = vmatprep.subr.bf16.mxu0 %v4294_v48  ;;  %2693 = vmatpush2.bf16.msra.mxu1 %v4295_v25 }
 0x317   : > { %2694 = vmatprep.subr.bf16.mxu1 %v4303_v40 }
 0x318   : > { %v1980_v18 = vadd.f32 %v1964_v55, %v5516_v46  ;;  %v4306_v46 = vld [vmem:[#allocation13 + $0x10c] ss:$16 sps:$4 sm:$0xff]  }
 0x319   : > { %2804 = vmatpush2.bf16.msra.mxu0 %v4292_v56 }
 0x31a   : > { %v1988_v44 = vpack.c.bf16 %v1980_v18, %v1979_v19  ;;  %2805 = vmatprep.subr.bf16.mxu0 %v4300_v49  ;;  %2695 = vmatpush2.bf16.msra.mxu1 %v4301_v58 }
 0x31c   : > { %2200 = vmatmul.mubr.bf16.gmra.mxu0 %v1988_v44 }
 0x31d   : > { %2806 = vmatpush2.bf16.msra.mxu0 %v4298_v5 }
 0x31e   : > { %2807 = vmatprep.subr.bf16.mxu0 %v4306_v46 }
 0x321   : > { %2808 = vmatpush2.bf16.msra.mxu0 %v4304_v30 }
 0x3a4   : > { %v2131_v0 = vpop.f32.mrf.mxu0 }
 0x3a5   : > { %v2132_v60 = vadd.f32 %v2131_v0, %v5606_v26 }
 0x3a6   : > { %v2133_v29 = vpop.f32.mrf.mxu0 }
 0x3a7   : > { %v2134_v20 = vadd.f32 %v2133_v29, %v5603_v3  ;;  %v2210_v9 = vmax.f32 %v2132_v60, 0.0 }
 0x3a8   : > { %v2135_v63 = vpop.f32.mrf.mxu0 }
 0x3a9   : > { %v2136_v22 = vadd.f32 %v2135_v63, %v5606_v26  ;;  %v2211_v6 = vmax.f32 %v2134_v20, 0.0 }
 0x3aa   : > { %v2137_v61 = vpop.f32.mrf.mxu0 }
 0x3ab   : > { %v2138_v62 = vadd.f32 %v2137_v61, %v5603_v3  ;;  %v2212_v2 = vmax.f32 %v2136_v22, 0.0 }
 0x3ac   : > { %v2141_v4 = vpop.f32.mrf.mxu0 }
 0x3ad   : > { %v2213_v8 = vmax.f32 %v2138_v62, 0.0  ;;  %v2242_v33 = vpack.c.bf16 %v2212_v2, %v2210_v9  ;;  %v2142_v47 = vadd.f32 %v2141_v4, %v5606_v26 }
 0x3ae   : > { %v2143_v31 = vpop.f32.mrf.mxu0 }
 0x3af   : > { %v2243_v12 = vpack.c.bf16 %v2213_v8, %v2211_v6  ;;  %v2144_v11 = vadd.f32 %v2143_v31, %v5603_v3  ;;  %v2214_v23 = vmax.f32 %v2142_v47, 0.0 }
 0x3b0   : > { %v2145_v59 = vpop.f32.mrf.mxu0 }
 0x3b1   : > { %v2146_v13 = vadd.f32 %v2145_v59, %v5606_v26  ;;  %2696 = vmatprep.mubr.bf16.mxu1 %v2243_v12  ;;  %2809 = vmatprep.mubr.bf16.mxu0 %v2243_v12  ;;  %v2215_v17 = vmax.f32 %v2144_v11, 0.0 }
 0x3b2   : > { %v2147_v15 = vpop.f32.mrf.mxu0  ;;  %2697 = vmatmul.mubr.bf16.vlgmr.msra.gmra.mxu1 %v2242_v33  ;;  %2810 = vmatmul.mubr.bf16.vlgmr.msra.gmra.mxu0 %v2242_v33 }
 0x3b3   : > { %v2148_v14 = vadd.f32 %v2147_v15, %v5603_v3  ;;  %v2216_v37 = vmax.f32 %v2146_v13, 0.0 }
 0x3b4   : > { %v2151_v16 = vpop.f32.mrf.mxu0 }
 0x3b5   : > { %v2217_v21 = vmax.f32 %v2148_v14, 0.0  ;;  %v2244_v28 = vpack.c.bf16 %v2216_v37, %v2214_v23  ;;  %v2152_v35 = vadd.f32 %v2151_v16, %v5606_v26 }
 0x3b6   : > { %v2153_v24 = vpop.f32.mrf.mxu0 }
 0x3b7   : > { %v2245_v27 = vpack.c.bf16 %v2217_v21, %v2215_v17  ;;  %v2154_v1 = vadd.f32 %v2153_v24, %v5603_v3  ;;  %v2218_v43 = vmax.f32 %v2152_v35, 0.0 }
 0x3b8   : > { %v2155_v34 = vpop.f32.mrf.mxu0 }
 0x3b9   : > { %v2156_v10 = vadd.f32 %v2155_v34, %v5606_v26  ;;  %2706 = vmatprep.mubr.bf16.mxu1 %v2245_v27  ;;  %2819 = vmatprep.mubr.bf16.mxu0 %v2245_v27  ;;  %v2219_v42 = vmax.f32 %v2154_v1, 0.0 }
 0x3ba   : > { %v2157_v36 = vpop.f32.mrf.mxu0  ;;  %2707 = vmatmul.mubr.bf16.gmra.mxu1 %v2244_v28  ;;  %2820 = vmatmul.mubr.bf16.gmra.mxu0 %v2244_v28 }
 0x3bb   : > { %v2158_v38 = vadd.f32 %v2157_v36, %v5603_v3  ;;  %v2220_v39 = vmax.f32 %v2156_v10, 0.0 }
 0x3bc   : > { %v2161_v41 = vpop.f32.mrf.mxu0 }
 0x3bd   : > { %v2221_v54 = vmax.f32 %v2158_v38, 0.0  ;;  %v2246_v19 = vpack.c.bf16 %v2220_v39, %v2218_v43  ;;  %v2162_v48 = vadd.f32 %v2161_v41, %v5606_v26 }
 0x3be   : > { %v2163_v45 = vpop.f32.mrf.mxu0 }
 0x3bf   : > { %v2247_v55 = vpack.c.bf16 %v2221_v54, %v2219_v42  ;;  %v2164_v44 = vadd.f32 %v2163_v45, %v5603_v3  ;;  %v2222_v40 = vmax.f32 %v2162_v48, 0.0 }
 0x3c0   : > { %v2165_v18 = vpop.f32.mrf.mxu0 }
 0x3c1   : > { %v2166_v32 = vadd.f32 %v2165_v18, %v5606_v26  ;;  %2716 = vmatprep.mubr.bf16.mxu1 %v2247_v55  ;;  %2829 = vmatprep.mubr.bf16.mxu0 %v2247_v55  ;;  %v2223_v25 = vmax.f32 %v2164_v44, 0.0 }
 0x3c2   : > { %v2167_v52 = vpop.f32.mrf.mxu0  ;;  %2717 = vmatmul.mubr.bf16.gmra.mxu1 %v2246_v19  ;;  %2830 = vmatmul.mubr.bf16.gmra.mxu0 %v2246_v19 }
 0x3c3   : > { %v2168_v56 = vadd.f32 %v2167_v52, %v5603_v3  ;;  %v2224_v57 = vmax.f32 %v2166_v32, 0.0 }
 0x3c4   : > { %v2171_v49 = vpop.f32.mrf.mxu0 }
 0x3c5   : > { %v2225_v5 = vmax.f32 %v2168_v56, 0.0  ;;  %v2248_v30 = vpack.c.bf16 %v2224_v57, %v2222_v40  ;;  %v2172_v63 = vadd.f32 %v2171_v49, %v5606_v26  ;;  %v2338_v40 = vsub.s32 3, %v5334_v50 }
 0x3c6   : > { %v2173_v46 = vpop.f32.mrf.mxu0 }
 0x3c7   : > { %v2249_v58 = vpack.c.bf16 %v2225_v5, %v2223_v25  ;;  %v2174_v0 = vadd.f32 %v2173_v46, %v5603_v3  ;;  %v2226_v4 = vmax.f32 %v2172_v63, 0.0  ;;  %v2334_v5 = vsub.s32 2, %v5334_v50 }
 0x3c8   : > { %v2175_v7 = vpop.f32.mrf.mxu0 }
 0x3c9   : > { %v2176_v29 = vadd.f32 %v2175_v7, %v5606_v26  ;;  %2726 = vmatprep.mubr.bf16.mxu1 %v2249_v58  ;;  %2839 = vmatprep.mubr.bf16.mxu0 %v2249_v58  ;;  %v2227_v62 = vmax.f32 %v2174_v0, 0.0 }
 0x3ca   : > { %v2177_v20 = vpop.f32.mrf.mxu0  ;;  %2727 = vmatmul.mubr.bf16.gmra.mxu1 %v2248_v30  ;;  %2840 = vmatmul.mubr.bf16.gmra.mxu0 %v2248_v30 }
 0x3cb   : > { %v2178_v22 = vadd.f32 %v2177_v20, %v5603_v3  ;;  %v2228_v60 = vmax.f32 %v2176_v29, 0.0 }
 0x3cc   : > { %v2181_v61 = vpop.f32.mrf.mxu0 }
 0x3cd   : > { %v2229_v2 = vmax.f32 %v2178_v22, 0.0  ;;  %v2250_v9 = vpack.c.bf16 %v2228_v60, %v2226_v4  ;;  %v2182_v59 = vadd.f32 %v2181_v61, %v5606_v26 }
 0x3ce   : > { %v2183_v6 = vpop.f32.mrf.mxu0 }
 0x3cf   : > { %v2251_v8 = vpack.c.bf16 %v2229_v2, %v2227_v62  ;;  %v2184_v12 = vadd.f32 %v2183_v6, %v5603_v3  ;;  %v2230_v16 = vmax.f32 %v2182_v59, 0.0 }
 0x3d0   : > { %v2185_v31 = vpop.f32.mrf.mxu0 }
 0x3d1   : > { %v2186_v33 = vadd.f32 %v2185_v31, %v5606_v26  ;;  %2736 = vmatprep.mubr.bf16.mxu1 %v2251_v8  ;;  %2849 = vmatprep.mubr.bf16.mxu0 %v2251_v8  ;;  %v2231_v14 = vmax.f32 %v2184_v12, 0.0 }
 0x3d2   : > { %v2187_v11 = vpop.f32.mrf.mxu0  ;;  %2737 = vmatmul.mubr.bf16.gmra.mxu1 %v2250_v9  ;;  %2850 = vmatmul.mubr.bf16.gmra.mxu0 %v2250_v9 }
 0x3d3   : > { %v2188_v13 = vadd.f32 %v2187_v11, %v5603_v3  ;;  %v2232_v47 = vmax.f32 %v2186_v33, 0.0 }
 0x3d4   : > { %v2191_v15 = vpop.f32.mrf.mxu0 }
 0x3d5   : > { %v2233_v37 = vmax.f32 %v2188_v13, 0.0  ;;  %v2252_v23 = vpack.c.bf16 %v2232_v47, %v2230_v16  ;;  %v2192_v34 = vadd.f32 %v2191_v15, %v5606_v26 }
 0x3d6   : > { %v2193_v17 = vpop.f32.mrf.mxu0 }
 0x3d7   : > { %v2253_v21 = vpack.c.bf16 %v2233_v37, %v2231_v14  ;;  %v2194_v27 = vadd.f32 %v2193_v17, %v5603_v3  ;;  %v2234_v41 = vmax.f32 %v2192_v34, 0.0 }
 0x3d8   : > { %v2195_v24 = vpop.f32.mrf.mxu0 }
 0x3d9   : > { %v2196_v28 = vadd.f32 %v2195_v24, %v5606_v26  ;;  %2746 = vmatprep.mubr.bf16.mxu1 %v2253_v21  ;;  %2859 = vmatprep.mubr.bf16.mxu0 %v2253_v21  ;;  %v2235_v38 = vmax.f32 %v2194_v27, 0.0 }
 0x3da   : > { %v2197_v1 = vpop.f32.mrf.mxu0  ;;  %2747 = vmatmul.mubr.bf16.gmra.mxu1 %v2252_v23  ;;  %2860 = vmatmul.mubr.bf16.gmra.mxu0 %v2252_v23 }
 0x3db   : > { %v2198_v10 = vadd.f32 %v2197_v1, %v5603_v3  ;;  %v2236_v35 = vmax.f32 %v2196_v28, 0.0 }
 0x3dc   : > { %v2201_v36 = vpop.f32.mrf.mxu0 }
 0x3dd   : > { %v2237_v39 = vmax.f32 %v2198_v10, 0.0  ;;  %v2254_v43 = vpack.c.bf16 %v2236_v35, %v2234_v41  ;;  %v2202_v18 = vadd.f32 %v2201_v36, %v5606_v26 }
 0x3de   : > { %v2203_v42 = vpop.f32.mrf.mxu0 }
 0x3df   : > { %v2255_v54 = vpack.c.bf16 %v2237_v39, %v2235_v38  ;;  %v2204_v55 = vadd.f32 %v2203_v42, %v5603_v3  ;;  %v2238_v57 = vmax.f32 %v2202_v18, 0.0 }
 0x3e0   : > { %v2205_v45 = vpop.f32.mrf.mxu0 }
 0x3e1   : > { %v2206_v19 = vadd.f32 %v2205_v45, %v5606_v26  ;;  %2756 = vmatprep.mubr.bf16.mxu1 %v2255_v54  ;;  %2869 = vmatprep.mubr.bf16.mxu0 %v2255_v54  ;;  %v2239_v52 = vmax.f32 %v2204_v55, 0.0  ;;  %v2322_v26 = vld [vmem:[%s5974_s11] sm:$0xf] }
 0x3e2   : > { %v2207_v44 = vpop.f32.mrf.mxu0  ;;  %2757 = vmatmul.mubr.bf16.gmra.mxu1 %v2254_v43  ;;  %2870 = vmatmul.mubr.bf16.gmra.mxu0 %v2254_v43  ;;  %v5648_v46 = vrot.slane %v2322_v26, %v2334_v5  ;;  %v5651_v58 = vrot.slane %v2322_v26, %v5343_v53  ;;  %v5653_v30 = vrot.slane %v2322_v26, %v2338_v40 }
 0x3e3   : > { %v2208_v32 = vadd.f32 %v2207_v44, %v5603_v3  ;;  %v2240_v48 = vmax.f32 %v2206_v19, 0.0  ;;  %v5646_v3 = vrot.slane %v2322_v26, %v5337_v51 }
 0x3e5   : > { %v2241_v56 = vmax.f32 %v2208_v32, 0.0  ;;  %v2256_v25 = vpack.c.bf16 %v2240_v48, %v2238_v57 }
 0x3e7   : > { %v2257_v49 = vpack.c.bf16 %v2241_v56, %v2239_v52 }
 0x3e9   : > { %2766 = vmatprep.mubr.bf16.mxu1 %v2257_v49  ;;  %2879 = vmatprep.mubr.bf16.mxu0 %v2257_v49 }
 0x3ea   : > { %2767 = vmatmul.mubr.bf16.gmra.mxu1 %v2256_v25  ;;  %2880 = vmatmul.mubr.bf16.gmra.mxu0 %v2256_v25 }
 0x472   : > { %v2698_v7 = vpop.f32.mrf.mxu1  ;;  %v2811_v0 = vpop.f32.mrf.mxu0 }
 0x473   : > { %v2699_v29 = vadd.f32 %v2698_v7, %v5646_v3  ;;  %v2812_v63 = vadd.f32 %v2811_v0, %v5648_v46 }
 0x474   : > { %v2700_v20 = vpop.f32.mrf.mxu1  ;;  %v2813_v22 = vpop.f32.mrf.mxu0 }
 0x475   : > { %v2890_v60 = vsub.f32 0.0, %v2699_v29  ;;  %v2892_v50 = vsub.f32 0.0, %v2812_v63  ;;  %v2701_v51 = vadd.f32 %v2700_v20, %v5651_v58  ;;  %v2814_v61 = vadd.f32 %v2813_v22, %v5653_v30 }
 0x476   : > { %v2702_v62 = vpop.f32.mrf.mxu1  ;;  %v2815_v2 = vpop.f32.mrf.mxu0 }
 0x477   : > { %v2954_v53 = vmul.f32 1.442695, %v2890_v60  ;;  %v2958_v4 = vmul.f32 1.442695, %v2892_v50  ;;  %v2891_v6 = vsub.f32 0.0, %v2701_v51  ;;  %v2893_v8 = vsub.f32 0.0, %v2814_v61 }
 0x478   : > { %v2703_v9 = vadd.f32 %v2702_v62, %v5646_v3  ;;  %v2816_v31 = vadd.f32 %v2815_v2, %v5648_v46  ;;  %v2704_v12 = vpop.f32.mrf.mxu1  ;;  %v2817_v33 = vpop.f32.mrf.mxu0 }
 0x479   : > { %4339 = vpow2.f32 %v2954_v53  ;;  %v2956_v59 = vmul.f32 1.442695, %v2891_v6  ;;  %v2960_v11 = vmul.f32 1.442695, %v2893_v8  ;;  %v2705_v13 = vadd.f32 %v2704_v12, %v5651_v58 }
 0x47a   : > { %4341 = vpow2.f32 %v2958_v4  ;;  %v2894_v47 = vsub.f32 0.0, %v2703_v9  ;;  %v2896_v15 = vsub.f32 0.0, %v2816_v31  ;;  %v2818_v14 = vadd.f32 %v2817_v33, %v5653_v30  ;;  %v2708_v37 = vpop.f32.mrf.mxu1  ;;  %v2821_v16 = vpop.f32.mrf.mxu0 }
 0x47b   : > { %4343 = vpow2.f32 %v2956_v59  ;;  %v2895_v17 = vsub.f32 0.0, %v2705_v13  ;;  %v2709_v21 = vadd.f32 %v2708_v37, %v5646_v3  ;;  %v2822_v23 = vadd.f32 %v2821_v16, %v5648_v46 }
 0x47c   : > { %4345 = vpow2.f32 %v2960_v11  ;;  %v2962_v24 = vmul.f32 1.442695, %v2894_v47  ;;  %v2966_v27 = vmul.f32 1.442695, %v2896_v15  ;;  %v2897_v28 = vsub.f32 0.0, %v2818_v14  ;;  %v2710_v34 = vpop.f32.mrf.mxu1  ;;  %v2823_v1 = vpop.f32.mrf.mxu0 }
 0x47d   : > { %v2964_v10 = vmul.f32 1.442695, %v2895_v17  ;;  %v2898_v35 = vsub.f32 0.0, %v2709_v21  ;;  %v2900_v36 = vsub.f32 0.0, %v2822_v23  ;;  %v2711_v38 = vadd.f32 %v2710_v34, %v5651_v58 }
 0x47e   : > { %4347 = vpow2.f32 %v2962_v24  ;;  %v2968_v39 = vmul.f32 1.442695, %v2897_v28  ;;  %v2824_v41 = vadd.f32 %v2823_v1, %v5653_v30  ;;  %v2712_v42 = vpop.f32.mrf.mxu1  ;;  %v2825_v54 = vpop.f32.mrf.mxu0 }
 0x47f   : > { %4349 = vpow2.f32 %v2966_v27  ;;  %v2970_v43 = vmul.f32 1.442695, %v2898_v35  ;;  %v2974_v45 = vmul.f32 1.442695, %v2900_v36  ;;  %v2899_v55 = vsub.f32 0.0, %v2711_v38 }
 0x480   : > { %4351 = vpow2.f32 %v2964_v10  ;;  %v2901_v19 = vsub.f32 0.0, %v2824_v41  ;;  %v2713_v18 = vadd.f32 %v2712_v42, %v5646_v3  ;;  %v2826_v44 = vadd.f32 %v2825_v54, %v5648_v46  ;;  %v2714_v32 = vpop.f32.mrf.mxu1  ;;  %v2827_v48 = vpop.f32.mrf.mxu0 }
 0x481   : > { %4353 = vpow2.f32 %v2968_v39  ;;  %v2972_v52 = vmul.f32 1.442695, %v2899_v55  ;;  %v2715_v56 = vadd.f32 %v2714_v32, %v5651_v58  ;;  %v2828_v57 = vadd.f32 %v2827_v48, %v5653_v30 }
 0x482   : > { %4355 = vpow2.f32 %v2970_v43  ;;  %v2976_v49 = vmul.f32 1.442695, %v2901_v19  ;;  %v2902_v25 = vsub.f32 0.0, %v2713_v18  ;;  %v2904_v5 = vsub.f32 0.0, %v2826_v44  ;;  %v2718_v26 = vpop.f32.mrf.mxu1  ;;  %v2831_v40 = vpop.f32.mrf.mxu0 }
 0x483   : > { %4357 = vpow2.f32 %v2974_v45  ;;  %v2903_v7 = vsub.f32 0.0, %v2715_v56  ;;  %v2905_v60 = vsub.f32 0.0, %v2828_v57  ;;  %v5684_v33 = vadd.f32 %v2718_v26, %v5646_v3 }
 0x484   : > { %4359 = vpow2.f32 %v2972_v52  ;;  %v2978_v0 = vmul.f32 1.442695, %v2902_v25  ;;  %v2982_v29 = vmul.f32 1.442695, %v2904_v5  ;;  %v5671_v63 = vpop.f32.mrf.mxu1  ;;  %v5673_v20 = vpop.f32.mrf.mxu0  ;;  %v5694_v11 = vadd.f32 %v2831_v40, %v5648_v46 }
 0x485   : > { %4361 = vpow2.f32 %v2976_v49  ;;  %v2980_v22 = vmul.f32 1.442695, %v2903_v7  ;;  %v2984_v9 = vmul.f32 1.442695, %v2905_v60 }
 0x486   : > { %v4340_v50 = vpop.eup %4339  ;;  %4363 = vpow2.f32 %v2978_v0  ;;  %v5675_v51 = vpop.f32.mrf.mxu1 }
 0x487   : > { %v4342_v61 = vpop.eup %4341  ;;  %v3082_v62 = vadd.f32 1.0, %v4340_v50  ;;  %4365 = vpow2.f32 %v2982_v29  ;;  %v5677_v4 = vpop.f32.mrf.mxu0 }
 0x488   : > { %v4344_v2 = vpop.eup %4343  ;;  %v3084_v53 = vadd.f32 1.0, %v4342_v61  ;;  %4367 = vpow2.f32 %v2980_v22  ;;  %v5679_v31 = vpop.f32.mrf.mxu1 }
 0x489   : > { %v4346_v6 = vpop.eup %4345  ;;  %4369 = vrcp.f32 %v3082_v62  ;;  %v3083_v8 = vadd.f32 1.0, %v4344_v2  ;;  %v5698_v15 = vpop.f32.mrf.mxu0 }
 0x48a   : > { %4371 = vrcp.f32 %v3084_v53  ;;  %v3085_v12 = vadd.f32 1.0, %v4346_v6  ;;  %v5700_v16 = vpop.f32.mrf.mxu1 }
 0x48b   : > { %v4348_v59 = vpop.eup %4347  ;;  %4373 = vrcp.f32 %v3083_v8 }
 0x48c   : > { %v4350_v13 = vpop.eup %4349  ;;  %4375 = vrcp.f32 %v3085_v12  ;;  %v3086_v47 = vadd.f32 1.0, %v4348_v59 }
 0x48d   : > { %v4352_v14 = vpop.eup %4351  ;;  %v3088_v37 = vadd.f32 1.0, %v4350_v13  ;;  %4377 = vpow2.f32 %v2984_v9 }
 0x48e   : > { %4794 = shalt.err (!%p4791_p8)
}
 0x48f   : > { %s4795_s15 = scalar_lea.hbm %s5691_s23, 2048  ;;  %s4799_s26 = scalar_lea.hbm %s5976_s13, 4096 }
 0x490   : > { %p4796_p3 = scmp.ne.s32.totalorder %s5691_s23, %s4795_s15  ;;  %p4800_p2 = scmp.lt.s32.totalorder %s5691_s23, %s5976_s13 }
 0x491   : > { %p4801_p10 = scmp.lt.s32.totalorder %s4799_s26, %s4795_s15 }
 0x492   : > { %p4797_p7 = pnand %p4796_p3, %p6029_p5 }
 0x493   : > { %p4802_p0 = por %p4801_p10, %p4800_p2 }
 0x494   : > { %p4798_p12 = pneg %p4797_p7 }
 0x496   : > { %p4803_p13 = pnand %p4802_p0, %p4798_p12 }
 0x498   : > { %4806 = shalt.err (!%p4803_p13)
}
 0x499   : > { %s4936_s24 = smov 128   ;;  %s4937_s10 = smov 8   ;;  %v4354_v17 = vpop.eup %4353  ;;  %4379 = vrcp.f32 %v3086_v47  ;;  %v3087_v21 = vadd.f32 1.0, %v4352_v14  ;;  %v2906_v23 = vsub.f32 0.0, %v5684_v33  ;;  %v2908_v28 = vsub.f32 0.0, %v5694_v11  ;;  %v5740_v36 = vpop.f32.mrf.mxu0 }
 0x49a   : > { %3959 = dma.vmem_to_hbm [thread:$0]  (%p6029_p5), %s5696_s20, 2048, %s5691_s23, %s5704_s17, %s4936_s24, %s4936_s24, %s4937_s10   ;;  %v4356_v24 = vpop.eup %4355  ;;  %4381 = vrcp.f32 %v3088_v37  ;;  %v3089_v27 = vadd.f32 1.0, %v4354_v17  ;;  %v5734_v34 = vadd.f32 %v5671_v63, %v5651_v58  ;;  %v5738_v35 = vadd.f32 %v5673_v20, %v5653_v30  ;;  %v5753_v42 = vpop.f32.mrf.mxu1 }
 0x49b   : > { %v4358_v1 = vpop.eup %4357  ;;  %4383 = vrcp.f32 %v3087_v21  ;;  %v3090_v10 = vadd.f32 1.0, %v4356_v24  ;;  %s6030_s14 = sld [smem:[#allocation36_spill]]  ;;  %v5751_v41 = vadd.f32 %v5675_v51, %v5646_v3  ;;  %s3363_s0 = sshll.u32 %s5527_s25, 4  ;;  %v5756_v45 = vmul.f32 1.442695, %v2906_v23  ;;  %s5762_s0 = int_to_ptr.vmem [resolvable:$true] %s3363_s0 }
 0x49c   : > { %v4360_v38 = vpop.eup %4359  ;;  %4385 = vrcp.f32 %v3089_v27  ;;  %v3092_v39 = vadd.f32 1.0, %v4358_v1  ;;  %v5760_v55 = vadd.f32 %v5677_v4, %v5648_v46  ;;  %v5764_v44 = vmul.f32 1.442695, %v2908_v28  ;;  %s4807_s25 = scalar_lea.vmem %s5762_s0, 2048 }
 0x49d   : > { %v4362_v54 = vpop.eup %4361  ;;  %4387 = vrcp.f32 %v3090_v10  ;;  %v3091_v43 = vadd.f32 1.0, %v4360_v38  ;;  %v2907_v32 = vsub.f32 0.0, %v5734_v34  ;;  %p4808_p9 = scmp.ne.s32.totalorder %s5762_s0, %s4807_s25 }
 0x49e   : > { %v4364_v19 = vpop.eup %4363  ;;  %4389 = vrcp.f32 %v3092_v39  ;;  %v3093_v18 = vadd.f32 1.0, %v4362_v54 }
 0x49f   : > { %p4809_p11 = pnand %p4808_p9, %p6029_p5 }
 0x4a1   : > { %s5747_s8 = scalar_lea.hbm %s6030_s14, %s3788_s4  ;;  %p4810_p1 = pneg %p4809_p11 }
 0x4a2   : > { %s4938_s4 = smov [#allocation17]  }
 0x4a3   : > { %s4811_s22 = sshll.u32 %s4938_s4, 4  ;;  %s4812_s22 = int_to_ptr.vmem [resolvable:$false] %s4811_s22 }
 0x4a4   : > { %s4813_s15 = scalar_lea.vmem %s4812_s22, 4096  ;;  %p4814_p4 = scmp.lt.s32.totalorder %s5762_s0, %s4812_s22 }
 0x4a5   : > { %p4815_p6 = scmp.lt.s32.totalorder %s4813_s15, %s4807_s25 }
 0x4a7   : > { %p4816_p8 = por %p4815_p6, %p4814_p4 }
 0x4a9   : > { %p4817_p3 = pnand %p4816_p8, %p4810_p1 }
 0x4ab   : > { %4820 = shalt.err (!%p4817_p3)
}
 0x4ac   : > { %s4821_s2 = scalar_lea.hbm %s5747_s8, 2048  ;;  %s4825_s21 = scalar_lea.hbm %s6030_s14, 4096 }
 0x4ad   : > { %p4822_p7 = scmp.ne.s32.totalorder %s5747_s8, %s4821_s2  ;;  %p4826_p10 = scmp.lt.s32.totalorder %s5747_s8, %s6030_s14 }
 0x4ae   : > { %p4827_p0 = scmp.lt.s32.totalorder %s4825_s21, %s4821_s2 }
 0x4af   : > { %p4823_p12 = pnand %p4822_p7, %p6029_p5 }
 0x4b0   : > { %p4828_p13 = por %p4827_p0, %p4826_p10 }
 0x4b1   : > { %p4824_p2 = pneg %p4823_p12 }
 0x4b3   : > { %p4829_p9 = pnand %p4828_p13, %p4824_p2 }
 0x4b5   : > { %4832 = shalt.err (!%p4829_p9)
}
 0x4b6   : > { %3960 = dma.vmem_to_hbm [thread:$0]  (%p6029_p5), %s5762_s0, 2048, %s5747_s8, %s5704_s17, %s4936_s24, %s4936_s24, %s4937_s10   ;;  %v4366_v48 = vpop.eup %4365  ;;  %4391 = vrcp.f32 %v3091_v43  ;;  %v3094_v52 = vadd.f32 1.0, %v4364_v19  ;;  %v2909_v56 = vsub.f32 0.0, %v5738_v35  ;;  %v2725_v57 = vadd.f32 %v5679_v31, %v5651_v58  ;;  %v2843_v49 = vpop.f32.mrf.mxu0 }
 0x4b7   : > { %v4368_v25 = vpop.eup %4367  ;;  %4393 = vrcp.f32 %v3093_v18  ;;  %v3096_v5 = vadd.f32 1.0, %v4366_v48  ;;  %v2910_v26 = vsub.f32 0.0, %v5751_v41  ;;  %v2838_v40 = vadd.f32 %v5698_v15, %v5653_v30  ;;  %v2732_v7 = vpop.f32.mrf.mxu1  ;;  %s5802_s17 = scalar_lea.vmem [#allocation14], %s3583_s6  ;;  %s3787_s6 = sshll.u32 %s5038_s19, 13 }
 0x4b8   : > { %v4370_v0 = vpop.eup %4369  ;;  %4395 = vrcp.f32 %v3094_v52  ;;  %v3095_v29 = vadd.f32 1.0, %v4368_v25  ;;  %v2912_v63 = vsub.f32 0.0, %v5760_v55  ;;  %v2729_v20 = vadd.f32 %v5700_v16, %v5646_v3  ;;  %v2845_v53 = vpop.f32.mrf.mxu0  ;;  %s3331_s24 = sshll.u32 %s5802_s17, 4  ;;  %s6031_s8 = sld [smem:[#allocation35_spill]]  ;;  %s5917_s24 = int_to_ptr.vmem [resolvable:$true] %s3331_s24 }
 0x4b9   : > { %v4372_v22 = vpop.eup %4371  ;;  %3210 = vst [vmem:[%s5802_s17] sm:$0xff] %v4370_v0  ;;  %4397 = vrcp.f32 %v3096_v5  ;;  %v2988_v60 = vmul.f32 1.442695, %v2907_v32  ;;  %v2842_v50 = vadd.f32 %v5740_v36, %v5648_v46  ;;  %v2992_v61 = vmul.f32 1.442695, %v2909_v56  ;;  %v2734_v31 = vpop.f32.mrf.mxu1  ;;  %s3307_s25 = scalar_lea.sflag [#allocation4], %s5233_s18  ;;  %s4833_s4 = scalar_lea.vmem %s5917_s24, 8192 }
 0x4ba   : > { %v4374_v51 = vpop.eup %4373  ;;  %3212 = vst [vmem:[%s5802_s17 + $0x10] sm:$0xff] %v4372_v22  ;;  %4399 = vrcp.f32 %v3095_v29  ;;  %v2911_v62 = vsub.f32 0.0, %v2725_v57  ;;  %v2731_v2 = vadd.f32 %v5753_v42, %v5651_v58  ;;  %v2994_v6 = vmul.f32 1.442695, %v2910_v26  ;;  %v2847_v23 = vpop.f32.mrf.mxu0  ;;  %p4834_p11 = scmp.ne.s32.totalorder %s5917_s24, %s4833_s4  ;;  %s4939_s19 = smov [#allocation14]  }
 0x4bb   : > { %v4376_v4 = vpop.eup %4375  ;;  %3211 = vst [vmem:[%s5802_s17 + $0x8] sm:$0xff] %v4374_v51  ;;  %4401 = vpow2.f32 %v5756_v45  ;;  %v2913_v8 = vsub.f32 0.0, %v2838_v40  ;;  %v2844_v9 = vadd.f32 %v2843_v49, %v5653_v30  ;;  %v2998_v33 = vmul.f32 1.442695, %v2912_v63  ;;  %v2738_v34 = vpop.f32.mrf.mxu1  ;;  %s4837_s22 = sshll.u32 %s4939_s19, 4  ;;  %s4838_s22 = int_to_ptr.vmem [resolvable:$false] %s4837_s22 }
 0x4bc   : > { %v4378_v12 = vpop.eup %4377  ;;  %3213 = vst [vmem:[%s5802_s17 + $0x18] sm:$0xff] %v4376_v4  ;;  %4403 = vpow2.f32 %v5764_v44  ;;  %v2914_v59 = vsub.f32 0.0, %v2729_v20  ;;  %v2733_v11 = vadd.f32 %v2732_v7, %v5646_v3  ;;  %v2916_v15 = vsub.f32 0.0, %v2842_v50  ;;  %v2851_v43 = vpop.f32.mrf.mxu0  ;;  %p4835_p1 = pnand %p4834_p11, %p6029_p5  ;;  %s4839_s15 = scalar_lea.vmem %s4838_s22, 16384 }
 0x4bd   : > { %v4380_v13 = vpop.eup %4379  ;;  %v3097_v47 = vadd.f32 1.0, %v4378_v12  ;;  %4405 = vpow2.f32 %v2988_v60  ;;  %v2846_v14 = vadd.f32 %v2845_v53, %v5648_v46  ;;  %v2996_v16 = vmul.f32 1.442695, %v2911_v62  ;;  %v2740_v18 = vpop.f32.mrf.mxu1  ;;  %p4840_p6 = scmp.lt.s32.totalorder %s5917_s24, %s4838_s22  ;;  %p4841_p8 = scmp.lt.s32.totalorder %s4839_s15, %s4833_s4 }
 0x4be   : > { %v4382_v37 = vpop.eup %4381  ;;  %3214 = vst [vmem:[%s5802_s17 + $0x20] sm:$0xff] %v4380_v13  ;;  %4407 = vpow2.f32 %v2992_v61  ;;  %v2915_v17 = vsub.f32 0.0, %v2731_v2  ;;  %v2735_v21 = vadd.f32 %v2734_v31, %v5651_v58  ;;  %v3000_v27 = vmul.f32 1.442695, %v2913_v8  ;;  %v2853_v49 = vpop.f32.mrf.mxu0  ;;  %s5915_s0 = scalar_lea.hbm %s6031_s8, %s3787_s6  ;;  %p4836_p4 = pneg %p4835_p1 }
 0x4bf   : > { %v4384_v24 = vpop.eup %4383  ;;  %3216 = vst [vmem:[%s5802_s17 + $0x30] sm:$0xff] %v4382_v37  ;;  %4409 = vrcp.f32 %v3097_v47  ;;  %v2917_v28 = vsub.f32 0.0, %v2844_v9  ;;  %v3002_v10 = vmul.f32 1.442695, %v2914_v59  ;;  %v2918_v35 = vsub.f32 0.0, %v2733_v11  ;;  %v2742_v26 = vpop.f32.mrf.mxu1  ;;  %p4842_p3 = por %p4841_p8, %p4840_p6 }
 0x4c0   : > { %v4386_v1 = vpop.eup %4385  ;;  %3215 = vst [vmem:[%s5802_s17 + $0x28] sm:$0xff] %v4384_v24  ;;  %4411 = vpow2.f32 %v2994_v6  ;;  %v3006_v38 = vmul.f32 1.442695, %v2916_v15  ;;  %v2920_v39 = vsub.f32 0.0, %v2846_v14  ;;  %v3004_v42 = vmul.f32 1.442695, %v2915_v17  ;;  %v2855_v20 = vpop.f32.mrf.mxu0 }
 0x4c1   : > { %v4388_v36 = vpop.eup %4387  ;;  %3217 = vst [vmem:[%s5802_s17 + $0x38] sm:$0xff] %v4386_v1  ;;  %4413 = vpow2.f32 %v2998_v33  ;;  %v2919_v54 = vsub.f32 0.0, %v2735_v21  ;;  %v3008_v55 = vmul.f32 1.442695, %v2917_v28  ;;  %v2848_v19 = vadd.f32 %v2847_v23, %v5653_v30  ;;  %v2744_v51 = vpop.f32.mrf.mxu1  ;;  %p4843_p7 = pnand %p4842_p3, %p4836_p4 }
 0x4c2   : > { %v4390_v41 = vpop.eup %4389  ;;  %3218 = vst [vmem:[%s5802_s17 + $0x40] sm:$0xff] %v4388_v36  ;;  %4415 = vpow2.f32 %v2996_v16  ;;  %v3010_v32 = vmul.f32 1.442695, %v2918_v35  ;;  %v3014_v52 = vmul.f32 1.442695, %v2920_v39  ;;  %v2739_v2 = vadd.f32 %v2738_v34, %v5646_v3  ;;  %v2857_v9 = vpop.f32.mrf.mxu0 }
 0x4c3   : > { %v4392_v45 = vpop.eup %4391  ;;  %3220 = vst [vmem:[%s5802_s17 + $0x50] sm:$0xff] %v4390_v41  ;;  %4417 = vpow2.f32 %v3000_v27  ;;  %v3012_v57 = vmul.f32 1.442695, %v2919_v54  ;;  %v2921_v5 = vsub.f32 0.0, %v2848_v19  ;;  %v2852_v4 = vadd.f32 %v2851_v43, %v5648_v46  ;;  %v2748_v33 = vpop.f32.mrf.mxu1 }
 0x4c4   : > { %v4394_v44 = vpop.eup %4393  ;;  %3219 = vst [vmem:[%s5802_s17 + $0x48] sm:$0xff] %v4392_v45  ;;  %4419 = vpow2.f32 %v3002_v10  ;;  %v2922_v13 = vsub.f32 0.0, %v2739_v2  ;;  %v2741_v37 = vadd.f32 %v2740_v18, %v5651_v58  ;;  %v2854_v21 = vadd.f32 %v2853_v49, %v5653_v30  ;;  %v2861_v23 = vpop.f32.mrf.mxu0 }
 0x4c5   : > { %v4396_v48 = vpop.eup %4395  ;;  %3221 = vst [vmem:[%s5802_s17 + $0x58] sm:$0xff] %v4394_v44  ;;  %4421 = vpow2.f32 %v3006_v38  ;;  %v3016_v50 = vmul.f32 1.442695, %v2921_v5  ;;  %v2924_v14 = vsub.f32 0.0, %v2852_v4  ;;  %v2743_v28 = vadd.f32 %v2742_v26, %v5646_v3  ;;  %v2750_v34 = vpop.f32.mrf.mxu1 }
 0x4c6   : > { %v4398_v56 = vpop.eup %4397  ;;  %3222 = vst [vmem:[%s5802_s17 + $0x60] sm:$0xff] %v4396_v48  ;;  %4423 = vpow2.f32 %v3004_v42  ;;  %v3018_v35 = vmul.f32 1.442695, %v2922_v13  ;;  %v2856_v36 = vadd.f32 %v2855_v20, %v5648_v46  ;;  %v2923_v42 = vsub.f32 0.0, %v2741_v37  ;;  %v2863_v19 = vpop.f32.mrf.mxu0 }
 0x4c7   : > { %v4400_v25 = vpop.eup %4399  ;;  %3224 = vst [vmem:[%s5802_s17 + $0x70] sm:$0xff] %v4398_v56  ;;  %4425 = vpow2.f32 %v3008_v55  ;;  %v3022_v41 = vmul.f32 1.442695, %v2924_v14  ;;  %v2925_v45 = vsub.f32 0.0, %v2854_v21  ;;  %v2745_v55 = vadd.f32 %v2744_v51, %v5651_v58 }
 0x4c8   : > { %v4402_v40 = vpop.eup %4401  ;;  %3223 = vst [vmem:[%s5802_s17 + $0x68] sm:$0xff] %v4400_v25  ;;  %4427 = vpow2.f32 %v3010_v32  ;;  %v2926_v32 = vsub.f32 0.0, %v2743_v28  ;;  %v2858_v48 = vadd.f32 %v2857_v9, %v5653_v30  ;;  %v2928_v49 = vsub.f32 0.0, %v2856_v36  ;;  %v2865_v20 = vpop.f32.mrf.mxu0 }
 0x4c9   : > { %v4404_v7 = vpop.eup %4403  ;;  %v3098_v0 = vadd.f32 1.0, %v4402_v40  ;;  %4429 = vpow2.f32 %v3014_v52  ;;  %v2752_v52 = vpop.f32.mrf.mxu1  ;;  %v2749_v25 = vadd.f32 %v2748_v33, %v5646_v3  ;;  %v3020_v26 = vmul.f32 1.442695, %v2923_v42 }
 0x4ca   : > { %v4406_v29 = vpop.eup %4405  ;;  %v3100_v63 = vadd.f32 1.0, %v4404_v7  ;;  %4431 = vpow2.f32 %v3012_v57  ;;  %v2862_v40 = vadd.f32 %v2861_v23, %v5648_v46  ;;  %v2864_v51 = vadd.f32 %v2863_v19, %v5653_v30  ;;  %v2867_v13 = vpop.f32.mrf.mxu0 }
 0x4cb   : > { %v4408_v22 = vpop.eup %4407  ;;  %4433 = vrcp.f32 %v3098_v0  ;;  %v3099_v60 = vadd.f32 1.0, %v4406_v29  ;;  %v3024_v0 = vmul.f32 1.442695, %v2925_v45  ;;  %v2927_v29 = vsub.f32 0.0, %v2745_v55 }
 0x4cc   : > { %v4410_v61 = vpop.eup %4409  ;;  %4435 = vrcp.f32 %v3100_v63  ;;  %v3101_v62 = vadd.f32 1.0, %v4408_v22  ;;  %v2751_v63 = vadd.f32 %v2750_v34, %v5651_v58  ;;  %v3030_v2 = vmul.f32 1.442695, %v2928_v49 }
 0x4cd   : > { %v4412_v53 = vpop.eup %4411  ;;  %3225 = vst [vmem:[%s5802_s17 + $0x78] sm:$0xff] %v4410_v61  ;;  %4437 = vrcp.f32 %v3099_v60  ;;  %v3026_v60 = vmul.f32 1.442695, %v2926_v32  ;;  %v2754_v61 = vpop.f32.mrf.mxu1  ;;  %v2753_v4 = vadd.f32 %v2752_v52, %v5646_v3  ;;  %v2932_v9 = vsub.f32 0.0, %v2862_v40 }
 0x4ce   : > { %v4414_v6 = vpop.eup %4413  ;;  %4439 = vrcp.f32 %v3101_v62  ;;  %v3102_v8 = vadd.f32 1.0, %v4412_v53  ;;  %v2930_v53 = vsub.f32 0.0, %v2749_v25  ;;  %v3028_v33 = vmul.f32 1.442695, %v2927_v29 }
 0x4cf   : > { %v4416_v31 = vpop.eup %4415  ;;  %v3104_v12 = vadd.f32 1.0, %v4414_v6  ;;  %4441 = vpow2.f32 %v3016_v50  ;;  %v2929_v50 = vsub.f32 0.0, %v2858_v48  ;;  %v2933_v14 = vsub.f32 0.0, %v2864_v51  ;;  %v2758_v37 = vpop.f32.mrf.mxu1 }
 0x4d0   : > { %v4418_v59 = vpop.eup %4417  ;;  %4443 = vrcp.f32 %v3102_v8  ;;  %v3103_v11 = vadd.f32 1.0, %v4416_v31  ;;  %v2866_v31 = vadd.f32 %v2865_v20, %v5648_v46  ;;  %v2934_v21 = vsub.f32 0.0, %v2753_v4 }
 0x4d1   : > { %v4420_v47 = vpop.eup %4419  ;;  %4445 = vrcp.f32 %v3104_v12  ;;  %v3105_v15 = vadd.f32 1.0, %v4418_v59  ;;  %v2931_v59 = vsub.f32 0.0, %v2751_v63  ;;  %v3040_v36 = vmul.f32 1.442695, %v2933_v14 }
 0x4d2   : > { %v4422_v16 = vpop.eup %4421  ;;  %4447 = vrcp.f32 %v3103_v11  ;;  %v3106_v17 = vadd.f32 1.0, %v4420_v47  ;;  %v2755_v11 = vadd.f32 %v2754_v61, %v5651_v58  ;;  %v3042_v42 = vmul.f32 1.442695, %v2934_v21 }
 0x4d3   : > { %v4424_v24 = vpop.eup %4423  ;;  %4449 = vrcp.f32 %v3105_v15  ;;  %v3108_v27 = vadd.f32 1.0, %v4422_v16  ;;  %v3032_v15 = vmul.f32 1.442695, %v2929_v50  ;;  %v3036_v34 = vmul.f32 1.442695, %v2931_v59 }
 0x4d4   : > { %v4426_v1 = vpop.eup %4425  ;;  %4451 = vrcp.f32 %v3106_v17  ;;  %v3107_v10 = vadd.f32 1.0, %v4424_v24  ;;  %v3034_v17 = vmul.f32 1.442695, %v2930_v53  ;;  %v3038_v24 = vmul.f32 1.442695, %v2932_v9 }
 0x4d5   : > { %v4428_v38 = vpop.eup %4427  ;;  %4453 = vrcp.f32 %v3108_v27  ;;  %v3109_v39 = vadd.f32 1.0, %v4426_v1  ;;  %v2936_v27 = vsub.f32 0.0, %v2866_v31  ;;  %v2935_v1 = vsub.f32 0.0, %v2755_v11 }
 0x4d6   : > { %v4430_v54 = vpop.eup %4429  ;;  %4455 = vrcp.f32 %v3107_v10  ;;  %v3110_v43 = vadd.f32 1.0, %v4428_v38  ;;  %v2871_v10 = vpop.f32.mrf.mxu0  ;;  %v2868_v38 = vadd.f32 %v2867_v13, %v5653_v30  ;;  %v2759_v20 = vadd.f32 %v2758_v37, %v5646_v3 }
 0x4d7   : > { %v4432_v18 = vpop.eup %4431  ;;  %4457 = vrcp.f32 %v3109_v39  ;;  %v3112_v44 = vadd.f32 1.0, %v4430_v54  ;;  %v2760_v39 = vpop.f32.mrf.mxu1  ;;  %v3044_v55 = vmul.f32 1.442695, %v2935_v1 }
 0x4d8   : > { %v4434_v56 = vpop.eup %4433  ;;  %4459 = vrcp.f32 %v3110_v43  ;;  %v3111_v57 = vadd.f32 1.0, %v4432_v18  ;;  %v3046_v43 = vmul.f32 1.442695, %v2936_v27  ;;  %v2873_v19 = vpop.f32.mrf.mxu0  ;;  %v2938_v31 = vsub.f32 0.0, %v2759_v20 }
 0x4d9   : > { %v4436_v5 = vpop.eup %4435  ;;  %3226 = vst [vmem:[%s5802_s17 + $0x80] sm:$0xff] %v4434_v56  ;;  %4461 = vrcp.f32 %v3112_v44  ;;  %v2937_v44 = vsub.f32 0.0, %v2868_v38  ;;  %v2762_v32 = vpop.f32.mrf.mxu1  ;;  %v2874_v11 = vadd.f32 %v2873_v19, %v5653_v30 }
 0x4da   : > { %v4438_v7 = vpop.eup %4437  ;;  %3228 = vst [vmem:[%s5802_s17 + $0x90] sm:$0xff] %v4436_v5  ;;  %4463 = vrcp.f32 %v3111_v57  ;;  %v2875_v25 = vpop.f32.mrf.mxu0  ;;  %v2763_v14 = vadd.f32 %v2762_v32, %v5646_v3 }
 0x4db   : > { %v4440_v22 = vpop.eup %4439  ;;  %3227 = vst [vmem:[%s5802_s17 + $0x88] sm:$0xff] %v4438_v7  ;;  %4465 = vpow2.f32 %v3018_v35  ;;  %v3048_v40 = vmul.f32 1.442695, %v2937_v44  ;;  %v2764_v7 = vpop.f32.mrf.mxu1 }
 0x4dc   : > { %v4442_v62 = vpop.eup %4441  ;;  %3229 = vst [vmem:[%s5802_s17 + $0x98] sm:$0xff] %v4440_v22  ;;  %4467 = vpow2.f32 %v3022_v41  ;;  %v2872_v22 = vadd.f32 %v2871_v10, %v5648_v46  ;;  %v2877_v51 = vpop.f32.mrf.mxu0 }
 0x4dd   : > { %v4444_v6 = vpop.eup %4443  ;;  %v3113_v8 = vadd.f32 1.0, %v4442_v62  ;;  %4469 = vpow2.f32 %v3020_v26 }
 0x4de   : > { %v4446_v12 = vpop.eup %4445  ;;  %3230 = vst [vmem:[%s5802_s17 + $0xa0] sm:$0xff] %v4444_v6  ;;  %4471 = vpow2.f32 %v3024_v0  ;;  %v2761_v6 = vadd.f32 %v2760_v39, %v5651_v58  ;;  %v2881_v13 = vpop.f32.mrf.mxu0 }
 0x4df   : > { %v4448_v47 = vpop.eup %4447  ;;  %3232 = vst [vmem:[%s5802_s17 + $0xb0] sm:$0xff] %v4446_v12  ;;  %4473 = vrcp.f32 %v3113_v8  ;;  %v2940_v12 = vsub.f32 0.0, %v2872_v22 }
 0x4e0   : > { %v4450_v16 = vpop.eup %4449  ;;  %3231 = vst [vmem:[%s5802_s17 + $0xa8] sm:$0xff] %v4448_v47  ;;  %4475 = vpow2.f32 %v3026_v60  ;;  %v2939_v21 = vsub.f32 0.0, %v2761_v6  ;;  %v2883_v38 = vpop.f32.mrf.mxu0 }
 0x4e1   : > { %v4452_v23 = vpop.eup %4451  ;;  %3233 = vst [vmem:[%s5802_s17 + $0xb8] sm:$0xff] %v4450_v16  ;;  %4477 = vpow2.f32 %v3030_v2  ;;  %v2768_v2 = vpop.f32.mrf.mxu1 }
 0x4e2   : > { %v4454_v28 = vpop.eup %4453  ;;  %3234 = vst [vmem:[%s5802_s17 + $0xc0] sm:$0xff] %v4452_v23  ;;  %4479 = vpow2.f32 %v3028_v33  ;;  %v2876_v23 = vadd.f32 %v2875_v25, %v5648_v46  ;;  %v3052_v32 = vmul.f32 1.442695, %v2939_v21  ;;  %v2885_v25 = vpop.f32.mrf.mxu0 }
 0x4e3   : > { %v4456_v35 = vpop.eup %4455  ;;  %3236 = vst [vmem:[%s5802_s17 + $0xd0] sm:$0xff] %v4454_v28  ;;  %4481 = vpow2.f32 %v3032_v15  ;;  %v2770_v37 = vpop.f32.mrf.mxu1  ;;  %v3050_v28 = vmul.f32 1.442695, %v2938_v31 }
 0x4e4   : > { %v4458_v41 = vpop.eup %4457  ;;  %3235 = vst [vmem:[%s5802_s17 + $0xc8] sm:$0xff] %v4456_v35  ;;  %4483 = vpow2.f32 %v3034_v17  ;;  %v2941_v35 = vsub.f32 0.0, %v2874_v11  ;;  %v2944_v19 = vsub.f32 0.0, %v2876_v23 }
 0x4e5   : > { %v4460_v54 = vpop.eup %4459  ;;  %3237 = vst [vmem:[%s5802_s17 + $0xd8] sm:$0xff] %v4458_v41  ;;  %4485 = vpow2.f32 %v3038_v24 }
 0x4e6   : > { %v4462_v45 = vpop.eup %4461  ;;  %3238 = vst [vmem:[%s5802_s17 + $0xe0] sm:$0xff] %v4460_v54  ;;  %4487 = vpow2.f32 %v3036_v34  ;;  %v3054_v34 = vmul.f32 1.442695, %v2940_v12  ;;  %v2878_v54 = vadd.f32 %v2877_v51, %v5653_v30  ;;  %v2887_v12 = vpop.f32.mrf.mxu0 }
 0x4e7   : > { %v4464_v18 = vpop.eup %4463  ;;  %3240 = vst [vmem:[%s5802_s17 + $0xf0] sm:$0xff] %v4462_v45  ;;  %4489 = vpow2.f32 %v3040_v36  ;;  %v2765_v36 = vadd.f32 %v2764_v7, %v5651_v58  ;;  %v2884_v7 = vadd.f32 %v2883_v38, %v5653_v30 }
 0x4e8   : > { %v4466_v48 = vpop.eup %4465  ;;  %3239 = vst [vmem:[%s5802_s17 + $0xe8] sm:$0xff] %v4464_v18  ;;  %4491 = vpow2.f32 %v3042_v42  ;;  %v2942_v42 = vsub.f32 0.0, %v2763_v14  ;;  %v2769_v18 = vadd.f32 %v2768_v2, %v5646_v3 }
 0x4e9   : > { %v4468_v52 = vpop.eup %4467  ;;  %v3114_v56 = vadd.f32 1.0, %v4466_v48  ;;  %4493 = vpow2.f32 %v3046_v43  ;;  %v2772_v43 = vpop.f32.mrf.mxu1  ;;  %v2882_v48 = vadd.f32 %v2881_v13, %v5648_v46 }
 0x4ea   : > { %v4470_v57 = vpop.eup %4469  ;;  %v3116_v49 = vadd.f32 1.0, %v4468_v52  ;;  %4495 = vpow2.f32 %v3044_v55  ;;  %v2946_v20 = vsub.f32 0.0, %v2769_v18  ;;  %v2773_v22 = vadd.f32 %v2772_v43, %v5646_v3 }
 0x4eb   : > { %v4472_v5 = vpop.eup %4471  ;;  %4497 = vrcp.f32 %v3114_v56  ;;  %v3115_v26 = vadd.f32 1.0, %v4470_v57  ;;  %v3056_v56 = vmul.f32 1.442695, %v2941_v35  ;;  %v2943_v57 = vsub.f32 0.0, %v2765_v36 }
 0x4ec   : > { %v4474_v0 = vpop.eup %4473  ;;  %4499 = vrcp.f32 %v3116_v49  ;;  %v3117_v29 = vadd.f32 1.0, %v4472_v5  ;;  %v2771_v49 = vadd.f32 %v2770_v37, %v5651_v58  ;;  %v2948_v51 = vsub.f32 0.0, %v2882_v48 }
 0x4ed   : > { %v4476_v63 = vpop.eup %4475  ;;  %3241 = vst [vmem:[%s5802_s17 + $0xf8] sm:$0xff] %v4474_v0  ;;  %4501 = vrcp.f32 %v3115_v26  ;;  %v3058_v26 = vmul.f32 1.442695, %v2942_v42  ;;  %v2774_v0 = vpop.f32.mrf.mxu1  ;;  %v3060_v2 = vmul.f32 1.442695, %v2943_v57  ;;  %v2888_v37 = vadd.f32 %v2887_v12, %v5653_v30 }
 0x4ee   : > { %v4478_v60 = vpop.eup %4477  ;;  %4503 = vrcp.f32 %v3117_v29  ;;  %v3118_v50 = vadd.f32 1.0, %v4476_v63  ;;  %v3062_v63 = vmul.f32 1.442695, %v2944_v19  ;;  %v3066_v31 = vmul.f32 1.442695, %v2946_v20 }
 0x4ef   : > { %v4480_v61 = vpop.eup %4479  ;;  %v3120_v62 = vadd.f32 1.0, %v4478_v60  ;;  %4505 = vpow2.f32 %v3048_v40  ;;  %v2945_v40 = vsub.f32 0.0, %v2878_v54 }
 0x4f0   : > { %v4482_v53 = vpop.eup %4481  ;;  %4507 = vrcp.f32 %v3118_v50  ;;  %v3119_v4 = vadd.f32 1.0, %v4480_v61  ;;  %v2886_v61 = vadd.f32 %v2885_v25, %v5648_v46  ;;  %v2950_v46 = vsub.f32 0.0, %v2773_v22 }
 0x4f1   : > { %v4484_v8 = vpop.eup %4483  ;;  %4509 = vrcp.f32 %v3120_v62  ;;  %v3121_v9 = vadd.f32 1.0, %v4482_v53  ;;  %v2947_v53 = vsub.f32 0.0, %v2771_v49  ;;  %v3064_v3 = vmul.f32 1.442695, %v2945_v40 }
 0x4f2   : > { %v4486_v33 = vpop.eup %4485  ;;  %4511 = vrcp.f32 %v3119_v4  ;;  %v3122_v59 = vadd.f32 1.0, %v4484_v8  ;;  %v2775_v4 = vadd.f32 %v2774_v0, %v5651_v58  ;;  %v2949_v8 = vsub.f32 0.0, %v2884_v7 }
 0x4f3   : > { %v4488_v47 = vpop.eup %4487  ;;  %4513 = vrcp.f32 %v3121_v9  ;;  %v3124_v15 = vadd.f32 1.0, %v4486_v33  ;;  %v2952_v11 = vsub.f32 0.0, %v2886_v61  ;;  %v3068_v13 = vmul.f32 1.442695, %v2947_v53 }
 0x4f4   : > { %v4490_v16 = vpop.eup %4489  ;;  %4515 = vrcp.f32 %v3122_v59  ;;  %v3123_v17 = vadd.f32 1.0, %v4488_v47  ;;  %v3070_v59 = vmul.f32 1.442695, %v2948_v51  ;;  %v2951_v47 = vsub.f32 0.0, %v2775_v4 }
 0x4f5   : > { %v4492_v24 = vpop.eup %4491  ;;  %4517 = vrcp.f32 %v3124_v15  ;;  %v3125_v27 = vadd.f32 1.0, %v4490_v16  ;;  %v3072_v14 = vmul.f32 1.442695, %v2949_v8  ;;  %v3078_v23 = vmul.f32 1.442695, %v2952_v11 }
 0x4f6   : > { %v4494_v1 = vpop.eup %4493  ;;  %4519 = vrcp.f32 %v3123_v17  ;;  %v3126_v10 = vadd.f32 1.0, %v4492_v24  ;;  %v3074_v17 = vmul.f32 1.442695, %v2950_v46 }
 0x4f7   : > { %v4496_v39 = vpop.eup %4495  ;;  %4521 = vrcp.f32 %v3125_v27  ;;  %v3128_v41 = vadd.f32 1.0, %v4494_v1  ;;  %v3076_v27 = vmul.f32 1.442695, %v2951_v47 }
 0x4f8   : > { %v4498_v45 = vpop.eup %4497  ;;  %4523 = vrcp.f32 %v3126_v10  ;;  %v3127_v55 = vadd.f32 1.0, %v4496_v39 }
 0x4f9   : > { %v4500_v44 = vpop.eup %4499  ;;  %3242 = vst [vmem:[%s5802_s17 + $0x100] sm:$0xff] %v4498_v45  ;;  %4525 = vrcp.f32 %v3128_v41 }
 0x4fa   : > { %v4502_v52 = vpop.eup %4501  ;;  %3244 = vst [vmem:[%s5802_s17 + $0x110] sm:$0xff] %v4500_v44  ;;  %4527 = vrcp.f32 %v3127_v55 }
 0x4fb   : > { %v4504_v5 = vpop.eup %4503  ;;  %3243 = vst [vmem:[%s5802_s17 + $0x108] sm:$0xff] %v4502_v52  ;;  %4529 = vpow2.f32 %v3050_v28 }
 0x4fc   : > { %v4506_v29 = vpop.eup %4505  ;;  %3245 = vst [vmem:[%s5802_s17 + $0x118] sm:$0xff] %v4504_v5  ;;  %4531 = vpow2.f32 %v3054_v34  ;;  %v2953_v34 = vsub.f32 0.0, %v2888_v37 }
 0x4fd   : > { %v4508_v60 = vpop.eup %4507  ;;  %v3129_v50 = vadd.f32 1.0, %v4506_v29  ;;  %4533 = vpow2.f32 %v3052_v32 }
 0x4fe   : > { %v4510_v62 = vpop.eup %4509  ;;  %3246 = vst [vmem:[%s5802_s17 + $0x120] sm:$0xff] %v4508_v60  ;;  %4535 = vpow2.f32 %v3056_v56  ;;  %v3080_v41 = vmul.f32 1.442695, %v2953_v34 }
 0x4ff   : > { %v4512_v6 = vpop.eup %4511  ;;  %3248 = vst [vmem:[%s5802_s17 + $0x130] sm:$0xff] %v4510_v62  ;;  %4537 = vrcp.f32 %v3129_v50 }
 0x500   : > { %v4514_v9 = vpop.eup %4513  ;;  %3247 = vst [vmem:[%s5802_s17 + $0x128] sm:$0xff] %v4512_v6  ;;  %4539 = vpow2.f32 %v3058_v26 }
 0x501   : > { %v4516_v33 = vpop.eup %4515  ;;  %3249 = vst [vmem:[%s5802_s17 + $0x138] sm:$0xff] %v4514_v9  ;;  %4541 = vpow2.f32 %v3062_v63 }
 0x502   : > { %v4518_v58 = vpop.eup %4517  ;;  %3250 = vst [vmem:[%s5802_s17 + $0x140] sm:$0xff] %v4516_v33  ;;  %4543 = vpow2.f32 %v3060_v2 }
 0x503   : > { %v4520_v15 = vpop.eup %4519  ;;  %3252 = vst [vmem:[%s5802_s17 + $0x150] sm:$0xff] %v4518_v58  ;;  %4545 = vpow2.f32 %v3064_v3 }
 0x504   : > { %v4522_v16 = vpop.eup %4521  ;;  %3251 = vst [vmem:[%s5802_s17 + $0x148] sm:$0xff] %v4520_v15  ;;  %4547 = vpow2.f32 %v3066_v31 }
 0x505   : > { %v4524_v21 = vpop.eup %4523  ;;  %3253 = vst [vmem:[%s5802_s17 + $0x158] sm:$0xff] %v4522_v16  ;;  %4549 = vpow2.f32 %v3070_v59 }
 0x506   : > { %v4526_v24 = vpop.eup %4525  ;;  %3254 = vst [vmem:[%s5802_s17 + $0x160] sm:$0xff] %v4524_v21  ;;  %4551 = vpow2.f32 %v3068_v13 }
 0x507   : > { %v4528_v28 = vpop.eup %4527  ;;  %3256 = vst [vmem:[%s5802_s17 + $0x170] sm:$0xff] %v4526_v24  ;;  %4553 = vpow2.f32 %v3072_v14 }
 0x508   : > { %v4530_v1 = vpop.eup %4529  ;;  %3255 = vst [vmem:[%s5802_s17 + $0x168] sm:$0xff] %v4528_v28  ;;  %4555 = vpow2.f32 %v3074_v17 }
 0x509   : > { %v4532_v30 = vpop.eup %4531  ;;  %v3130_v10 = vadd.f32 1.0, %v4530_v1  ;;  %4557 = vpow2.f32 %v3078_v23 }
 0x50a   : > { %v4534_v35 = vpop.eup %4533  ;;  %v3132_v36 = vadd.f32 1.0, %v4532_v30  ;;  %4559 = vpow2.f32 %v3076_v27 }
 0x50b   : > { %v4536_v38 = vpop.eup %4535  ;;  %4561 = vrcp.f32 %v3130_v10  ;;  %v3131_v39 = vadd.f32 1.0, %v4534_v35 }
 0x50c   : > { %v4538_v42 = vpop.eup %4537  ;;  %4563 = vrcp.f32 %v3132_v36  ;;  %v3133_v54 = vadd.f32 1.0, %v4536_v38 }
 0x50d   : > { %v4540_v43 = vpop.eup %4539  ;;  %3257 = vst [vmem:[%s5802_s17 + $0x178] sm:$0xff] %v4538_v42  ;;  %4565 = vrcp.f32 %v3131_v39 }
 0x50e   : > { %v4542_v45 = vpop.eup %4541  ;;  %4567 = vrcp.f32 %v3133_v54  ;;  %v3134_v55 = vadd.f32 1.0, %v4540_v43 }
 0x50f   : > { %v4544_v19 = vpop.eup %4543  ;;  %v3136_v18 = vadd.f32 1.0, %v4542_v45  ;;  %4569 = vpow2.f32 %v3080_v41 }
 0x510   : > { %v4546_v44 = vpop.eup %4545  ;;  %4571 = vrcp.f32 %v3134_v55  ;;  %v3135_v32 = vadd.f32 1.0, %v4544_v19 }
 0x511   : > { %v4548_v48 = vpop.eup %4547  ;;  %4573 = vrcp.f32 %v3136_v18  ;;  %v3137_v52 = vadd.f32 1.0, %v4546_v44 }
 0x512   : > { %v4550_v56 = vpop.eup %4549  ;;  %4575 = vrcp.f32 %v3135_v32  ;;  %v3138_v57 = vadd.f32 1.0, %v4548_v48 }
 0x513   : > { %v4552_v49 = vpop.eup %4551  ;;  %4577 = vrcp.f32 %v3137_v52  ;;  %v3140_v25 = vadd.f32 1.0, %v4550_v56 }
 0x514   : > { %v4554_v5 = vpop.eup %4553  ;;  %4579 = vrcp.f32 %v3138_v57  ;;  %v3139_v26 = vadd.f32 1.0, %v4552_v49 }
 0x515   : > { %v4556_v40 = vpop.eup %4555  ;;  %4581 = vrcp.f32 %v3140_v25  ;;  %v3141_v7 = vadd.f32 1.0, %v4554_v5 }
 0x516   : > { %v4558_v0 = vpop.eup %4557  ;;  %4583 = vrcp.f32 %v3139_v26  ;;  %v3142_v29 = vadd.f32 1.0, %v4556_v40 }
 0x517   : > { %v4560_v63 = vpop.eup %4559  ;;  %4585 = vrcp.f32 %v3141_v7  ;;  %v3144_v20 = vadd.f32 1.0, %v4558_v0 }
 0x518   : > { %v4562_v22 = vpop.eup %4561  ;;  %4587 = vrcp.f32 %v3142_v29  ;;  %v3143_v60 = vadd.f32 1.0, %v4560_v63 }
 0x519   : > { %v4564_v50 = vpop.eup %4563  ;;  %3258 = vst [vmem:[%s5802_s17 + $0x180] sm:$0xff] %v4562_v22  ;;  %4589 = vrcp.f32 %v3144_v20 }
 0x51a   : > { %v4566_v51 = vpop.eup %4565  ;;  %3260 = vst [vmem:[%s5802_s17 + $0x190] sm:$0xff] %v4564_v50  ;;  %4591 = vrcp.f32 %v3143_v60 }
 0x51b   : > { %v4568_v61 = vpop.eup %4567  ;;  %3259 = vst [vmem:[%s5802_s17 + $0x188] sm:$0xff] %v4566_v51 }
 0x51c   : > { %v4570_v62 = vpop.eup %4569  ;;  %3261 = vst [vmem:[%s5802_s17 + $0x198] sm:$0xff] %v4568_v61 }
 0x51d   : > { %v4572_v2 = vpop.eup %4571  ;;  %v3145_v53 = vadd.f32 1.0, %v4570_v62 }
 0x51e   : > { %v4574_v4 = vpop.eup %4573  ;;  %3262 = vst [vmem:[%s5802_s17 + $0x1a0] sm:$0xff] %v4572_v2 }
 0x51f   : > { %v4576_v6 = vpop.eup %4575  ;;  %3264 = vst [vmem:[%s5802_s17 + $0x1b0] sm:$0xff] %v4574_v4  ;;  %4593 = vrcp.f32 %v3145_v53 }
 0x520   : > { %v4578_v3 = vpop.eup %4577  ;;  %3263 = vst [vmem:[%s5802_s17 + $0x1a8] sm:$0xff] %v4576_v6 }
 0x521   : > { %v4580_v8 = vpop.eup %4579  ;;  %3265 = vst [vmem:[%s5802_s17 + $0x1b8] sm:$0xff] %v4578_v3 }
 0x522   : > { %v4582_v9 = vpop.eup %4581  ;;  %3266 = vst [vmem:[%s5802_s17 + $0x1c0] sm:$0xff] %v4580_v8 }
 0x523   : > { %v4584_v31 = vpop.eup %4583  ;;  %3268 = vst [vmem:[%s5802_s17 + $0x1d0] sm:$0xff] %v4582_v9 }
 0x524   : > { %v4586_v46 = vpop.eup %4585  ;;  %3267 = vst [vmem:[%s5802_s17 + $0x1c8] sm:$0xff] %v4584_v31 }
 0x525   : > { %v4588_v12 = vpop.eup %4587  ;;  %3269 = vst [vmem:[%s5802_s17 + $0x1d8] sm:$0xff] %v4586_v46 }
 0x526   : > { %v4590_v33 = vpop.eup %4589  ;;  %3270 = vst [vmem:[%s5802_s17 + $0x1e0] sm:$0xff] %v4588_v12 }
 0x527   : > { %v4592_v59 = vpop.eup %4591  ;;  %3272 = vst [vmem:[%s5802_s17 + $0x1f0] sm:$0xff] %v4590_v33 }
 0x528   : > { %3271 = vst [vmem:[%s5802_s17 + $0x1e8] sm:$0xff] %v4592_v59 }
 0x52c   : > { %v4594_v11 = vpop.eup %4593 }
 0x52d   : > { %3273 = vst [vmem:[%s5802_s17 + $0x1f8] sm:$0xff] %v4594_v11 }
 0x52e   : > { %4846 = shalt.err (!%p4843_p7)
}
 0x52f   : > { %s4847_s2 = scalar_lea.hbm %s5915_s0, 8192  ;;  %s4851_s21 = scalar_lea.hbm %s6031_s8, 16384 }
 0x530   : > { %p4848_p12 = scmp.ne.s32.totalorder %s5915_s0, %s4847_s2  ;;  %p4852_p0 = scmp.lt.s32.totalorder %s5915_s0, %s6031_s8 }
 0x531   : > { %p4853_p13 = scmp.lt.s32.totalorder %s4851_s21, %s4847_s2 }
 0x532   : > { %p4849_p2 = pnand %p4848_p12, %p6029_p5 }
 0x533   : > { %p4854_p9 = por %p4853_p13, %p4852_p0 }
 0x534   : > { %p4850_p10 = pneg %p4849_p2 }
 0x536   : > { %p4855_p11 = pnand %p4854_p9, %p4850_p10 }
 0x538   : > { %4858 = shalt.err (!%p4855_p11)
}
 0x539   : > { %s4940_s17 = smov 512   ;;  %s4941_s6 = smov 32  }
 0x53a   : > { %3958 = dma.vmem_to_hbm [thread:$0]  (%p6029_p5), %s5917_s24, 8192, %s5915_s0, %s3307_s25, %s4940_s17, %s4940_s17, %s4941_s6  }
 0x53b PF: > { %s6032_s10 = sld [smem:[#allocation28_spill]]  ;;  %s3378_s23 = sand.u32 1, %s4905_s29  }
 0x53c   : > { %p6034_p4 = scmp.ge.s32.totalorder %s4917_s16, 2  ;;  %s3379_s4 = scalar_lea.sflag [#allocation4], %s3378_s23 }
 0x541   : > { %p6033_p1 = scmp.ne.s32.totalorder %s6032_s10, 0 }
 0x543   : > { %p3988_p6 = pnand %p6034_p4, %p6033_p1 }
 0x545   : > { %p3989_p8 = pneg %p3988_p6 }
 0x547   : > { %4896 = dma.done.wait (%p3989_p8), %s3379_s4, 8192  }
 0x548   : > { %4898 = vsyncadd (%p3989_p8), %s3379_s4, 4294959104  ;;  %s6035_s19 = sadd.s32 4294967294, %s4917_s16  }
 0x549   : > { %s3387_s22 = sand.u32 1, %s6035_s19  }
 0x54a   : > { %s3388_s15 = scalar_lea.sflag [#allocation16], %s3387_s22 }
 0x54b   : > { %4900 = dma.done.wait (%p3989_p8), %s3388_s15, 4096  }
 0x54c   : > { %4902 = vsyncadd (%p3989_p8), %s3388_s15, 4294963200  ;;  %s6036_s16 = sld [smem:[#allocation26_spill]]  ;;  %s6039_s29 = smov %s4909_s30 }
 0x54d   : > { %s6037_s27 = sld [smem:[#allocation25_spill]] }
 0x54e   : > { %s6038_s15 = sld [smem:[#allocation27_spill]] }
 0x552   : > { %p36_p5 = scmp.ge.s32.totalorder %s6036_s16, 4  }
 0x553   : > { %s6040_s30 = smov %s6037_s27 }
 0x554   :  { %38 = sbr.rel (!%p36_p5) target bundleno = 20 (0x14), region = 178 }
 0x559   :  { %3402 = vsyncpa [#allocation3], 1 }
 0x55a   :  { %3404 = vsyncpa [#allocation3 + $0x1], 1 }
 0x55b   :  { %3405 = vsyncpa [#allocation6], 1 }
 0x55c   :  { %3407 = vsyncpa [#allocation6 + $0x1], 1 }
 0x55d   :  { %3408 = vsyncpa [#allocation9], 1 }
 0x55e   :  { %3409 = vsyncpa [#allocation12], 1 }
 0x55f   :  { %3410 = vsyncpa [#allocation4], 1 }
 0x560   :  { %3412 = vsyncpa [#allocation4 + $0x1], 1 }
 0x561   :  { %3413 = vsyncpa [#allocation16], 1 }
 0x562   :  { %3415 = vsyncpa [#allocation16 + $0x1], 1 }

</bundles_post_ra>
